<compile_context>
chip_gen: v5e
topology: v5e:2x2
jax: 0.10.0
libtpu: 0.0.40
codegen_flags: <defaults>
</compile_context>

<pallas_src>
import math
import functools

import jax
import jax.numpy as jnp
from jax.experimental import pallas as pl
from jax.experimental.pallas import tpu as pltpu

_LN_EPS = 1e-5
_VMEM_LIMIT = 32 * 1024 * 1024      # safe on v5e / v6e / v7x
_TILE_BUDGET = 20 * 1024 * 1024     # per-step working-set target (< limit)


# ----------------------------- kernel bodies -----------------------------

def _add_layernorm(x, y, g, b):
    """z = x + y; LayerNorm(z) over last axis (f32, biased variance)."""
    z = x + y
    mean = jnp.mean(z, axis=-1, keepdims=True)
    var = jnp.mean(jnp.square(z - mean), axis=-1, keepdims=True)
    zn = (z - mean) * jax.lax.rsqrt(var + _LN_EPS)
    return zn * g + b


def _attn_block_kernel(*refs, num_heads, with_pe):
    """Fused attention block: [PE add] + Q/KV projection + per-head SDPA +
    per-head accumulation through W_o + residual + LayerNorm.

    Self-attention passes the same activation as query source and K/V source;
    cross-attention passes the encoder output as K/V source. Softmax scale is
    pre-folded into W_q/b_q. Query rows are tiled by the grid; K/V see the full
    key sequence.
    """
    if with_pe:
        (xq_ref, pe_q_ref, kv_ref, pe_kv_ref, wq_ref, bq_ref, wkv_ref, bkv_ref,
         wo_ref, bo_ref, g_ref, b_ref, o_ref) = refs
    else:
        (xq_ref, kv_ref, wq_ref, bq_ref, wkv_ref, bkv_ref,
         wo_ref, bo_ref, g_ref, b_ref, o_ref) = refs
        pe_q_ref = pe_kv_ref = None

    D = xq_ref.shape[-1]
    dk = D // num_heads

    # Residual base / query rows (f32).
    xq = xq_ref[0].astype(jnp.float32)                       # (tq, D)
    if with_pe:
        xq = xq + pe_q_ref[...]

    # K/V source rows (bf16 for the MXU).
    if with_pe:
        kv_in = (kv_ref[0].astype(jnp.float32) + pe_kv_ref[...]).astype(jnp.bfloat16)
    else:
        kv_in = kv_ref[0]                                    # (S_kv, D) bf16

    # Projections (bf16 matmuls, f32 accumulation). Scale baked into wq/bq.
    q = jnp.dot(xq.astype(jnp.bfloat16), wq_ref[...],
                preferred_element_type=jnp.float32) + bq_ref[...]      # (tq, D)
    kv = jnp.dot(kv_in, wkv_ref[...],
                 preferred_element_type=jnp.float32) + bkv_ref[...]    # (S_kv, 2D)
    k = kv[:, :D]
    v = kv[:, D:]

    wo = wo_ref[...]                                          # (D, D) bf16
    acc = bo_ref[...]                                         # (1, D) f32, broadcasts

    for h in range(num_heads):                                # static unroll
        sl = slice(h * dk, (h + 1) * dk)
        qh = q[:, sl].astype(jnp.bfloat16)
        kh = k[:, sl].astype(jnp.bfloat16)
        vh = v[:, sl].astype(jnp.bfloat16)
        # q @ k^T without an explicit transpose: contract last dims of both.
        s = jax.lax.dot_general(qh, kh, (((1,), (1,)), ((), ())),
                                preferred_element_type=jnp.float32)    # (tq, S_kv)
        m = jnp.max(s, axis=-1, keepdims=True)
        p = jnp.exp(s - m)
        p = p * pl.reciprocal(jnp.sum(p, axis=-1, keepdims=True), approx=True)
        ctx_h = jnp.dot(p.astype(jnp.bfloat16), vh,
                        preferred_element_type=jnp.float32)            # (tq, dk)
        # Accumulate output projection per head: no lane concat.
        acc = acc + jnp.dot(ctx_h.astype(jnp.bfloat16), wo[sl, :],
                            preferred_element_type=jnp.float32)        # (tq, D)

    o_ref[0] = _add_layernorm(xq, acc, g_ref[...], b_ref[...]).astype(o_ref.dtype)


def _ffn_block_kernel(x_ref, w1_ref, b1_ref, w2_ref, b2_ref, g_ref, b_ref,
                      o_ref):
    """relu(x@W1+b1)@W2+b2 with residual + LayerNorm; hidden never leaves VMEM."""
    x = x_ref[...]                                            # (tm, D) bf16
    xf = x.astype(jnp.float32)
    h = jnp.dot(x, w1_ref[...],
                preferred_element_type=jnp.float32) + b1_ref[...]
    h = jnp.maximum(h, 0.0)
    y = jnp.dot(h.astype(jnp.bfloat16), w2_ref[...],
                preferred_element_type=jnp.float32) + b2_ref[...]
    o_ref[...] = _add_layernorm(xf, y, g_ref[...], b_ref[...]).astype(o_ref.dtype)


# ----------------------------- tile pickers -----------------------------

def _divisor_candidates(n):
    return [t for t in (1024, 512, 256, 128, 64, 32, 16, 8) if n % t == 0]


def _pick_ffn_tile(m, d_model, d_ff, budget=_TILE_BUDGET):
    """Largest row tile whose FFN working set (hidden f32 + double-buffered
    bf16 tiles + double-buffered bf16 weights) fits the VMEM budget."""
    cands = _divisor_candidates(m)
    if not cands:
        return m
    weight_bytes = 2 * 2 * (d_model * d_ff + d_ff * d_model)          # bf16, 2x buf
    for tm in cands:
        tiles = 2 * (tm * d_model * 2) * 2                            # in+out bf16, 2x buf
        hidden = 2 * (tm * d_ff * 4)                                   # f32 hidden (+relu)
        if weight_bytes + tiles + hidden < budget:
            return tm
    return cands[-1]


def _pick_q_tile(s_q, s_kv, d_model, budget=_TILE_BUDGET):
    """Largest query-row tile whose attention working set fits the VMEM budget."""
    cands = _divisor_candidates(s_q)
    if not cands:
        return s_q
    weight_bytes = 2 * 2 * (d_model * d_model + d_model * 2 * d_model
                            + d_model * d_model)                       # wq+wkv+wo bf16, 2x buf
    kv_bytes = 2 * (s_kv * d_model * 2) + s_kv * 2 * d_model * 4       # kv src + kv proj
    for tq in cands:
        q_bytes = 2 * (tq * d_model * 2) * 2 + tq * d_model * 4        # in+out tiles + q proj
        score_bytes = 2 * (tq * s_kv * 4)                              # scores + exp (f32)
        if weight_bytes + kv_bytes + q_bytes + score_bytes < budget:
            return tq
    return cands[-1]


# ----------------------------- pallas_call wrappers -----------------------------

def attention_block(xq_src, kv_src, p, num_heads, pe=None):
    """Fused attention + residual + LayerNorm. Self-attn: kv_src is xq_src.
    pe (S, D) f32 is only passed for the first layer's self-attention."""
    B, S, D = xq_src.shape
    S_kv = kv_src.shape[1]
    tq = _pick_q_tile(S, S_kv, D)
    with_pe = pe is not None
    kern = functools.partial(_attn_block_kernel, num_heads=num_heads,
                             with_pe=with_pe)

    in_specs = [pl.BlockSpec((1, tq, D), lambda b, qi: (b, qi, 0))]     # query rows
    args = [xq_src]
    if with_pe:
        in_specs.append(pl.BlockSpec((tq, D), lambda b, qi: (qi, 0)))   # pe (query rows)
        args.append(pe)
    in_specs.append(pl.BlockSpec((1, S_kv, D), lambda b, qi: (b, 0, 0)))  # K/V source
    args.append(kv_src)
    if with_pe:
        in_specs.append(pl.BlockSpec((S_kv, D), lambda b, qi: (0, 0)))  # pe (kv rows)
        args.append(pe)
    in_specs += [
        pl.BlockSpec((D, D), lambda b, qi: (0, 0)),        # wq (bf16, scale folded)
        pl.BlockSpec((1, D), lambda b, qi: (0, 0)),        # bq
        pl.BlockSpec((D, 2 * D), lambda b, qi: (0, 0)),    # wkv (bf16)
        pl.BlockSpec((1, 2 * D), lambda b, qi: (0, 0)),    # bkv
        pl.BlockSpec((D, D), lambda b, qi: (0, 0)),        # wo (bf16)
        pl.BlockSpec((1, D), lambda b, qi: (0, 0)),        # bo
        pl.BlockSpec((1, D), lambda b, qi: (0, 0)),        # ln gamma
        pl.BlockSpec((1, D), lambda b, qi: (0, 0)),        # ln beta
    ]
    args += [p["wq"], p["bq"], p["wkv"], p["bkv"], p["wo"], p["bo"],
             p["ln_g"], p["ln_b"]]

    return pl.pallas_call(
        kern,
        out_shape=jax.ShapeDtypeStruct((B, S, D), jnp.bfloat16),
        grid=(B, S // tq),
        in_specs=in_specs,
        out_specs=pl.BlockSpec((1, tq, D), lambda b, qi: (b, qi, 0)),
        compiler_params=pltpu.CompilerParams(
            dimension_semantics=("parallel", "parallel"),
            vmem_limit_bytes=_VMEM_LIMIT),
    )(*args)


def ffn_block(x2d, p):
    M, D = x2d.shape
    d_ff = p["w1"].shape[1]
    tm = _pick_ffn_tile(M, D, d_ff)
    return pl.pallas_call(
        _ffn_block_kernel,
        out_shape=jax.ShapeDtypeStruct((M, D), jnp.bfloat16),
        grid=(M // tm,),
        in_specs=[
            pl.BlockSpec((tm, D), lambda i: (i, 0)),           # x (bf16)
            pl.BlockSpec((D, d_ff), lambda i: (0, 0)),         # w1 (bf16)
            pl.BlockSpec((1, d_ff), lambda i: (0, 0)),         # b1
            pl.BlockSpec((d_ff, D), lambda i: (0, 0)),         # w2 (bf16)
            pl.BlockSpec((1, D), lambda i: (0, 0)),            # b2
            pl.BlockSpec((1, D), lambda i: (0, 0)),            # ln gamma
            pl.BlockSpec((1, D), lambda i: (0, 0)),            # ln beta
        ],
        out_specs=pl.BlockSpec((tm, D), lambda i: (i, 0)),
        compiler_params=pltpu.CompilerParams(
            dimension_semantics=("parallel",),
            vmem_limit_bytes=_VMEM_LIMIT),
    )(x2d, p["w1"], p["b1"], p["w2"], p["b2"], p["ln_g"], p["ln_b"])


# ----------------------------- params / model glue -----------------------------

def make_positional_encoding(max_len, d_model):
    position = jnp.arange(max_len, dtype=jnp.float32)[:, None]
    div_term = jnp.exp(
        jnp.arange(0, d_model, 2, dtype=jnp.float32)
        * (-math.log(10000.0) / d_model))
    pe = jnp.zeros((max_len, d_model), jnp.float32)
    pe = pe.at[:, 0::2].set(jnp.sin(position * div_term))
    pe = pe.at[:, 1::2].set(jnp.cos(position * div_term))
    return pe


def _init_linear(key, d_in, d_out):
    # PyTorch nn.Linear default: U(-1/sqrt(d_in), 1/sqrt(d_in))
    kw, kb = jax.random.split(key)
    bound = 1.0 / math.sqrt(d_in)
    w = jax.random.uniform(kw, (d_in, d_out), jnp.float32, -bound, bound)
    b = jax.random.uniform(kb, (1, d_out), jnp.float32, -bound, bound)
    return w, b


def _init_attn(key, d_model, num_heads):
    dk = d_model // num_heads
    scale = 1.0 / math.sqrt(dk)
    kq, kk, kv, ko = jax.random.split(key, 4)
    wq, bq = _init_linear(kq, d_model, d_model)
    wk, bk = _init_linear(kk, d_model, d_model)
    wv, bv = _init_linear(kv, d_model, d_model)
    wo, bo = _init_linear(ko, d_model, d_model)
    return {
        # softmax scale folded into the query projection
        "wq": (wq * scale).astype(jnp.bfloat16), "bq": bq * scale,
        "wkv": jnp.concatenate([wk, wv], axis=1).astype(jnp.bfloat16),
        "bkv": jnp.concatenate([bk, bv], axis=1),
        "wo": wo.astype(jnp.bfloat16), "bo": bo,
        "ln_g": jnp.ones((1, d_model), jnp.float32),
        "ln_b": jnp.zeros((1, d_model), jnp.float32),
    }


def _init_ffn(key, d_model, d_ff):
    k1, k2 = jax.random.split(key)
    w1, b1 = _init_linear(k1, d_model, d_ff)
    w2, b2 = _init_linear(k2, d_ff, d_model)
    return {
        "w1": w1.astype(jnp.bfloat16), "b1": b1,
        "w2": w2.astype(jnp.bfloat16), "b2": b2,
        "ln_g": jnp.ones((1, d_model), jnp.float32),
        "ln_b": jnp.zeros((1, d_model), jnp.float32),
    }


def init_layer_params(key, d_model, num_heads, d_ff):
    k1, k2, k3 = jax.random.split(key, 3)
    return {
        "self_attn": _init_attn(k1, d_model, num_heads),
        "cross_attn": _init_attn(k2, d_model, num_heads),
        "ffn": _init_ffn(k3, d_model, d_ff),
    }


def decoder_layer(p, x, enc_output, num_heads, pe=None):
    B, S, D = x.shape
    x = attention_block(x, x, p["self_attn"], num_heads, pe=pe)     # self-attn (+PE, layer 0)
    x = attention_block(x, enc_output, p["cross_attn"], num_heads)  # cross-attn
    x = ffn_block(x.reshape(B * S, D), p["ffn"]).reshape(B, S, D)   # FFN
    return x


def transformer_decoder(params, x, enc_output, num_heads):
    S = x.shape[1]
    pe = params["pe"][:S, :]
    xb = x.astype(jnp.bfloat16)            # bf16 inter-block activations
    enc = enc_output.astype(jnp.bfloat16)
    if not params["layers"]:               # degenerate no-layer case
        return x + pe[None, :, :]
    for i, layer_params in enumerate(params["layers"]):
        xb = decoder_layer(layer_params, xb, enc, num_heads,
                           pe=pe if i == 0 else None)
    return xb.astype(jnp.float32)


# ----------------------------- main -----------------------------

if __name__ == "__main__":
    batch_size = 2
    seq_len = 8
    d_model = 32
    num_heads = 4
    d_ff = 64
    num_layers = 2
    max_len = 64

    root = jax.random.PRNGKey(0)
    k_x, k_enc, k_params = jax.random.split(root, 3)

    x = jax.random.normal(k_x, (batch_size, seq_len, d_model), jnp.float32)
    enc_output = jax.random.normal(k_enc, (batch_size, seq_len, d_model),
                                   jnp.float32)

    layer_keys = jax.random.split(k_params, num_layers)
    params = {
        "pe": make_positional_encoding(max_len, d_model),
        "layers": [init_layer_params(layer_keys[i], d_model, num_heads, d_ff)
                   for i in range(num_layers)],
    }

    fwd = jax.jit(functools.partial(transformer_decoder, num_heads=num_heads))
    out = fwd(params, x, enc_output)
    out = jax.block_until_ready(out)

    assert out.shape == (batch_size, seq_len, d_model)
    assert jnp.all(jnp.isfinite(out))
    print("KERNEL_OK")
</pallas_src>

<mosaic_0001>
module attributes {stable_mosaic.version = 11 : i64} {
  func.func @_attn_block_kernel(%arg0: i32, %arg1: i32, %arg2: memref<1x8x32xbf16, #tpu.memory_space<vmem>>, %arg3: memref<1x8x32xbf16, #tpu.memory_space<vmem>>, %arg4: memref<32x32xbf16, #tpu.memory_space<vmem>>, %arg5: memref<1x32xf32, #tpu.memory_space<vmem>>, %arg6: memref<32x64xbf16, #tpu.memory_space<vmem>>, %arg7: memref<1x64xf32, #tpu.memory_space<vmem>>, %arg8: memref<32x32xbf16, #tpu.memory_space<vmem>>, %arg9: memref<1x32xf32, #tpu.memory_space<vmem>>, %arg10: memref<1x32xf32, #tpu.memory_space<vmem>>, %arg11: memref<1x32xf32, #tpu.memory_space<vmem>>, %arg12: memref<1x8x32xbf16, #tpu.memory_space<vmem>>) attributes {dimension_semantics = [#tpu.dimension_semantics<parallel>, #tpu.dimension_semantics<parallel>], iteration_bounds = array<i64: 2, 1>, scalar_prefetch = 0 : i64, scratch_operands = 0 : i64, tpu.core_type = #tpu.core_type<tc>, window_params = [{transform_indices = @transform_0, window_bounds = array<i64: 1, 8, 32>}, {transform_indices = @transform_1, window_bounds = array<i64: 1, 8, 32>}, {pipeline_mode = #tpu.pipeline_mode<synchronous>, transform_indices = @transform_2, window_bounds = array<i64: 32, 32>}, {pipeline_mode = #tpu.pipeline_mode<synchronous>, transform_indices = @transform_3, window_bounds = array<i64: 1, 32>}, {pipeline_mode = #tpu.pipeline_mode<synchronous>, transform_indices = @transform_4, window_bounds = array<i64: 32, 64>}, {pipeline_mode = #tpu.pipeline_mode<synchronous>, transform_indices = @transform_5, window_bounds = array<i64: 1, 64>}, {pipeline_mode = #tpu.pipeline_mode<synchronous>, transform_indices = @transform_6, window_bounds = array<i64: 32, 32>}, {pipeline_mode = #tpu.pipeline_mode<synchronous>, transform_indices = @transform_7, window_bounds = array<i64: 1, 32>}, {pipeline_mode = #tpu.pipeline_mode<synchronous>, transform_indices = @transform_8, window_bounds = array<i64: 1, 32>}, {pipeline_mode = #tpu.pipeline_mode<synchronous>, transform_indices = @transform_9, window_bounds = array<i64: 1, 32>}, {transform_indices = @transform_10, window_bounds = array<i64: 1, 8, 32>}]} {
    %c0 = arith.constant 0 : index
    %c0_0 = arith.constant 0 : index
    %c0_1 = arith.constant 0 : index
    %0 = vector.load %arg2[%c0, %c0_0, %c0_1] : memref<1x8x32xbf16, #tpu.memory_space<vmem>>, vector<1x8x32xbf16>
    %1 = vector.shape_cast %0 : vector<1x8x32xbf16> to vector<8x32xbf16>
    %2 = arith.extf %1 : vector<8x32xbf16> to vector<8x32xf32>
    %c0_2 = arith.constant 0 : index
    %c0_3 = arith.constant 0 : index
    %c0_4 = arith.constant 0 : index
    %3 = vector.load %arg3[%c0_2, %c0_3, %c0_4] : memref<1x8x32xbf16, #tpu.memory_space<vmem>>, vector<1x8x32xbf16>
    %4 = vector.shape_cast %3 : vector<1x8x32xbf16> to vector<8x32xbf16>
    %5 = arith.truncf %2 : vector<8x32xf32> to vector<8x32xbf16>
    %c0_5 = arith.constant 0 : index
    %c0_6 = arith.constant 0 : index
    %6 = vector.load %arg4[%c0_5, %c0_6] : memref<32x32xbf16, #tpu.memory_space<vmem>>, vector<32x32xbf16>
    %cst = arith.constant dense<0.000000e+00> : vector<8x32xf32>
    %7 = tpu.matmul %5, %6, %cst {dimension_numbers = #tpu.dot_dimension_numbers<[1], [0], [0], [1], [0, 0, 1, 1], [], []>} : vector<8x32xbf16>, vector<32x32xbf16>, vector<8x32xf32> -> vector<8x32xf32>
    %c0_7 = arith.constant 0 : index
    %c0_8 = arith.constant 0 : index
    %8 = vector.load %arg5[%c0_7, %c0_8] : memref<1x32xf32, #tpu.memory_space<vmem>>, vector<1x32xf32>
    %9 = vector.broadcast %8 : vector<1x32xf32> to vector<8x32xf32>
    %10 = arith.addf %7, %9 : vector<8x32xf32>
    %c0_9 = arith.constant 0 : index
    %c0_10 = arith.constant 0 : index
    %11 = vector.load %arg6[%c0_9, %c0_10] : memref<32x64xbf16, #tpu.memory_space<vmem>>, vector<32x64xbf16>
    %cst_11 = arith.constant dense<0.000000e+00> : vector<8x64xf32>
    %12 = tpu.matmul %4, %11, %cst_11 {dimension_numbers = #tpu.dot_dimension_numbers<[1], [0], [0], [1], [0, 0, 1, 1], [], []>} : vector<8x32xbf16>, vector<32x64xbf16>, vector<8x64xf32> -> vector<8x64xf32>
    %c0_12 = arith.constant 0 : index
    %c0_13 = arith.constant 0 : index
    %13 = vector.load %arg7[%c0_12, %c0_13] : memref<1x64xf32, #tpu.memory_space<vmem>>, vector<1x64xf32>
    %14 = vector.broadcast %13 : vector<1x64xf32> to vector<8x64xf32>
    %15 = arith.addf %12, %14 : vector<8x64xf32>
    %16 = vector.extract_strided_slice %15 {offsets = [0, 0], sizes = [8, 32], strides = [1, 1]} : vector<8x64xf32> to vector<8x32xf32>
    %17 = vector.extract_strided_slice %15 {offsets = [0, 32], sizes = [8, 32], strides = [1, 1]} : vector<8x64xf32> to vector<8x32xf32>
    %c0_14 = arith.constant 0 : index
    %c0_15 = arith.constant 0 : index
    %18 = vector.load %arg8[%c0_14, %c0_15] : memref<32x32xbf16, #tpu.memory_space<vmem>>, vector<32x32xbf16>
    %c0_16 = arith.constant 0 : index
    %c0_17 = arith.constant 0 : index
    %19 = vector.load %arg9[%c0_16, %c0_17] : memref<1x32xf32, #tpu.memory_space<vmem>>, vector<1x32xf32>
    %20 = vector.extract_strided_slice %10 {offsets = [0, 0], sizes = [8, 8], strides = [1, 1]} : vector<8x32xf32> to vector<8x8xf32>
    %21 = arith.truncf %20 : vector<8x8xf32> to vector<8x8xbf16>
    %22 = vector.extract_strided_slice %16 {offsets = [0, 0], sizes = [8, 8], strides = [1, 1]} : vector<8x32xf32> to vector<8x8xf32>
    %23 = arith.truncf %22 : vector<8x8xf32> to vector<8x8xbf16>
    %24 = vector.extract_strided_slice %17 {offsets = [0, 0], sizes = [8, 8], strides = [1, 1]} : vector<8x32xf32> to vector<8x8xf32>
    %25 = arith.truncf %24 : vector<8x8xf32> to vector<8x8xbf16>
    %cst_18 = arith.constant dense<0.000000e+00> : vector<8x8xf32>
    %26 = tpu.matmul %21, %23, %cst_18 {dimension_numbers = #tpu.dot_dimension_numbers<[1], [1], [0], [0], [0, 0, 1, 0], [], []>} : vector<8x8xbf16>, vector<8x8xbf16>, vector<8x8xf32> -> vector<8x8xf32>
    %cst_19 = arith.constant dense<0xFF800000> : vector<8xf32>
    %27 = vector.multi_reduction <maximumf>, %26, %cst_19 [1] : vector<8x8xf32> to vector<8xf32>
    %28 = vector.shape_cast %27 : vector<8xf32> to vector<8x1xf32>
    %29 = vector.broadcast %28 : vector<8x1xf32> to vector<8x8xf32>
    %30 = arith.subf %26, %29 : vector<8x8xf32>
    %31 = math.exp %30 : vector<8x8xf32>
    %cst_20 = arith.constant dense<0.000000e+00> : vector<8xf32>
    %32 = vector.multi_reduction <add>, %31, %cst_20 [1] : vector<8x8xf32> to vector<8xf32>
    %33 = vector.shape_cast %32 : vector<8xf32> to vector<8x1xf32>
    %34 = tpu.reciprocal %33 {approx = true} : vector<8x1xf32> -> vector<8x1xf32>
    %35 = vector.broadcast %34 : vector<8x1xf32> to vector<8x8xf32>
    %36 = arith.mulf %31, %35 : vector<8x8xf32>
    %37 = arith.truncf %36 : vector<8x8xf32> to vector<8x8xbf16>
    %cst_21 = arith.constant dense<0.000000e+00> : vector<8x8xf32>
    %38 = tpu.matmul %37, %25, %cst_21 {dimension_numbers = #tpu.dot_dimension_numbers<[1], [0], [0], [1], [0, 0, 1, 1], [], []>} : vector<8x8xbf16>, vector<8x8xbf16>, vector<8x8xf32> -> vector<8x8xf32>
    %39 = arith.truncf %38 : vector<8x8xf32> to vector<8x8xbf16>
    %40 = vector.extract_strided_slice %18 {offsets = [0, 0], sizes = [8, 32], strides = [1, 1]} : vector<32x32xbf16> to vector<8x32xbf16>
    %cst_22 = arith.constant dense<0.000000e+00> : vector<8x32xf32>
    %41 = tpu.matmul %39, %40, %cst_22 {dimension_numbers = #tpu.dot_dimension_numbers<[1], [0], [0], [1], [0, 0, 1, 1], [], []>} : vector<8x8xbf16>, vector<8x32xbf16>, vector<8x32xf32> -> vector<8x32xf32>
    %42 = vector.broadcast %19 : vector<1x32xf32> to vector<8x32xf32>
    %43 = arith.addf %42, %41 : vector<8x32xf32>
    %44 = vector.extract_strided_slice %10 {offsets = [0, 8], sizes = [8, 8], strides = [1, 1]} : vector<8x32xf32> to vector<8x8xf32>
    %45 = arith.truncf %44 : vector<8x8xf32> to vector<8x8xbf16>
    %46 = vector.extract_strided_slice %16 {offsets = [0, 8], sizes = [8, 8], strides = [1, 1]} : vector<8x32xf32> to vector<8x8xf32>
    %47 = arith.truncf %46 : vector<8x8xf32> to vector<8x8xbf16>
    %48 = vector.extract_strided_slice %17 {offsets = [0, 8], sizes = [8, 8], strides = [1, 1]} : vector<8x32xf32> to vector<8x8xf32>
    %49 = arith.truncf %48 : vector<8x8xf32> to vector<8x8xbf16>
    %cst_23 = arith.constant dense<0.000000e+00> : vector<8x8xf32>
    %50 = tpu.matmul %45, %47, %cst_23 {dimension_numbers = #tpu.dot_dimension_numbers<[1], [1], [0], [0], [0, 0, 1, 0], [], []>} : vector<8x8xbf16>, vector<8x8xbf16>, vector<8x8xf32> -> vector<8x8xf32>
    %cst_24 = arith.constant dense<0xFF800000> : vector<8xf32>
    %51 = vector.multi_reduction <maximumf>, %50, %cst_24 [1] : vector<8x8xf32> to vector<8xf32>
    %52 = vector.shape_cast %51 : vector<8xf32> to vector<8x1xf32>
    %53 = vector.broadcast %52 : vector<8x1xf32> to vector<8x8xf32>
    %54 = arith.subf %50, %53 : vector<8x8xf32>
    %55 = math.exp %54 : vector<8x8xf32>
    %cst_25 = arith.constant dense<0.000000e+00> : vector<8xf32>
    %56 = vector.multi_reduction <add>, %55, %cst_25 [1] : vector<8x8xf32> to vector<8xf32>
    %57 = vector.shape_cast %56 : vector<8xf32> to vector<8x1xf32>
    %58 = tpu.reciprocal %57 {approx = true} : vector<8x1xf32> -> vector<8x1xf32>
    %59 = vector.broadcast %58 : vector<8x1xf32> to vector<8x8xf32>
    %60 = arith.mulf %55, %59 : vector<8x8xf32>
    %61 = arith.truncf %60 : vector<8x8xf32> to vector<8x8xbf16>
    %cst_26 = arith.constant dense<0.000000e+00> : vector<8x8xf32>
    %62 = tpu.matmul %61, %49, %cst_26 {dimension_numbers = #tpu.dot_dimension_numbers<[1], [0], [0], [1], [0, 0, 1, 1], [], []>} : vector<8x8xbf16>, vector<8x8xbf16>, vector<8x8xf32> -> vector<8x8xf32>
    %63 = arith.truncf %62 : vector<8x8xf32> to vector<8x8xbf16>
    %64 = vector.extract_strided_slice %18 {offsets = [8, 0], sizes = [8, 32], strides = [1, 1]} : vector<32x32xbf16> to vector<8x32xbf16>
    %cst_27 = arith.constant dense<0.000000e+00> : vector<8x32xf32>
    %65 = tpu.matmul %63, %64, %cst_27 {dimension_numbers = #tpu.dot_dimension_numbers<[1], [0], [0], [1], [0, 0, 1, 1], [], []>} : vector<8x8xbf16>, vector<8x32xbf16>, vector<8x32xf32> -> vector<8x32xf32>
    %66 = arith.addf %43, %65 : vector<8x32xf32>
    %67 = vector.extract_strided_slice %10 {offsets = [0, 16], sizes = [8, 8], strides = [1, 1]} : vector<8x32xf32> to vector<8x8xf32>
    %68 = arith.truncf %67 : vector<8x8xf32> to vector<8x8xbf16>
    %69 = vector.extract_strided_slice %16 {offsets = [0, 16], sizes = [8, 8], strides = [1, 1]} : vector<8x32xf32> to vector<8x8xf32>
    %70 = arith.truncf %69 : vector<8x8xf32> to vector<8x8xbf16>
    %71 = vector.extract_strided_slice %17 {offsets = [0, 16], sizes = [8, 8], strides = [1, 1]} : vector<8x32xf32> to vector<8x8xf32>
    %72 = arith.truncf %71 : vector<8x8xf32> to vector<8x8xbf16>
    %cst_28 = arith.constant dense<0.000000e+00> : vector<8x8xf32>
    %73 = tpu.matmul %68, %70, %cst_28 {dimension_numbers = #tpu.dot_dimension_numbers<[1], [1], [0], [0], [0, 0, 1, 0], [], []>} : vector<8x8xbf16>, vector<8x8xbf16>, vector<8x8xf32> -> vector<8x8xf32>
    %cst_29 = arith.constant dense<0xFF800000> : vector<8xf32>
    %74 = vector.multi_reduction <maximumf>, %73, %cst_29 [1] : vector<8x8xf32> to vector<8xf32>
    %75 = vector.shape_cast %74 : vector<8xf32> to vector<8x1xf32>
    %76 = vector.broadcast %75 : vector<8x1xf32> to vector<8x8xf32>
    %77 = arith.subf %73, %76 : vector<8x8xf32>
    %78 = math.exp %77 : vector<8x8xf32>
    %cst_30 = arith.constant dense<0.000000e+00> : vector<8xf32>
    %79 = vector.multi_reduction <add>, %78, %cst_30 [1] : vector<8x8xf32> to vector<8xf32>
    %80 = vector.shape_cast %79 : vector<8xf32> to vector<8x1xf32>
    %81 = tpu.reciprocal %80 {approx = true} : vector<8x1xf32> -> vector<8x1xf32>
    %82 = vector.broadcast %81 : vector<8x1xf32> to vector<8x8xf32>
    %83 = arith.mulf %78, %82 : vector<8x8xf32>
    %84 = arith.truncf %83 : vector<8x8xf32> to vector<8x8xbf16>
    %cst_31 = arith.constant dense<0.000000e+00> : vector<8x8xf32>
    %85 = tpu.matmul %84, %72, %cst_31 {dimension_numbers = #tpu.dot_dimension_numbers<[1], [0], [0], [1], [0, 0, 1, 1], [], []>} : vector<8x8xbf16>, vector<8x8xbf16>, vector<8x8xf32> -> vector<8x8xf32>
    %86 = arith.truncf %85 : vector<8x8xf32> to vector<8x8xbf16>
    %87 = vector.extract_strided_slice %18 {offsets = [16, 0], sizes = [8, 32], strides = [1, 1]} : vector<32x32xbf16> to vector<8x32xbf16>
    %cst_32 = arith.constant dense<0.000000e+00> : vector<8x32xf32>
    %88 = tpu.matmul %86, %87, %cst_32 {dimension_numbers = #tpu.dot_dimension_numbers<[1], [0], [0], [1], [0, 0, 1, 1], [], []>} : vector<8x8xbf16>, vector<8x32xbf16>, vector<8x32xf32> -> vector<8x32xf32>
    %89 = arith.addf %66, %88 : vector<8x32xf32>
    %90 = vector.extract_strided_slice %10 {offsets = [0, 24], sizes = [8, 8], strides = [1, 1]} : vector<8x32xf32> to vector<8x8xf32>
    %91 = arith.truncf %90 : vector<8x8xf32> to vector<8x8xbf16>
    %92 = vector.extract_strided_slice %16 {offsets = [0, 24], sizes = [8, 8], strides = [1, 1]} : vector<8x32xf32> to vector<8x8xf32>
    %93 = arith.truncf %92 : vector<8x8xf32> to vector<8x8xbf16>
    %94 = vector.extract_strided_slice %17 {offsets = [0, 24], sizes = [8, 8], strides = [1, 1]} : vector<8x32xf32> to vector<8x8xf32>
    %95 = arith.truncf %94 : vector<8x8xf32> to vector<8x8xbf16>
    %cst_33 = arith.constant dense<0.000000e+00> : vector<8x8xf32>
    %96 = tpu.matmul %91, %93, %cst_33 {dimension_numbers = #tpu.dot_dimension_numbers<[1], [1], [0], [0], [0, 0, 1, 0], [], []>} : vector<8x8xbf16>, vector<8x8xbf16>, vector<8x8xf32> -> vector<8x8xf32>
    %cst_34 = arith.constant dense<0xFF800000> : vector<8xf32>
    %97 = vector.multi_reduction <maximumf>, %96, %cst_34 [1] : vector<8x8xf32> to vector<8xf32>
    %98 = vector.shape_cast %97 : vector<8xf32> to vector<8x1xf32>
    %99 = vector.broadcast %98 : vector<8x1xf32> to vector<8x8xf32>
    %100 = arith.subf %96, %99 : vector<8x8xf32>
    %101 = math.exp %100 : vector<8x8xf32>
    %cst_35 = arith.constant dense<0.000000e+00> : vector<8xf32>
    %102 = vector.multi_reduction <add>, %101, %cst_35 [1] : vector<8x8xf32> to vector<8xf32>
    %103 = vector.shape_cast %102 : vector<8xf32> to vector<8x1xf32>
    %104 = tpu.reciprocal %103 {approx = true} : vector<8x1xf32> -> vector<8x1xf32>
    %105 = vector.broadcast %104 : vector<8x1xf32> to vector<8x8xf32>
    %106 = arith.mulf %101, %105 : vector<8x8xf32>
    %107 = arith.truncf %106 : vector<8x8xf32> to vector<8x8xbf16>
    %cst_36 = arith.constant dense<0.000000e+00> : vector<8x8xf32>
    %108 = tpu.matmul %107, %95, %cst_36 {dimension_numbers = #tpu.dot_dimension_numbers<[1], [0], [0], [1], [0, 0, 1, 1], [], []>} : vector<8x8xbf16>, vector<8x8xbf16>, vector<8x8xf32> -> vector<8x8xf32>
    %109 = arith.truncf %108 : vector<8x8xf32> to vector<8x8xbf16>
    %110 = vector.extract_strided_slice %18 {offsets = [24, 0], sizes = [8, 32], strides = [1, 1]} : vector<32x32xbf16> to vector<8x32xbf16>
    %cst_37 = arith.constant dense<0.000000e+00> : vector<8x32xf32>
    %111 = tpu.matmul %109, %110, %cst_37 {dimension_numbers = #tpu.dot_dimension_numbers<[1], [0], [0], [1], [0, 0, 1, 1], [], []>} : vector<8x8xbf16>, vector<8x32xbf16>, vector<8x32xf32> -> vector<8x32xf32>
    %112 = arith.addf %89, %111 : vector<8x32xf32>
    %c0_38 = arith.constant 0 : index
    %c0_39 = arith.constant 0 : index
    %113 = vector.load %arg10[%c0_38, %c0_39] : memref<1x32xf32, #tpu.memory_space<vmem>>, vector<1x32xf32>
    %c0_40 = arith.constant 0 : index
    %c0_41 = arith.constant 0 : index
    %114 = vector.load %arg11[%c0_40, %c0_41] : memref<1x32xf32, #tpu.memory_space<vmem>>, vector<1x32xf32>
    %115 = arith.addf %2, %112 : vector<8x32xf32>
    %cst_42 = arith.constant dense<0.000000e+00> : vector<8xf32>
    %116 = vector.multi_reduction <add>, %115, %cst_42 [1] : vector<8x32xf32> to vector<8xf32>
    %117 = vector.shape_cast %116 : vector<8xf32> to vector<8x1xf32>
    %cst_43 = arith.constant 3.200000e+01 : f32
    %118 = vector.broadcast %cst_43 : f32 to vector<8x1xf32>
    %119 = arith.divf %117, %118 : vector<8x1xf32>
    %120 = vector.broadcast %119 : vector<8x1xf32> to vector<8x32xf32>
    %121 = arith.subf %115, %120 : vector<8x32xf32>
    %122 = arith.mulf %121, %121 : vector<8x32xf32>
    %cst_44 = arith.constant dense<0.000000e+00> : vector<8xf32>
    %123 = vector.multi_reduction <add>, %122, %cst_44 [1] : vector<8x32xf32> to vector<8xf32>
    %124 = vector.shape_cast %123 : vector<8xf32> to vector<8x1xf32>
    %cst_45 = arith.constant 3.200000e+01 : f32
    %125 = vector.broadcast %cst_45 : f32 to vector<8x1xf32>
    %126 = arith.divf %124, %125 : vector<8x1xf32>
    %127 = vector.broadcast %119 : vector<8x1xf32> to vector<8x32xf32>
    %128 = arith.subf %115, %127 : vector<8x32xf32>
    %cst_46 = arith.constant 9.99999974E-6 : f32
    %129 = vector.broadcast %cst_46 : f32 to vector<8x1xf32>
    %130 = arith.addf %126, %129 : vector<8x1xf32>
    %131 = math.rsqrt %130 : vector<8x1xf32>
    %132 = vector.broadcast %131 : vector<8x1xf32> to vector<8x32xf32>
    %133 = arith.mulf %128, %132 : vector<8x32xf32>
    %134 = vector.broadcast %113 : vector<1x32xf32> to vector<8x32xf32>
    %135 = arith.mulf %133, %134 : vector<8x32xf32>
    %136 = vector.broadcast %114 : vector<1x32xf32> to vector<8x32xf32>
    %137 = arith.addf %135, %136 : vector<8x32xf32>
    %138 = arith.truncf %137 : vector<8x32xf32> to vector<8x32xbf16>
    %c0_47 = arith.constant 0 : index
    %c0_48 = arith.constant 0 : index
    %c0_49 = arith.constant 0 : index
    %139 = vector.load %arg12[%c0_47, %c0_48, %c0_49] : memref<1x8x32xbf16, #tpu.memory_space<vmem>>, vector<1x8x32xbf16>
    %140 = vector.shape_cast %139 : vector<1x8x32xbf16> to vector<8x32xbf16>
    %141 = vector.shape_cast %138 : vector<8x32xbf16> to vector<1x8x32xbf16>
    tpu.vector_store %arg12[%c0_47, %c0_48, %c0_49], %141 {strides = array<i32>} : memref<1x8x32xbf16, #tpu.memory_space<vmem>>, vector<1x8x32xbf16>,
    return
  }
  func.func @transform_0(%arg0: i32, %arg1: i32) -> (i32, i32, i32) {
    %c0_i32 = arith.constant 0 : i32
    %c0_i32_0 = arith.constant 0 : i32
    return %arg0, %arg1, %c0_i32 : i32, i32, i32
  }
  func.func @transform_1(%arg0: i32, %arg1: i32) -> (i32, i32, i32) {
    %c0_i32 = arith.constant 0 : i32
    %c0_i32_0 = arith.constant 0 : i32
    %c0_i32_1 = arith.constant 0 : i32
    return %arg0, %c0_i32, %c0_i32_0 : i32, i32, i32
  }
  func.func @transform_2(%arg0: i32, %arg1: i32) -> (i32, i32) {
    %c0_i32 = arith.constant 0 : i32
    %c0_i32_0 = arith.constant 0 : i32
    %c0_i32_1 = arith.constant 0 : i32
    return %c0_i32, %c0_i32_0 : i32, i32
  }
  func.func @transform_3(%arg0: i32, %arg1: i32) -> (i32, i32) {
    %c0_i32 = arith.constant 0 : i32
    %c0_i32_0 = arith.constant 0 : i32
    %c0_i32_1 = arith.constant 0 : i32
    return %c0_i32, %c0_i32_0 : i32, i32
  }
  func.func @transform_4(%arg0: i32, %arg1: i32) -> (i32, i32) {
    %c0_i32 = arith.constant 0 : i32
    %c0_i32_0 = arith.constant 0 : i32
    %c0_i32_1 = arith.constant 0 : i32
    return %c0_i32, %c0_i32_0 : i32, i32
  }
  func.func @transform_5(%arg0: i32, %arg1: i32) -> (i32, i32) {
    %c0_i32 = arith.constant 0 : i32
    %c0_i32_0 = arith.constant 0 : i32
    %c0_i32_1 = arith.constant 0 : i32
    return %c0_i32, %c0_i32_0 : i32, i32
  }
  func.func @transform_6(%arg0: i32, %arg1: i32) -> (i32, i32) {
    %c0_i32 = arith.constant 0 : i32
    %c0_i32_0 = arith.constant 0 : i32
    %c0_i32_1 = arith.constant 0 : i32
    return %c0_i32, %c0_i32_0 : i32, i32
  }
  func.func @transform_7(%arg0: i32, %arg1: i32) -> (i32, i32) {
    %c0_i32 = arith.constant 0 : i32
    %c0_i32_0 = arith.constant 0 : i32
    %c0_i32_1 = arith.constant 0 : i32
    return %c0_i32, %c0_i32_0 : i32, i32
  }
  func.func @transform_8(%arg0: i32, %arg1: i32) -> (i32, i32) {
    %c0_i32 = arith.constant 0 : i32
    %c0_i32_0 = arith.constant 0 : i32
    %c0_i32_1 = arith.constant 0 : i32
    return %c0_i32, %c0_i32_0 : i32, i32
  }
  func.func @transform_9(%arg0: i32, %arg1: i32) -> (i32, i32) {
    %c0_i32 = arith.constant 0 : i32
    %c0_i32_0 = arith.constant 0 : i32
    %c0_i32_1 = arith.constant 0 : i32
    return %c0_i32, %c0_i32_0 : i32, i32
  }
  func.func @transform_10(%arg0: i32, %arg1: i32) -> (i32, i32, i32) {
    %c0_i32 = arith.constant 0 : i32
    %c0_i32_0 = arith.constant 0 : i32
    return %arg0, %arg1, %c0_i32 : i32, i32, i32
  }
}

module attributes {stable_mosaic.version = 11 : i64} {
  func.func @_attn_block_kernel(%arg0: i32, %arg1: i32, %arg2: memref<1x8x32xbf16, #tpu.memory_space<vmem>>, %arg3: memref<8x32xf32, #tpu.memory_space<vmem>>, %arg4: memref<1x8x32xbf16, #tpu.memory_space<vmem>>, %arg5: memref<8x32xf32, #tpu.memory_space<vmem>>, %arg6: memref<32x32xbf16, #tpu.memory_space<vmem>>, %arg7: memref<1x32xf32, #tpu.memory_space<vmem>>, %arg8: memref<32x64xbf16, #tpu.memory_space<vmem>>, %arg9: memref<1x64xf32, #tpu.memory_space<vmem>>, %arg10: memref<32x32xbf16, #tpu.memory_space<vmem>>, %arg11: memref<1x32xf32, #tpu.memory_space<vmem>>, %arg12: memref<1x32xf32, #tpu.memory_space<vmem>>, %arg13: memref<1x32xf32, #tpu.memory_space<vmem>>, %arg14: memref<1x8x32xbf16, #tpu.memory_space<vmem>>) attributes {dimension_semantics = [#tpu.dimension_semantics<parallel>, #tpu.dimension_semantics<parallel>], iteration_bounds = array<i64: 2, 1>, scalar_prefetch = 0 : i64, scratch_operands = 0 : i64, tpu.core_type = #tpu.core_type<tc>, window_params = [{transform_indices = @transform_0, window_bounds = array<i64: 1, 8, 32>}, {transform_indices = @transform_1, window_bounds = array<i64: 8, 32>}, {transform_indices = @transform_2, window_bounds = array<i64: 1, 8, 32>}, {pipeline_mode = #tpu.pipeline_mode<synchronous>, transform_indices = @transform_3, window_bounds = array<i64: 8, 32>}, {pipeline_mode = #tpu.pipeline_mode<synchronous>, transform_indices = @transform_4, window_bounds = array<i64: 32, 32>}, {pipeline_mode = #tpu.pipeline_mode<synchronous>, transform_indices = @transform_5, window_bounds = array<i64: 1, 32>}, {pipeline_mode = #tpu.pipeline_mode<synchronous>, transform_indices = @transform_6, window_bounds = array<i64: 32, 64>}, {pipeline_mode = #tpu.pipeline_mode<synchronous>, transform_indices = @transform_7, window_bounds = array<i64: 1, 64>}, {pipeline_mode = #tpu.pipeline_mode<synchronous>, transform_indices = @transform_8, window_bounds = array<i64: 32, 32>}, {pipeline_mode = #tpu.pipeline_mode<synchronous>, transform_indices = @transform_9, window_bounds = array<i64: 1, 32>}, {pipeline_mode = #tpu.pipeline_mode<synchronous>, transform_indices = @transform_10, window_bounds = array<i64: 1, 32>}, {pipeline_mode = #tpu.pipeline_mode<synchronous>, transform_indices = @transform_11, window_bounds = array<i64: 1, 32>}, {transform_indices = @transform_12, window_bounds = array<i64: 1, 8, 32>}]} {
    %c0 = arith.constant 0 : index
    %c0_0 = arith.constant 0 : index
    %c0_1 = arith.constant 0 : index
    %0 = vector.load %arg2[%c0, %c0_0, %c0_1] : memref<1x8x32xbf16, #tpu.memory_space<vmem>>, vector<1x8x32xbf16>
    %1 = vector.shape_cast %0 : vector<1x8x32xbf16> to vector<8x32xbf16>
    %2 = arith.extf %1 : vector<8x32xbf16> to vector<8x32xf32>
    %c0_2 = arith.constant 0 : index
    %c0_3 = arith.constant 0 : index
    %3 = vector.load %arg3[%c0_2, %c0_3] : memref<8x32xf32, #tpu.memory_space<vmem>>, vector<8x32xf32>
    %4 = arith.addf %2, %3 : vector<8x32xf32>
    %c0_4 = arith.constant 0 : index
    %c0_5 = arith.constant 0 : index
    %c0_6 = arith.constant 0 : index
    %5 = vector.load %arg4[%c0_4, %c0_5, %c0_6] : memref<1x8x32xbf16, #tpu.memory_space<vmem>>, vector<1x8x32xbf16>
    %6 = vector.shape_cast %5 : vector<1x8x32xbf16> to vector<8x32xbf16>
    %7 = arith.extf %6 : vector<8x32xbf16> to vector<8x32xf32>
    %c0_7 = arith.constant 0 : index
    %c0_8 = arith.constant 0 : index
    %8 = vector.load %arg5[%c0_7, %c0_8] : memref<8x32xf32, #tpu.memory_space<vmem>>, vector<8x32xf32>
    %9 = arith.addf %7, %8 : vector<8x32xf32>
    %10 = arith.truncf %9 : vector<8x32xf32> to vector<8x32xbf16>
    %11 = arith.truncf %4 : vector<8x32xf32> to vector<8x32xbf16>
    %c0_9 = arith.constant 0 : index
    %c0_10 = arith.constant 0 : index
    %12 = vector.load %arg6[%c0_9, %c0_10] : memref<32x32xbf16, #tpu.memory_space<vmem>>, vector<32x32xbf16>
    %cst = arith.constant dense<0.000000e+00> : vector<8x32xf32>
    %13 = tpu.matmul %11, %12, %cst {dimension_numbers = #tpu.dot_dimension_numbers<[1], [0], [0], [1], [0, 0, 1, 1], [], []>} : vector<8x32xbf16>, vector<32x32xbf16>, vector<8x32xf32> -> vector<8x32xf32>
    %c0_11 = arith.constant 0 : index
    %c0_12 = arith.constant 0 : index
    %14 = vector.load %arg7[%c0_11, %c0_12] : memref<1x32xf32, #tpu.memory_space<vmem>>, vector<1x32xf32>
    %15 = vector.broadcast %14 : vector<1x32xf32> to vector<8x32xf32>
    %16 = arith.addf %13, %15 : vector<8x32xf32>
    %c0_13 = arith.constant 0 : index
    %c0_14 = arith.constant 0 : index
    %17 = vector.load %arg8[%c0_13, %c0_14] : memref<32x64xbf16, #tpu.memory_space<vmem>>, vector<32x64xbf16>
    %cst_15 = arith.constant dense<0.000000e+00> : vector<8x64xf32>
    %18 = tpu.matmul %10, %17, %cst_15 {dimension_numbers = #tpu.dot_dimension_numbers<[1], [0], [0], [1], [0, 0, 1, 1], [], []>} : vector<8x32xbf16>, vector<32x64xbf16>, vector<8x64xf32> -> vector<8x64xf32>
    %c0_16 = arith.constant 0 : index
    %c0_17 = arith.constant 0 : index
    %19 = vector.load %arg9[%c0_16, %c0_17] : memref<1x64xf32, #tpu.memory_space<vmem>>, vector<1x64xf32>
    %20 = vector.broadcast %19 : vector<1x64xf32> to vector<8x64xf32>
    %21 = arith.addf %18, %20 : vector<8x64xf32>
    %22 = vector.extract_strided_slice %21 {offsets = [0, 0], sizes = [8, 32], strides = [1, 1]} : vector<8x64xf32> to vector<8x32xf32>
    %23 = vector.extract_strided_slice %21 {offsets = [0, 32], sizes = [8, 32], strides = [1, 1]} : vector<8x64xf32> to vector<8x32xf32>
    %c0_18 = arith.constant 0 : index
    %c0_19 = arith.constant 0 : index
    %24 = vector.load %arg10[%c0_18, %c0_19] : memref<32x32xbf16, #tpu.memory_space<vmem>>, vector<32x32xbf16>
    %c0_20 = arith.constant 0 : index
    %c0_21 = arith.constant 0 : index
    %25 = vector.load %arg11[%c0_20, %c0_21] : memref<1x32xf32, #tpu.memory_space<vmem>>, vector<1x32xf32>
    %26 = vector.extract_strided_slice %16 {offsets = [0, 0], sizes = [8, 8], strides = [1, 1]} : vector<8x32xf32> to vector<8x8xf32>
    %27 = arith.truncf %26 : vector<8x8xf32> to vector<8x8xbf16>
    %28 = vector.extract_strided_slice %22 {offsets = [0, 0], sizes = [8, 8], strides = [1, 1]} : vector<8x32xf32> to vector<8x8xf32>
    %29 = arith.truncf %28 : vector<8x8xf32> to vector<8x8xbf16>
    %30 = vector.extract_strided_slice %23 {offsets = [0, 0], sizes = [8, 8], strides = [1, 1]} : vector<8x32xf32> to vector<8x8xf32>
    %31 = arith.truncf %30 : vector<8x8xf32> to vector<8x8xbf16>
    %cst_22 = arith.constant dense<0.000000e+00> : vector<8x8xf32>
    %32 = tpu.matmul %27, %29, %cst_22 {dimension_numbers = #tpu.dot_dimension_numbers<[1], [1], [0], [0], [0, 0, 1, 0], [], []>} : vector<8x8xbf16>, vector<8x8xbf16>, vector<8x8xf32> -> vector<8x8xf32>
    %cst_23 = arith.constant dense<0xFF800000> : vector<8xf32>
    %33 = vector.multi_reduction <maximumf>, %32, %cst_23 [1] : vector<8x8xf32> to vector<8xf32>
    %34 = vector.shape_cast %33 : vector<8xf32> to vector<8x1xf32>
    %35 = vector.broadcast %34 : vector<8x1xf32> to vector<8x8xf32>
    %36 = arith.subf %32, %35 : vector<8x8xf32>
    %37 = math.exp %36 : vector<8x8xf32>
    %cst_24 = arith.constant dense<0.000000e+00> : vector<8xf32>
    %38 = vector.multi_reduction <add>, %37, %cst_24 [1] : vector<8x8xf32> to vector<8xf32>
    %39 = vector.shape_cast %38 : vector<8xf32> to vector<8x1xf32>
    %40 = tpu.reciprocal %39 {approx = true} : vector<8x1xf32> -> vector<8x1xf32>
    %41 = vector.broadcast %40 : vector<8x1xf32> to vector<8x8xf32>
    %42 = arith.mulf %37, %41 : vector<8x8xf32>
    %43 = arith.truncf %42 : vector<8x8xf32> to vector<8x8xbf16>
    %cst_25 = arith.constant dense<0.000000e+00> : vector<8x8xf32>
    %44 = tpu.matmul %43, %31, %cst_25 {dimension_numbers = #tpu.dot_dimension_numbers<[1], [0], [0], [1], [0, 0, 1, 1], [], []>} : vector<8x8xbf16>, vector<8x8xbf16>, vector<8x8xf32> -> vector<8x8xf32>
    %45 = arith.truncf %44 : vector<8x8xf32> to vector<8x8xbf16>
    %46 = vector.extract_strided_slice %24 {offsets = [0, 0], sizes = [8, 32], strides = [1, 1]} : vector<32x32xbf16> to vector<8x32xbf16>
    %cst_26 = arith.constant dense<0.000000e+00> : vector<8x32xf32>
    %47 = tpu.matmul %45, %46, %cst_26 {dimension_numbers = #tpu.dot_dimension_numbers<[1], [0], [0], [1], [0, 0, 1, 1], [], []>} : vector<8x8xbf16>, vector<8x32xbf16>, vector<8x32xf32> -> vector<8x32xf32>
    %48 = vector.broadcast %25 : vector<1x32xf32> to vector<8x32xf32>
    %49 = arith.addf %48, %47 : vector<8x32xf32>
    %50 = vector.extract_strided_slice %16 {offsets = [0, 8], sizes = [8, 8], strides = [1, 1]} : vector<8x32xf32> to vector<8x8xf32>
    %51 = arith.truncf %50 : vector<8x8xf32> to vector<8x8xbf16>
    %52 = vector.extract_strided_slice %22 {offsets = [0, 8], sizes = [8, 8], strides = [1, 1]} : vector<8x32xf32> to vector<8x8xf32>
    %53 = arith.truncf %52 : vector<8x8xf32> to vector<8x8xbf16>
    %54 = vector.extract_strided_slice %23 {offsets = [0, 8], sizes = [8, 8], strides = [1, 1]} : vector<8x32xf32> to vector<8x8xf32>
    %55 = arith.truncf %54 : vector<8x8xf32> to vector<8x8xbf16>
    %cst_27 = arith.constant dense<0.000000e+00> : vector<8x8xf32>
    %56 = tpu.matmul %51, %53, %cst_27 {dimension_numbers = #tpu.dot_dimension_numbers<[1], [1], [0], [0], [0, 0, 1, 0], [], []>} : vector<8x8xbf16>, vector<8x8xbf16>, vector<8x8xf32> -> vector<8x8xf32>
    %cst_28 = arith.constant dense<0xFF800000> : vector<8xf32>
    %57 = vector.multi_reduction <maximumf>, %56, %cst_28 [1] : vector<8x8xf32> to vector<8xf32>
    %58 = vector.shape_cast %57 : vector<8xf32> to vector<8x1xf32>
    %59 = vector.broadcast %58 : vector<8x1xf32> to vector<8x8xf32>
    %60 = arith.subf %56, %59 : vector<8x8xf32>
    %61 = math.exp %60 : vector<8x8xf32>
    %cst_29 = arith.constant dense<0.000000e+00> : vector<8xf32>
    %62 = vector.multi_reduction <add>, %61, %cst_29 [1] : vector<8x8xf32> to vector<8xf32>
    %63 = vector.shape_cast %62 : vector<8xf32> to vector<8x1xf32>
    %64 = tpu.reciprocal %63 {approx = true} : vector<8x1xf32> -> vector<8x1xf32>
    %65 = vector.broadcast %64 : vector<8x1xf32> to vector<8x8xf32>
    %66 = arith.mulf %61, %65 : vector<8x8xf32>
    %67 = arith.truncf %66 : vector<8x8xf32> to vector<8x8xbf16>
    %cst_30 = arith.constant dense<0.000000e+00> : vector<8x8xf32>
    %68 = tpu.matmul %67, %55, %cst_30 {dimension_numbers = #tpu.dot_dimension_numbers<[1], [0], [0], [1], [0, 0, 1, 1], [], []>} : vector<8x8xbf16>, vector<8x8xbf16>, vector<8x8xf32> -> vector<8x8xf32>
    %69 = arith.truncf %68 : vector<8x8xf32> to vector<8x8xbf16>
    %70 = vector.extract_strided_slice %24 {offsets = [8, 0], sizes = [8, 32], strides = [1, 1]} : vector<32x32xbf16> to vector<8x32xbf16>
    %cst_31 = arith.constant dense<0.000000e+00> : vector<8x32xf32>
    %71 = tpu.matmul %69, %70, %cst_31 {dimension_numbers = #tpu.dot_dimension_numbers<[1], [0], [0], [1], [0, 0, 1, 1], [], []>} : vector<8x8xbf16>, vector<8x32xbf16>, vector<8x32xf32> -> vector<8x32xf32>
    %72 = arith.addf %49, %71 : vector<8x32xf32>
    %73 = vector.extract_strided_slice %16 {offsets = [0, 16], sizes = [8, 8], strides = [1, 1]} : vector<8x32xf32> to vector<8x8xf32>
    %74 = arith.truncf %73 : vector<8x8xf32> to vector<8x8xbf16>
    %75 = vector.extract_strided_slice %22 {offsets = [0, 16], sizes = [8, 8], strides = [1, 1]} : vector<8x32xf32> to vector<8x8xf32>
    %76 = arith.truncf %75 : vector<8x8xf32> to vector<8x8xbf16>
    %77 = vector.extract_strided_slice %23 {offsets = [0, 16], sizes = [8, 8], strides = [1, 1]} : vector<8x32xf32> to vector<8x8xf32>
    %78 = arith.truncf %77 : vector<8x8xf32> to vector<8x8xbf16>
    %cst_32 = arith.constant dense<0.000000e+00> : vector<8x8xf32>
    %79 = tpu.matmul %74, %76, %cst_32 {dimension_numbers = #tpu.dot_dimension_numbers<[1], [1], [0], [0], [0, 0, 1, 0], [], []>} : vector<8x8xbf16>, vector<8x8xbf16>, vector<8x8xf32> -> vector<8x8xf32>
    %cst_33 = arith.constant dense<0xFF800000> : vector<8xf32>
    %80 = vector.multi_reduction <maximumf>, %79, %cst_33 [1] : vector<8x8xf32> to vector<8xf32>
    %81 = vector.shape_cast %80 : vector<8xf32> to vector<8x1xf32>
    %82 = vector.broadcast %81 : vector<8x1xf32> to vector<8x8xf32>
    %83 = arith.subf %79, %82 : vector<8x8xf32>
    %84 = math.exp %83 : vector<8x8xf32>
    %cst_34 = arith.constant dense<0.000000e+00> : vector<8xf32>
    %85 = vector.multi_reduction <add>, %84, %cst_34 [1] : vector<8x8xf32> to vector<8xf32>
    %86 = vector.shape_cast %85 : vector<8xf32> to vector<8x1xf32>
    %87 = tpu.reciprocal %86 {approx = true} : vector<8x1xf32> -> vector<8x1xf32>
    %88 = vector.broadcast %87 : vector<8x1xf32> to vector<8x8xf32>
    %89 = arith.mulf %84, %88 : vector<8x8xf32>
    %90 = arith.truncf %89 : vector<8x8xf32> to vector<8x8xbf16>
    %cst_35 = arith.constant dense<0.000000e+00> : vector<8x8xf32>
    %91 = tpu.matmul %90, %78, %cst_35 {dimension_numbers = #tpu.dot_dimension_numbers<[1], [0], [0], [1], [0, 0, 1, 1], [], []>} : vector<8x8xbf16>, vector<8x8xbf16>, vector<8x8xf32> -> vector<8x8xf32>
    %92 = arith.truncf %91 : vector<8x8xf32> to vector<8x8xbf16>
    %93 = vector.extract_strided_slice %24 {offsets = [16, 0], sizes = [8, 32], strides = [1, 1]} : vector<32x32xbf16> to vector<8x32xbf16>
    %cst_36 = arith.constant dense<0.000000e+00> : vector<8x32xf32>
    %94 = tpu.matmul %92, %93, %cst_36 {dimension_numbers = #tpu.dot_dimension_numbers<[1], [0], [0], [1], [0, 0, 1, 1], [], []>} : vector<8x8xbf16>, vector<8x32xbf16>, vector<8x32xf32> -> vector<8x32xf32>
    %95 = arith.addf %72, %94 : vector<8x32xf32>
    %96 = vector.extract_strided_slice %16 {offsets = [0, 24], sizes = [8, 8], strides = [1, 1]} : vector<8x32xf32> to vector<8x8xf32>
    %97 = arith.truncf %96 : vector<8x8xf32> to vector<8x8xbf16>
    %98 = vector.extract_strided_slice %22 {offsets = [0, 24], sizes = [8, 8], strides = [1, 1]} : vector<8x32xf32> to vector<8x8xf32>
    %99 = arith.truncf %98 : vector<8x8xf32> to vector<8x8xbf16>
    %100 = vector.extract_strided_slice %23 {offsets = [0, 24], sizes = [8, 8], strides = [1, 1]} : vector<8x32xf32> to vector<8x8xf32>
    %101 = arith.truncf %100 : vector<8x8xf32> to vector<8x8xbf16>
    %cst_37 = arith.constant dense<0.000000e+00> : vector<8x8xf32>
    %102 = tpu.matmul %97, %99, %cst_37 {dimension_numbers = #tpu.dot_dimension_numbers<[1], [1], [0], [0], [0, 0, 1, 0], [], []>} : vector<8x8xbf16>, vector<8x8xbf16>, vector<8x8xf32> -> vector<8x8xf32>
    %cst_38 = arith.constant dense<0xFF800000> : vector<8xf32>
    %103 = vector.multi_reduction <maximumf>, %102, %cst_38 [1] : vector<8x8xf32> to vector<8xf32>
    %104 = vector.shape_cast %103 : vector<8xf32> to vector<8x1xf32>
    %105 = vector.broadcast %104 : vector<8x1xf32> to vector<8x8xf32>
    %106 = arith.subf %102, %105 : vector<8x8xf32>
    %107 = math.exp %106 : vector<8x8xf32>
    %cst_39 = arith.constant dense<0.000000e+00> : vector<8xf32>
    %108 = vector.multi_reduction <add>, %107, %cst_39 [1] : vector<8x8xf32> to vector<8xf32>
    %109 = vector.shape_cast %108 : vector<8xf32> to vector<8x1xf32>
    %110 = tpu.reciprocal %109 {approx = true} : vector<8x1xf32> -> vector<8x1xf32>
    %111 = vector.broadcast %110 : vector<8x1xf32> to vector<8x8xf32>
    %112 = arith.mulf %107, %111 : vector<8x8xf32>
    %113 = arith.truncf %112 : vector<8x8xf32> to vector<8x8xbf16>
    %cst_40 = arith.constant dense<0.000000e+00> : vector<8x8xf32>
    %114 = tpu.matmul %113, %101, %cst_40 {dimension_numbers = #tpu.dot_dimension_numbers<[1], [0], [0], [1], [0, 0, 1, 1], [], []>} : vector<8x8xbf16>, vector<8x8xbf16>, vector<8x8xf32> -> vector<8x8xf32>
    %115 = arith.truncf %114 : vector<8x8xf32> to vector<8x8xbf16>
    %116 = vector.extract_strided_slice %24 {offsets = [24, 0], sizes = [8, 32], strides = [1, 1]} : vector<32x32xbf16> to vector<8x32xbf16>
    %cst_41 = arith.constant dense<0.000000e+00> : vector<8x32xf32>
    %117 = tpu.matmul %115, %116, %cst_41 {dimension_numbers = #tpu.dot_dimension_numbers<[1], [0], [0], [1], [0, 0, 1, 1], [], []>} : vector<8x8xbf16>, vector<8x32xbf16>, vector<8x32xf32> -> vector<8x32xf32>
    %118 = arith.addf %95, %117 : vector<8x32xf32>
    %c0_42 = arith.constant 0 : index
    %c0_43 = arith.constant 0 : index
    %119 = vector.load %arg12[%c0_42, %c0_43] : memref<1x32xf32, #tpu.memory_space<vmem>>, vector<1x32xf32>
    %c0_44 = arith.constant 0 : index
    %c0_45 = arith.constant 0 : index
    %120 = vector.load %arg13[%c0_44, %c0_45] : memref<1x32xf32, #tpu.memory_space<vmem>>, vector<1x32xf32>
    %121 = arith.addf %4, %118 : vector<8x32xf32>
    %cst_46 = arith.constant dense<0.000000e+00> : vector<8xf32>
    %122 = vector.multi_reduction <add>, %121, %cst_46 [1] : vector<8x32xf32> to vector<8xf32>
    %123 = vector.shape_cast %122 : vector<8xf32> to vector<8x1xf32>
    %cst_47 = arith.constant 3.200000e+01 : f32
    %124 = vector.broadcast %cst_47 : f32 to vector<8x1xf32>
    %125 = arith.divf %123, %124 : vector<8x1xf32>
    %126 = vector.broadcast %125 : vector<8x1xf32> to vector<8x32xf32>
    %127 = arith.subf %121, %126 : vector<8x32xf32>
    %128 = arith.mulf %127, %127 : vector<8x32xf32>
    %cst_48 = arith.constant dense<0.000000e+00> : vector<8xf32>
    %129 = vector.multi_reduction <add>, %128, %cst_48 [1] : vector<8x32xf32> to vector<8xf32>
    %130 = vector.shape_cast %129 : vector<8xf32> to vector<8x1xf32>
    %cst_49 = arith.constant 3.200000e+01 : f32
    %131 = vector.broadcast %cst_49 : f32 to vector<8x1xf32>
    %132 = arith.divf %130, %131 : vector<8x1xf32>
    %133 = vector.broadcast %125 : vector<8x1xf32> to vector<8x32xf32>
    %134 = arith.subf %121, %133 : vector<8x32xf32>
    %cst_50 = arith.constant 9.99999974E-6 : f32
    %135 = vector.broadcast %cst_50 : f32 to vector<8x1xf32>
    %136 = arith.addf %132, %135 : vector<8x1xf32>
    %137 = math.rsqrt %136 : vector<8x1xf32>
    %138 = vector.broadcast %137 : vector<8x1xf32> to vector<8x32xf32>
    %139 = arith.mulf %134, %138 : vector<8x32xf32>
    %140 = vector.broadcast %119 : vector<1x32xf32> to vector<8x32xf32>
    %141 = arith.mulf %139, %140 : vector<8x32xf32>
    %142 = vector.broadcast %120 : vector<1x32xf32> to vector<8x32xf32>
    %143 = arith.addf %141, %142 : vector<8x32xf32>
    %144 = arith.truncf %143 : vector<8x32xf32> to vector<8x32xbf16>
    %c0_51 = arith.constant 0 : index
    %c0_52 = arith.constant 0 : index
    %c0_53 = arith.constant 0 : index
    %145 = vector.load %arg14[%c0_51, %c0_52, %c0_53] : memref<1x8x32xbf16, #tpu.memory_space<vmem>>, vector<1x8x32xbf16>
    %146 = vector.shape_cast %145 : vector<1x8x32xbf16> to vector<8x32xbf16>
    %147 = vector.shape_cast %144 : vector<8x32xbf16> to vector<1x8x32xbf16>
    tpu.vector_store %arg14[%c0_51, %c0_52, %c0_53], %147 {strides = array<i32>} : memref<1x8x32xbf16, #tpu.memory_space<vmem>>, vector<1x8x32xbf16>,
    return
  }
  func.func @transform_0(%arg0: i32, %arg1: i32) -> (i32, i32, i32) {
    %c0_i32 = arith.constant 0 : i32
    %c0_i32_0 = arith.constant 0 : i32
    return %arg0, %arg1, %c0_i32 : i32, i32, i32
  }
  func.func @transform_1(%arg0: i32, %arg1: i32) -> (i32, i32) {
    %c0_i32 = arith.constant 0 : i32
    %c0_i32_0 = arith.constant 0 : i32
    return %arg1, %c0_i32 : i32, i32
  }
  func.func @transform_2(%arg0: i32, %arg1: i32) -> (i32, i32, i32) {
    %c0_i32 = arith.constant 0 : i32
    %c0_i32_0 = arith.constant 0 : i32
    %c0_i32_1 = arith.constant 0 : i32
    return %arg0, %c0_i32, %c0_i32_0 : i32, i32, i32
  }
  func.func @transform_3(%arg0: i32, %arg1: i32) -> (i32, i32) {
    %c0_i32 = arith.constant 0 : i32
    %c0_i32_0 = arith.constant 0 : i32
    %c0_i32_1 = arith.constant 0 : i32
    return %c0_i32, %c0_i32_0 : i32, i32
  }
  func.func @transform_4(%arg0: i32, %arg1: i32) -> (i32, i32) {
    %c0_i32 = arith.constant 0 : i32
    %c0_i32_0 = arith.constant 0 : i32
    %c0_i32_1 = arith.constant 0 : i32
    return %c0_i32, %c0_i32_0 : i32, i32
  }
  func.func @transform_5(%arg0: i32, %arg1: i32) -> (i32, i32) {
    %c0_i32 = arith.constant 0 : i32
    %c0_i32_0 = arith.constant 0 : i32
    %c0_i32_1 = arith.constant 0 : i32
    return %c0_i32, %c0_i32_0 : i32, i32
  }
  func.func @transform_6(%arg0: i32, %arg1: i32) -> (i32, i32) {
    %c0_i32 = arith.constant 0 : i32
    %c0_i32_0 = arith.constant 0 : i32
    %c0_i32_1 = arith.constant 0 : i32
    return %c0_i32, %c0_i32_0 : i32, i32
  }
  func.func @transform_7(%arg0: i32, %arg1: i32) -> (i32, i32) {
    %c0_i32 = arith.constant 0 : i32
    %c0_i32_0 = arith.constant 0 : i32
    %c0_i32_1 = arith.constant 0 : i32
    return %c0_i32, %c0_i32_0 : i32, i32
  }
  func.func @transform_8(%arg0: i32, %arg1: i32) -> (i32, i32) {
    %c0_i32 = arith.constant 0 : i32
    %c0_i32_0 = arith.constant 0 : i32
    %c0_i32_1 = arith.constant 0 : i32
    return %c0_i32, %c0_i32_0 : i32, i32
  }
  func.func @transform_9(%arg0: i32, %arg1: i32) -> (i32, i32) {
    %c0_i32 = arith.constant 0 : i32
    %c0_i32_0 = arith.constant 0 : i32
    %c0_i32_1 = arith.constant 0 : i32
    return %c0_i32, %c0_i32_0 : i32, i32
  }
  func.func @transform_10(%arg0: i32, %arg1: i32) -> (i32, i32) {
    %c0_i32 = arith.constant 0 : i32
    %c0_i32_0 = arith.constant 0 : i32
    %c0_i32_1 = arith.constant 0 : i32
    return %c0_i32, %c0_i32_0 : i32, i32
  }
  func.func @transform_11(%arg0: i32, %arg1: i32) -> (i32, i32) {
    %c0_i32 = arith.constant 0 : i32
    %c0_i32_0 = arith.constant 0 : i32
    %c0_i32_1 = arith.constant 0 : i32
    return %c0_i32, %c0_i32_0 : i32, i32
  }
  func.func @transform_12(%arg0: i32, %arg1: i32) -> (i32, i32, i32) {
    %c0_i32 = arith.constant 0 : i32
    %c0_i32_0 = arith.constant 0 : i32
    return %arg0, %arg1, %c0_i32 : i32, i32, i32
  }
}

module attributes {stable_mosaic.version = 11 : i64} {
  func.func @_ffn_block_kernel(%arg0: i32, %arg1: memref<16x32xbf16, #tpu.memory_space<vmem>>, %arg2: memref<32x64xbf16, #tpu.memory_space<vmem>>, %arg3: memref<1x64xf32, #tpu.memory_space<vmem>>, %arg4: memref<64x32xbf16, #tpu.memory_space<vmem>>, %arg5: memref<1x32xf32, #tpu.memory_space<vmem>>, %arg6: memref<1x32xf32, #tpu.memory_space<vmem>>, %arg7: memref<1x32xf32, #tpu.memory_space<vmem>>, %arg8: memref<16x32xbf16, #tpu.memory_space<vmem>>) attributes {dimension_semantics = [#tpu.dimension_semantics<parallel>], iteration_bounds = array<i64: 1>, scalar_prefetch = 0 : i64, scratch_operands = 0 : i64, tpu.core_type = #tpu.core_type<tc>, window_params = [{transform_indices = @transform_0, window_bounds = array<i64: 16, 32>}, {pipeline_mode = #tpu.pipeline_mode<synchronous>, transform_indices = @transform_1, window_bounds = array<i64: 32, 64>}, {pipeline_mode = #tpu.pipeline_mode<synchronous>, transform_indices = @transform_2, window_bounds = array<i64: 1, 64>}, {pipeline_mode = #tpu.pipeline_mode<synchronous>, transform_indices = @transform_3, window_bounds = array<i64: 64, 32>}, {pipeline_mode = #tpu.pipeline_mode<synchronous>, transform_indices = @transform_4, window_bounds = array<i64: 1, 32>}, {pipeline_mode = #tpu.pipeline_mode<synchronous>, transform_indices = @transform_5, window_bounds = array<i64: 1, 32>}, {pipeline_mode = #tpu.pipeline_mode<synchronous>, transform_indices = @transform_6, window_bounds = array<i64: 1, 32>}, {transform_indices = @transform_7, window_bounds = array<i64: 16, 32>}]} {
    %c0 = arith.constant 0 : index
    %c0_0 = arith.constant 0 : index
    %0 = vector.load %arg1[%c0, %c0_0] : memref<16x32xbf16, #tpu.memory_space<vmem>>, vector<16x32xbf16>
    %1 = arith.extf %0 : vector<16x32xbf16> to vector<16x32xf32>
    %c0_1 = arith.constant 0 : index
    %c0_2 = arith.constant 0 : index
    %2 = vector.load %arg2[%c0_1, %c0_2] : memref<32x64xbf16, #tpu.memory_space<vmem>>, vector<32x64xbf16>
    %cst = arith.constant dense<0.000000e+00> : vector<16x64xf32>
    %3 = tpu.matmul %0, %2, %cst {dimension_numbers = #tpu.dot_dimension_numbers<[1], [0], [0], [1], [0, 0, 1, 1], [], []>} : vector<16x32xbf16>, vector<32x64xbf16>, vector<16x64xf32> -> vector<16x64xf32>
    %c0_3 = arith.constant 0 : index
    %c0_4 = arith.constant 0 : index
    %4 = vector.load %arg3[%c0_3, %c0_4] : memref<1x64xf32, #tpu.memory_space<vmem>>, vector<1x64xf32>
    %5 = vector.broadcast %4 : vector<1x64xf32> to vector<16x64xf32>
    %6 = arith.addf %3, %5 : vector<16x64xf32>
    %cst_5 = arith.constant 0.000000e+00 : f32
    %7 = vector.broadcast %cst_5 : f32 to vector<16x64xf32>
    %8 = arith.maximumf %6, %7 : vector<16x64xf32>
    %9 = arith.truncf %8 : vector<16x64xf32> to vector<16x64xbf16>
    %c0_6 = arith.constant 0 : index
    %c0_7 = arith.constant 0 : index
    %10 = vector.load %arg4[%c0_6, %c0_7] : memref<64x32xbf16, #tpu.memory_space<vmem>>, vector<64x32xbf16>
    %cst_8 = arith.constant dense<0.000000e+00> : vector<16x32xf32>
    %11 = tpu.matmul %9, %10, %cst_8 {dimension_numbers = #tpu.dot_dimension_numbers<[1], [0], [0], [1], [0, 0, 1, 1], [], []>} : vector<16x64xbf16>, vector<64x32xbf16>, vector<16x32xf32> -> vector<16x32xf32>
    %c0_9 = arith.constant 0 : index
    %c0_10 = arith.constant 0 : index
    %12 = vector.load %arg5[%c0_9, %c0_10] : memref<1x32xf32, #tpu.memory_space<vmem>>, vector<1x32xf32>
    %13 = vector.broadcast %12 : vector<1x32xf32> to vector<16x32xf32>
    %14 = arith.addf %11, %13 : vector<16x32xf32>
    %c0_11 = arith.constant 0 : index
    %c0_12 = arith.constant 0 : index
    %15 = vector.load %arg6[%c0_11, %c0_12] : memref<1x32xf32, #tpu.memory_space<vmem>>, vector<1x32xf32>
    %c0_13 = arith.constant 0 : index
    %c0_14 = arith.constant 0 : index
    %16 = vector.load %arg7[%c0_13, %c0_14] : memref<1x32xf32, #tpu.memory_space<vmem>>, vector<1x32xf32>
    %17 = arith.addf %1, %14 : vector<16x32xf32>
    %cst_15 = arith.constant dense<0.000000e+00> : vector<16xf32>
    %18 = vector.multi_reduction <add>, %17, %cst_15 [1] : vector<16x32xf32> to vector<16xf32>
    %19 = vector.shape_cast %18 : vector<16xf32> to vector<16x1xf32>
    %cst_16 = arith.constant 3.200000e+01 : f32
    %20 = vector.broadcast %cst_16 : f32 to vector<16x1xf32>
    %21 = arith.divf %19, %20 : vector<16x1xf32>
    %22 = vector.broadcast %21 : vector<16x1xf32> to vector<16x32xf32>
    %23 = arith.subf %17, %22 : vector<16x32xf32>
    %24 = arith.mulf %23, %23 : vector<16x32xf32>
    %cst_17 = arith.constant dense<0.000000e+00> : vector<16xf32>
    %25 = vector.multi_reduction <add>, %24, %cst_17 [1] : vector<16x32xf32> to vector<16xf32>
    %26 = vector.shape_cast %25 : vector<16xf32> to vector<16x1xf32>
    %cst_18 = arith.constant 3.200000e+01 : f32
    %27 = vector.broadcast %cst_18 : f32 to vector<16x1xf32>
    %28 = arith.divf %26, %27 : vector<16x1xf32>
    %29 = vector.broadcast %21 : vector<16x1xf32> to vector<16x32xf32>
    %30 = arith.subf %17, %29 : vector<16x32xf32>
    %cst_19 = arith.constant 9.99999974E-6 : f32
    %31 = vector.broadcast %cst_19 : f32 to vector<16x1xf32>
    %32 = arith.addf %28, %31 : vector<16x1xf32>
    %33 = math.rsqrt %32 : vector<16x1xf32>
    %34 = vector.broadcast %33 : vector<16x1xf32> to vector<16x32xf32>
    %35 = arith.mulf %30, %34 : vector<16x32xf32>
    %36 = vector.broadcast %15 : vector<1x32xf32> to vector<16x32xf32>
    %37 = arith.mulf %35, %36 : vector<16x32xf32>
    %38 = vector.broadcast %16 : vector<1x32xf32> to vector<16x32xf32>
    %39 = arith.addf %37, %38 : vector<16x32xf32>
    %40 = arith.truncf %39 : vector<16x32xf32> to vector<16x32xbf16>
    %c0_20 = arith.constant 0 : index
    %c0_21 = arith.constant 0 : index
    %41 = vector.load %arg8[%c0_20, %c0_21] : memref<16x32xbf16, #tpu.memory_space<vmem>>, vector<16x32xbf16>
    tpu.vector_store %arg8[%c0_20, %c0_21], %40 {strides = array<i32>} : memref<16x32xbf16, #tpu.memory_space<vmem>>, vector<16x32xbf16>,
    return
  }
  func.func @transform_0(%arg0: i32) -> (i32, i32) {
    %c0_i32 = arith.constant 0 : i32
    %c0_i32_0 = arith.constant 0 : i32
    return %arg0, %c0_i32 : i32, i32
  }
  func.func @transform_1(%arg0: i32) -> (i32, i32) {
    %c0_i32 = arith.constant 0 : i32
    %c0_i32_0 = arith.constant 0 : i32
    %c0_i32_1 = arith.constant 0 : i32
    return %c0_i32, %c0_i32_0 : i32, i32
  }
  func.func @transform_2(%arg0: i32) -> (i32, i32) {
    %c0_i32 = arith.constant 0 : i32
    %c0_i32_0 = arith.constant 0 : i32
    %c0_i32_1 = arith.constant 0 : i32
    return %c0_i32, %c0_i32_0 : i32, i32
  }
  func.func @transform_3(%arg0: i32) -> (i32, i32) {
    %c0_i32 = arith.constant 0 : i32
    %c0_i32_0 = arith.constant 0 : i32
    %c0_i32_1 = arith.constant 0 : i32
    return %c0_i32, %c0_i32_0 : i32, i32
  }
  func.func @transform_4(%arg0: i32) -> (i32, i32) {
    %c0_i32 = arith.constant 0 : i32
    %c0_i32_0 = arith.constant 0 : i32
    %c0_i32_1 = arith.constant 0 : i32
    return %c0_i32, %c0_i32_0 : i32, i32
  }
  func.func @transform_5(%arg0: i32) -> (i32, i32) {
    %c0_i32 = arith.constant 0 : i32
    %c0_i32_0 = arith.constant 0 : i32
    %c0_i32_1 = arith.constant 0 : i32
    return %c0_i32, %c0_i32_0 : i32, i32
  }
  func.func @transform_6(%arg0: i32) -> (i32, i32) {
    %c0_i32 = arith.constant 0 : i32
    %c0_i32_0 = arith.constant 0 : i32
    %c0_i32_1 = arith.constant 0 : i32
    return %c0_i32, %c0_i32_0 : i32, i32
  }
  func.func @transform_7(%arg0: i32) -> (i32, i32) {
    %c0_i32 = arith.constant 0 : i32
    %c0_i32_0 = arith.constant 0 : i32
    return %arg0, %c0_i32 : i32, i32
  }
}

module attributes {stable_mosaic.version = 11 : i64} {
  func.func @_attn_block_kernel(%arg0: i32, %arg1: i32, %arg2: memref<1x8x32xbf16, #tpu.memory_space<vmem>>, %arg3: memref<1x8x32xbf16, #tpu.memory_space<vmem>>, %arg4: memref<32x32xbf16, #tpu.memory_space<vmem>>, %arg5: memref<1x32xf32, #tpu.memory_space<vmem>>, %arg6: memref<32x64xbf16, #tpu.memory_space<vmem>>, %arg7: memref<1x64xf32, #tpu.memory_space<vmem>>, %arg8: memref<32x32xbf16, #tpu.memory_space<vmem>>, %arg9: memref<1x32xf32, #tpu.memory_space<vmem>>, %arg10: memref<1x32xf32, #tpu.memory_space<vmem>>, %arg11: memref<1x32xf32, #tpu.memory_space<vmem>>, %arg12: memref<1x8x32xbf16, #tpu.memory_space<vmem>>) attributes {dimension_semantics = [#tpu.dimension_semantics<parallel>, #tpu.dimension_semantics<parallel>], iteration_bounds = array<i64: 2, 1>, scalar_prefetch = 0 : i64, scratch_operands = 0 : i64, tpu.core_type = #tpu.core_type<tc>, window_params = [{transform_indices = @transform_0, window_bounds = array<i64: 1, 8, 32>}, {transform_indices = @transform_1, window_bounds = array<i64: 1, 8, 32>}, {pipeline_mode = #tpu.pipeline_mode<synchronous>, transform_indices = @transform_2, window_bounds = array<i64: 32, 32>}, {pipeline_mode = #tpu.pipeline_mode<synchronous>, transform_indices = @transform_3, window_bounds = array<i64: 1, 32>}, {pipeline_mode = #tpu.pipeline_mode<synchronous>, transform_indices = @transform_4, window_bounds = array<i64: 32, 64>}, {pipeline_mode = #tpu.pipeline_mode<synchronous>, transform_indices = @transform_5, window_bounds = array<i64: 1, 64>}, {pipeline_mode = #tpu.pipeline_mode<synchronous>, transform_indices = @transform_6, window_bounds = array<i64: 32, 32>}, {pipeline_mode = #tpu.pipeline_mode<synchronous>, transform_indices = @transform_7, window_bounds = array<i64: 1, 32>}, {pipeline_mode = #tpu.pipeline_mode<synchronous>, transform_indices = @transform_8, window_bounds = array<i64: 1, 32>}, {pipeline_mode = #tpu.pipeline_mode<synchronous>, transform_indices = @transform_9, window_bounds = array<i64: 1, 32>}, {transform_indices = @transform_10, window_bounds = array<i64: 1, 8, 32>}]} {
    %c0 = arith.constant 0 : index
    %c0_0 = arith.constant 0 : index
    %c0_1 = arith.constant 0 : index
    %0 = vector.load %arg2[%c0, %c0_0, %c0_1] : memref<1x8x32xbf16, #tpu.memory_space<vmem>>, vector<1x8x32xbf16>
    %1 = vector.shape_cast %0 : vector<1x8x32xbf16> to vector<8x32xbf16>
    %2 = arith.extf %1 : vector<8x32xbf16> to vector<8x32xf32>
    %c0_2 = arith.constant 0 : index
    %c0_3 = arith.constant 0 : index
    %c0_4 = arith.constant 0 : index
    %3 = vector.load %arg3[%c0_2, %c0_3, %c0_4] : memref<1x8x32xbf16, #tpu.memory_space<vmem>>, vector<1x8x32xbf16>
    %4 = vector.shape_cast %3 : vector<1x8x32xbf16> to vector<8x32xbf16>
    %5 = arith.truncf %2 : vector<8x32xf32> to vector<8x32xbf16>
    %c0_5 = arith.constant 0 : index
    %c0_6 = arith.constant 0 : index
    %6 = vector.load %arg4[%c0_5, %c0_6] : memref<32x32xbf16, #tpu.memory_space<vmem>>, vector<32x32xbf16>
    %cst = arith.constant dense<0.000000e+00> : vector<8x32xf32>
    %7 = tpu.matmul %5, %6, %cst {dimension_numbers = #tpu.dot_dimension_numbers<[1], [0], [0], [1], [0, 0, 1, 1], [], []>} : vector<8x32xbf16>, vector<32x32xbf16>, vector<8x32xf32> -> vector<8x32xf32>
    %c0_7 = arith.constant 0 : index
    %c0_8 = arith.constant 0 : index
    %8 = vector.load %arg5[%c0_7, %c0_8] : memref<1x32xf32, #tpu.memory_space<vmem>>, vector<1x32xf32>
    %9 = vector.broadcast %8 : vector<1x32xf32> to vector<8x32xf32>
    %10 = arith.addf %7, %9 : vector<8x32xf32>
    %c0_9 = arith.constant 0 : index
    %c0_10 = arith.constant 0 : index
    %11 = vector.load %arg6[%c0_9, %c0_10] : memref<32x64xbf16, #tpu.memory_space<vmem>>, vector<32x64xbf16>
    %cst_11 = arith.constant dense<0.000000e+00> : vector<8x64xf32>
    %12 = tpu.matmul %4, %11, %cst_11 {dimension_numbers = #tpu.dot_dimension_numbers<[1], [0], [0], [1], [0, 0, 1, 1], [], []>} : vector<8x32xbf16>, vector<32x64xbf16>, vector<8x64xf32> -> vector<8x64xf32>
    %c0_12 = arith.constant 0 : index
    %c0_13 = arith.constant 0 : index
    %13 = vector.load %arg7[%c0_12, %c0_13] : memref<1x64xf32, #tpu.memory_space<vmem>>, vector<1x64xf32>
    %14 = vector.broadcast %13 : vector<1x64xf32> to vector<8x64xf32>
    %15 = arith.addf %12, %14 : vector<8x64xf32>
    %16 = vector.extract_strided_slice %15 {offsets = [0, 0], sizes = [8, 32], strides = [1, 1]} : vector<8x64xf32> to vector<8x32xf32>
    %17 = vector.extract_strided_slice %15 {offsets = [0, 32], sizes = [8, 32], strides = [1, 1]} : vector<8x64xf32> to vector<8x32xf32>
    %c0_14 = arith.constant 0 : index
    %c0_15 = arith.constant 0 : index
    %18 = vector.load %arg8[%c0_14, %c0_15] : memref<32x32xbf16, #tpu.memory_space<vmem>>, vector<32x32xbf16>
    %c0_16 = arith.constant 0 : index
    %c0_17 = arith.constant 0 : index
    %19 = vector.load %arg9[%c0_16, %c0_17] : memref<1x32xf32, #tpu.memory_space<vmem>>, vector<1x32xf32>
    %20 = vector.extract_strided_slice %10 {offsets = [0, 0], sizes = [8, 8], strides = [1, 1]} : vector<8x32xf32> to vector<8x8xf32>
    %21 = arith.truncf %20 : vector<8x8xf32> to vector<8x8xbf16>
    %22 = vector.extract_strided_slice %16 {offsets = [0, 0], sizes = [8, 8], strides = [1, 1]} : vector<8x32xf32> to vector<8x8xf32>
    %23 = arith.truncf %22 : vector<8x8xf32> to vector<8x8xbf16>
    %24 = vector.extract_strided_slice %17 {offsets = [0, 0], sizes = [8, 8], strides = [1, 1]} : vector<8x32xf32> to vector<8x8xf32>
    %25 = arith.truncf %24 : vector<8x8xf32> to vector<8x8xbf16>
    %cst_18 = arith.constant dense<0.000000e+00> : vector<8x8xf32>
    %26 = tpu.matmul %21, %23, %cst_18 {dimension_numbers = #tpu.dot_dimension_numbers<[1], [1], [0], [0], [0, 0, 1, 0], [], []>} : vector<8x8xbf16>, vector<8x8xbf16>, vector<8x8xf32> -> vector<8x8xf32>
    %cst_19 = arith.constant dense<0xFF800000> : vector<8xf32>
    %27 = vector.multi_reduction <maximumf>, %26, %cst_19 [1] : vector<8x8xf32> to vector<8xf32>
    %28 = vector.shape_cast %27 : vector<8xf32> to vector<8x1xf32>
    %29 = vector.broadcast %28 : vector<8x1xf32> to vector<8x8xf32>
    %30 = arith.subf %26, %29 : vector<8x8xf32>
    %31 = math.exp %30 : vector<8x8xf32>
    %cst_20 = arith.constant dense<0.000000e+00> : vector<8xf32>
    %32 = vector.multi_reduction <add>, %31, %cst_20 [1] : vector<8x8xf32> to vector<8xf32>
    %33 = vector.shape_cast %32 : vector<8xf32> to vector<8x1xf32>
    %34 = tpu.reciprocal %33 {approx = true} : vector<8x1xf32> -> vector<8x1xf32>
    %35 = vector.broadcast %34 : vector<8x1xf32> to vector<8x8xf32>
    %36 = arith.mulf %31, %35 : vector<8x8xf32>
    %37 = arith.truncf %36 : vector<8x8xf32> to vector<8x8xbf16>
    %cst_21 = arith.constant dense<0.000000e+00> : vector<8x8xf32>
    %38 = tpu.matmul %37, %25, %cst_21 {dimension_numbers = #tpu.dot_dimension_numbers<[1], [0], [0], [1], [0, 0, 1, 1], [], []>} : vector<8x8xbf16>, vector<8x8xbf16>, vector<8x8xf32> -> vector<8x8xf32>
    %39 = arith.truncf %38 : vector<8x8xf32> to vector<8x8xbf16>
    %40 = vector.extract_strided_slice %18 {offsets = [0, 0], sizes = [8, 32], strides = [1, 1]} : vector<32x32xbf16> to vector<8x32xbf16>
    %cst_22 = arith.constant dense<0.000000e+00> : vector<8x32xf32>
    %41 = tpu.matmul %39, %40, %cst_22 {dimension_numbers = #tpu.dot_dimension_numbers<[1], [0], [0], [1], [0, 0, 1, 1], [], []>} : vector<8x8xbf16>, vector<8x32xbf16>, vector<8x32xf32> -> vector<8x32xf32>
    %42 = vector.broadcast %19 : vector<1x32xf32> to vector<8x32xf32>
    %43 = arith.addf %42, %41 : vector<8x32xf32>
    %44 = vector.extract_strided_slice %10 {offsets = [0, 8], sizes = [8, 8], strides = [1, 1]} : vector<8x32xf32> to vector<8x8xf32>
    %45 = arith.truncf %44 : vector<8x8xf32> to vector<8x8xbf16>
    %46 = vector.extract_strided_slice %16 {offsets = [0, 8], sizes = [8, 8], strides = [1, 1]} : vector<8x32xf32> to vector<8x8xf32>
    %47 = arith.truncf %46 : vector<8x8xf32> to vector<8x8xbf16>
    %48 = vector.extract_strided_slice %17 {offsets = [0, 8], sizes = [8, 8], strides = [1, 1]} : vector<8x32xf32> to vector<8x8xf32>
    %49 = arith.truncf %48 : vector<8x8xf32> to vector<8x8xbf16>
    %cst_23 = arith.constant dense<0.000000e+00> : vector<8x8xf32>
    %50 = tpu.matmul %45, %47, %cst_23 {dimension_numbers = #tpu.dot_dimension_numbers<[1], [1], [0], [0], [0, 0, 1, 0], [], []>} : vector<8x8xbf16>, vector<8x8xbf16>, vector<8x8xf32> -> vector<8x8xf32>
    %cst_24 = arith.constant dense<0xFF800000> : vector<8xf32>
    %51 = vector.multi_reduction <maximumf>, %50, %cst_24 [1] : vector<8x8xf32> to vector<8xf32>
    %52 = vector.shape_cast %51 : vector<8xf32> to vector<8x1xf32>
    %53 = vector.broadcast %52 : vector<8x1xf32> to vector<8x8xf32>
    %54 = arith.subf %50, %53 : vector<8x8xf32>
    %55 = math.exp %54 : vector<8x8xf32>
    %cst_25 = arith.constant dense<0.000000e+00> : vector<8xf32>
    %56 = vector.multi_reduction <add>, %55, %cst_25 [1] : vector<8x8xf32> to vector<8xf32>
    %57 = vector.shape_cast %56 : vector<8xf32> to vector<8x1xf32>
    %58 = tpu.reciprocal %57 {approx = true} : vector<8x1xf32> -> vector<8x1xf32>
    %59 = vector.broadcast %58 : vector<8x1xf32> to vector<8x8xf32>
    %60 = arith.mulf %55, %59 : vector<8x8xf32>
    %61 = arith.truncf %60 : vector<8x8xf32> to vector<8x8xbf16>
    %cst_26 = arith.constant dense<0.000000e+00> : vector<8x8xf32>
    %62 = tpu.matmul %61, %49, %cst_26 {dimension_numbers = #tpu.dot_dimension_numbers<[1], [0], [0], [1], [0, 0, 1, 1], [], []>} : vector<8x8xbf16>, vector<8x8xbf16>, vector<8x8xf32> -> vector<8x8xf32>
    %63 = arith.truncf %62 : vector<8x8xf32> to vector<8x8xbf16>
    %64 = vector.extract_strided_slice %18 {offsets = [8, 0], sizes = [8, 32], strides = [1, 1]} : vector<32x32xbf16> to vector<8x32xbf16>
    %cst_27 = arith.constant dense<0.000000e+00> : vector<8x32xf32>
    %65 = tpu.matmul %63, %64, %cst_27 {dimension_numbers = #tpu.dot_dimension_numbers<[1], [0], [0], [1], [0, 0, 1, 1], [], []>} : vector<8x8xbf16>, vector<8x32xbf16>, vector<8x32xf32> -> vector<8x32xf32>
    %66 = arith.addf %43, %65 : vector<8x32xf32>
    %67 = vector.extract_strided_slice %10 {offsets = [0, 16], sizes = [8, 8], strides = [1, 1]} : vector<8x32xf32> to vector<8x8xf32>
    %68 = arith.truncf %67 : vector<8x8xf32> to vector<8x8xbf16>
    %69 = vector.extract_strided_slice %16 {offsets = [0, 16], sizes = [8, 8], strides = [1, 1]} : vector<8x32xf32> to vector<8x8xf32>
    %70 = arith.truncf %69 : vector<8x8xf32> to vector<8x8xbf16>
    %71 = vector.extract_strided_slice %17 {offsets = [0, 16], sizes = [8, 8], strides = [1, 1]} : vector<8x32xf32> to vector<8x8xf32>
    %72 = arith.truncf %71 : vector<8x8xf32> to vector<8x8xbf16>
    %cst_28 = arith.constant dense<0.000000e+00> : vector<8x8xf32>
    %73 = tpu.matmul %68, %70, %cst_28 {dimension_numbers = #tpu.dot_dimension_numbers<[1], [1], [0], [0], [0, 0, 1, 0], [], []>} : vector<8x8xbf16>, vector<8x8xbf16>, vector<8x8xf32> -> vector<8x8xf32>
    %cst_29 = arith.constant dense<0xFF800000> : vector<8xf32>
    %74 = vector.multi_reduction <maximumf>, %73, %cst_29 [1] : vector<8x8xf32> to vector<8xf32>
    %75 = vector.shape_cast %74 : vector<8xf32> to vector<8x1xf32>
    %76 = vector.broadcast %75 : vector<8x1xf32> to vector<8x8xf32>
    %77 = arith.subf %73, %76 : vector<8x8xf32>
    %78 = math.exp %77 : vector<8x8xf32>
    %cst_30 = arith.constant dense<0.000000e+00> : vector<8xf32>
    %79 = vector.multi_reduction <add>, %78, %cst_30 [1] : vector<8x8xf32> to vector<8xf32>
    %80 = vector.shape_cast %79 : vector<8xf32> to vector<8x1xf32>
    %81 = tpu.reciprocal %80 {approx = true} : vector<8x1xf32> -> vector<8x1xf32>
    %82 = vector.broadcast %81 : vector<8x1xf32> to vector<8x8xf32>
    %83 = arith.mulf %78, %82 : vector<8x8xf32>
    %84 = arith.truncf %83 : vector<8x8xf32> to vector<8x8xbf16>
    %cst_31 = arith.constant dense<0.000000e+00> : vector<8x8xf32>
    %85 = tpu.matmul %84, %72, %cst_31 {dimension_numbers = #tpu.dot_dimension_numbers<[1], [0], [0], [1], [0, 0, 1, 1], [], []>} : vector<8x8xbf16>, vector<8x8xbf16>, vector<8x8xf32> -> vector<8x8xf32>
    %86 = arith.truncf %85 : vector<8x8xf32> to vector<8x8xbf16>
    %87 = vector.extract_strided_slice %18 {offsets = [16, 0], sizes = [8, 32], strides = [1, 1]} : vector<32x32xbf16> to vector<8x32xbf16>
    %cst_32 = arith.constant dense<0.000000e+00> : vector<8x32xf32>
    %88 = tpu.matmul %86, %87, %cst_32 {dimension_numbers = #tpu.dot_dimension_numbers<[1], [0], [0], [1], [0, 0, 1, 1], [], []>} : vector<8x8xbf16>, vector<8x32xbf16>, vector<8x32xf32> -> vector<8x32xf32>
    %89 = arith.addf %66, %88 : vector<8x32xf32>
    %90 = vector.extract_strided_slice %10 {offsets = [0, 24], sizes = [8, 8], strides = [1, 1]} : vector<8x32xf32> to vector<8x8xf32>
    %91 = arith.truncf %90 : vector<8x8xf32> to vector<8x8xbf16>
    %92 = vector.extract_strided_slice %16 {offsets = [0, 24], sizes = [8, 8], strides = [1, 1]} : vector<8x32xf32> to vector<8x8xf32>
    %93 = arith.truncf %92 : vector<8x8xf32> to vector<8x8xbf16>
    %94 = vector.extract_strided_slice %17 {offsets = [0, 24], sizes = [8, 8], strides = [1, 1]} : vector<8x32xf32> to vector<8x8xf32>
    %95 = arith.truncf %94 : vector<8x8xf32> to vector<8x8xbf16>
    %cst_33 = arith.constant dense<0.000000e+00> : vector<8x8xf32>
    %96 = tpu.matmul %91, %93, %cst_33 {dimension_numbers = #tpu.dot_dimension_numbers<[1], [1], [0], [0], [0, 0, 1, 0], [], []>} : vector<8x8xbf16>, vector<8x8xbf16>, vector<8x8xf32> -> vector<8x8xf32>
    %cst_34 = arith.constant dense<0xFF800000> : vector<8xf32>
    %97 = vector.multi_reduction <maximumf>, %96, %cst_34 [1] : vector<8x8xf32> to vector<8xf32>
    %98 = vector.shape_cast %97 : vector<8xf32> to vector<8x1xf32>
    %99 = vector.broadcast %98 : vector<8x1xf32> to vector<8x8xf32>
    %100 = arith.subf %96, %99 : vector<8x8xf32>
    %101 = math.exp %100 : vector<8x8xf32>
    %cst_35 = arith.constant dense<0.000000e+00> : vector<8xf32>
    %102 = vector.multi_reduction <add>, %101, %cst_35 [1] : vector<8x8xf32> to vector<8xf32>
    %103 = vector.shape_cast %102 : vector<8xf32> to vector<8x1xf32>
    %104 = tpu.reciprocal %103 {approx = true} : vector<8x1xf32> -> vector<8x1xf32>
    %105 = vector.broadcast %104 : vector<8x1xf32> to vector<8x8xf32>
    %106 = arith.mulf %101, %105 : vector<8x8xf32>
    %107 = arith.truncf %106 : vector<8x8xf32> to vector<8x8xbf16>
    %cst_36 = arith.constant dense<0.000000e+00> : vector<8x8xf32>
    %108 = tpu.matmul %107, %95, %cst_36 {dimension_numbers = #tpu.dot_dimension_numbers<[1], [0], [0], [1], [0, 0, 1, 1], [], []>} : vector<8x8xbf16>, vector<8x8xbf16>, vector<8x8xf32> -> vector<8x8xf32>
    %109 = arith.truncf %108 : vector<8x8xf32> to vector<8x8xbf16>
    %110 = vector.extract_strided_slice %18 {offsets = [24, 0], sizes = [8, 32], strides = [1, 1]} : vector<32x32xbf16> to vector<8x32xbf16>
    %cst_37 = arith.constant dense<0.000000e+00> : vector<8x32xf32>
    %111 = tpu.matmul %109, %110, %cst_37 {dimension_numbers = #tpu.dot_dimension_numbers<[1], [0], [0], [1], [0, 0, 1, 1], [], []>} : vector<8x8xbf16>, vector<8x32xbf16>, vector<8x32xf32> -> vector<8x32xf32>
    %112 = arith.addf %89, %111 : vector<8x32xf32>
    %c0_38 = arith.constant 0 : index
    %c0_39 = arith.constant 0 : index
    %113 = vector.load %arg10[%c0_38, %c0_39] : memref<1x32xf32, #tpu.memory_space<vmem>>, vector<1x32xf32>
    %c0_40 = arith.constant 0 : index
    %c0_41 = arith.constant 0 : index
    %114 = vector.load %arg11[%c0_40, %c0_41] : memref<1x32xf32, #tpu.memory_space<vmem>>, vector<1x32xf32>
    %115 = arith.addf %2, %112 : vector<8x32xf32>
    %cst_42 = arith.constant dense<0.000000e+00> : vector<8xf32>
    %116 = vector.multi_reduction <add>, %115, %cst_42 [1] : vector<8x32xf32> to vector<8xf32>
    %117 = vector.shape_cast %116 : vector<8xf32> to vector<8x1xf32>
    %cst_43 = arith.constant 3.200000e+01 : f32
    %118 = vector.broadcast %cst_43 : f32 to vector<8x1xf32>
    %119 = arith.divf %117, %118 : vector<8x1xf32>
    %120 = vector.broadcast %119 : vector<8x1xf32> to vector<8x32xf32>
    %121 = arith.subf %115, %120 : vector<8x32xf32>
    %122 = arith.mulf %121, %121 : vector<8x32xf32>
    %cst_44 = arith.constant dense<0.000000e+00> : vector<8xf32>
    %123 = vector.multi_reduction <add>, %122, %cst_44 [1] : vector<8x32xf32> to vector<8xf32>
    %124 = vector.shape_cast %123 : vector<8xf32> to vector<8x1xf32>
    %cst_45 = arith.constant 3.200000e+01 : f32
    %125 = vector.broadcast %cst_45 : f32 to vector<8x1xf32>
    %126 = arith.divf %124, %125 : vector<8x1xf32>
    %127 = vector.broadcast %119 : vector<8x1xf32> to vector<8x32xf32>
    %128 = arith.subf %115, %127 : vector<8x32xf32>
    %cst_46 = arith.constant 9.99999974E-6 : f32
    %129 = vector.broadcast %cst_46 : f32 to vector<8x1xf32>
    %130 = arith.addf %126, %129 : vector<8x1xf32>
    %131 = math.rsqrt %130 : vector<8x1xf32>
    %132 = vector.broadcast %131 : vector<8x1xf32> to vector<8x32xf32>
    %133 = arith.mulf %128, %132 : vector<8x32xf32>
    %134 = vector.broadcast %113 : vector<1x32xf32> to vector<8x32xf32>
    %135 = arith.mulf %133, %134 : vector<8x32xf32>
    %136 = vector.broadcast %114 : vector<1x32xf32> to vector<8x32xf32>
    %137 = arith.addf %135, %136 : vector<8x32xf32>
    %138 = arith.truncf %137 : vector<8x32xf32> to vector<8x32xbf16>
    %c0_47 = arith.constant 0 : index
    %c0_48 = arith.constant 0 : index
    %c0_49 = arith.constant 0 : index
    %139 = vector.load %arg12[%c0_47, %c0_48, %c0_49] : memref<1x8x32xbf16, #tpu.memory_space<vmem>>, vector<1x8x32xbf16>
    %140 = vector.shape_cast %139 : vector<1x8x32xbf16> to vector<8x32xbf16>
    %141 = vector.shape_cast %138 : vector<8x32xbf16> to vector<1x8x32xbf16>
    tpu.vector_store %arg12[%c0_47, %c0_48, %c0_49], %141 {strides = array<i32>} : memref<1x8x32xbf16, #tpu.memory_space<vmem>>, vector<1x8x32xbf16>,
    return
  }
  func.func @transform_0(%arg0: i32, %arg1: i32) -> (i32, i32, i32) {
    %c0_i32 = arith.constant 0 : i32
    %c0_i32_0 = arith.constant 0 : i32
    return %arg0, %arg1, %c0_i32 : i32, i32, i32
  }
  func.func @transform_1(%arg0: i32, %arg1: i32) -> (i32, i32, i32) {
    %c0_i32 = arith.constant 0 : i32
    %c0_i32_0 = arith.constant 0 : i32
    %c0_i32_1 = arith.constant 0 : i32
    return %arg0, %c0_i32, %c0_i32_0 : i32, i32, i32
  }
  func.func @transform_2(%arg0: i32, %arg1: i32) -> (i32, i32) {
    %c0_i32 = arith.constant 0 : i32
    %c0_i32_0 = arith.constant 0 : i32
    %c0_i32_1 = arith.constant 0 : i32
    return %c0_i32, %c0_i32_0 : i32, i32
  }
  func.func @transform_3(%arg0: i32, %arg1: i32) -> (i32, i32) {
    %c0_i32 = arith.constant 0 : i32
    %c0_i32_0 = arith.constant 0 : i32
    %c0_i32_1 = arith.constant 0 : i32
    return %c0_i32, %c0_i32_0 : i32, i32
  }
  func.func @transform_4(%arg0: i32, %arg1: i32) -> (i32, i32) {
    %c0_i32 = arith.constant 0 : i32
    %c0_i32_0 = arith.constant 0 : i32
    %c0_i32_1 = arith.constant 0 : i32
    return %c0_i32, %c0_i32_0 : i32, i32
  }
  func.func @transform_5(%arg0: i32, %arg1: i32) -> (i32, i32) {
    %c0_i32 = arith.constant 0 : i32
    %c0_i32_0 = arith.constant 0 : i32
    %c0_i32_1 = arith.constant 0 : i32
    return %c0_i32, %c0_i32_0 : i32, i32
  }
  func.func @transform_6(%arg0: i32, %arg1: i32) -> (i32, i32) {
    %c0_i32 = arith.constant 0 : i32
    %c0_i32_0 = arith.constant 0 : i32
    %c0_i32_1 = arith.constant 0 : i32
    return %c0_i32, %c0_i32_0 : i32, i32
  }
  func.func @transform_7(%arg0: i32, %arg1: i32) -> (i32, i32) {
    %c0_i32 = arith.constant 0 : i32
    %c0_i32_0 = arith.constant 0 : i32
    %c0_i32_1 = arith.constant 0 : i32
    return %c0_i32, %c0_i32_0 : i32, i32
  }
  func.func @transform_8(%arg0: i32, %arg1: i32) -> (i32, i32) {
    %c0_i32 = arith.constant 0 : i32
    %c0_i32_0 = arith.constant 0 : i32
    %c0_i32_1 = arith.constant 0 : i32
    return %c0_i32, %c0_i32_0 : i32, i32
  }
  func.func @transform_9(%arg0: i32, %arg1: i32) -> (i32, i32) {
    %c0_i32 = arith.constant 0 : i32
    %c0_i32_0 = arith.constant 0 : i32
    %c0_i32_1 = arith.constant 0 : i32
    return %c0_i32, %c0_i32_0 : i32, i32
  }
  func.func @transform_10(%arg0: i32, %arg1: i32) -> (i32, i32, i32) {
    %c0_i32 = arith.constant 0 : i32
    %c0_i32_0 = arith.constant 0 : i32
    return %arg0, %arg1, %c0_i32 : i32, i32, i32
  }
}

module attributes {stable_mosaic.version = 11 : i64} {
  func.func @_attn_block_kernel(%arg0: i32, %arg1: i32, %arg2: memref<1x8x32xbf16, #tpu.memory_space<vmem>>, %arg3: memref<1x8x32xbf16, #tpu.memory_space<vmem>>, %arg4: memref<32x32xbf16, #tpu.memory_space<vmem>>, %arg5: memref<1x32xf32, #tpu.memory_space<vmem>>, %arg6: memref<32x64xbf16, #tpu.memory_space<vmem>>, %arg7: memref<1x64xf32, #tpu.memory_space<vmem>>, %arg8: memref<32x32xbf16, #tpu.memory_space<vmem>>, %arg9: memref<1x32xf32, #tpu.memory_space<vmem>>, %arg10: memref<1x32xf32, #tpu.memory_space<vmem>>, %arg11: memref<1x32xf32, #tpu.memory_space<vmem>>, %arg12: memref<1x8x32xbf16, #tpu.memory_space<vmem>>) attributes {dimension_semantics = [#tpu.dimension_semantics<parallel>, #tpu.dimension_semantics<parallel>], iteration_bounds = array<i64: 2, 1>, scalar_prefetch = 0 : i64, scratch_operands = 0 : i64, tpu.core_type = #tpu.core_type<tc>, window_params = [{transform_indices = @transform_0, window_bounds = array<i64: 1, 8, 32>}, {transform_indices = @transform_1, window_bounds = array<i64: 1, 8, 32>}, {pipeline_mode = #tpu.pipeline_mode<synchronous>, transform_indices = @transform_2, window_bounds = array<i64: 32, 32>}, {pipeline_mode = #tpu.pipeline_mode<synchronous>, transform_indices = @transform_3, window_bounds = array<i64: 1, 32>}, {pipeline_mode = #tpu.pipeline_mode<synchronous>, transform_indices = @transform_4, window_bounds = array<i64: 32, 64>}, {pipeline_mode = #tpu.pipeline_mode<synchronous>, transform_indices = @transform_5, window_bounds = array<i64: 1, 64>}, {pipeline_mode = #tpu.pipeline_mode<synchronous>, transform_indices = @transform_6, window_bounds = array<i64: 32, 32>}, {pipeline_mode = #tpu.pipeline_mode<synchronous>, transform_indices = @transform_7, window_bounds = array<i64: 1, 32>}, {pipeline_mode = #tpu.pipeline_mode<synchronous>, transform_indices = @transform_8, window_bounds = array<i64: 1, 32>}, {pipeline_mode = #tpu.pipeline_mode<synchronous>, transform_indices = @transform_9, window_bounds = array<i64: 1, 32>}, {transform_indices = @transform_10, window_bounds = array<i64: 1, 8, 32>}]} {
    %c0 = arith.constant 0 : index
    %c0_0 = arith.constant 0 : index
    %c0_1 = arith.constant 0 : index
    %0 = vector.load %arg2[%c0, %c0_0, %c0_1] : memref<1x8x32xbf16, #tpu.memory_space<vmem>>, vector<1x8x32xbf16>
    %1 = vector.shape_cast %0 : vector<1x8x32xbf16> to vector<8x32xbf16>
    %2 = arith.extf %1 : vector<8x32xbf16> to vector<8x32xf32>
    %c0_2 = arith.constant 0 : index
    %c0_3 = arith.constant 0 : index
    %c0_4 = arith.constant 0 : index
    %3 = vector.load %arg3[%c0_2, %c0_3, %c0_4] : memref<1x8x32xbf16, #tpu.memory_space<vmem>>, vector<1x8x32xbf16>
    %4 = vector.shape_cast %3 : vector<1x8x32xbf16> to vector<8x32xbf16>
    %5 = arith.truncf %2 : vector<8x32xf32> to vector<8x32xbf16>
    %c0_5 = arith.constant 0 : index
    %c0_6 = arith.constant 0 : index
    %6 = vector.load %arg4[%c0_5, %c0_6] : memref<32x32xbf16, #tpu.memory_space<vmem>>, vector<32x32xbf16>
    %cst = arith.constant dense<0.000000e+00> : vector<8x32xf32>
    %7 = tpu.matmul %5, %6, %cst {dimension_numbers = #tpu.dot_dimension_numbers<[1], [0], [0], [1], [0, 0, 1, 1], [], []>} : vector<8x32xbf16>, vector<32x32xbf16>, vector<8x32xf32> -> vector<8x32xf32>
    %c0_7 = arith.constant 0 : index
    %c0_8 = arith.constant 0 : index
    %8 = vector.load %arg5[%c0_7, %c0_8] : memref<1x32xf32, #tpu.memory_space<vmem>>, vector<1x32xf32>
    %9 = vector.broadcast %8 : vector<1x32xf32> to vector<8x32xf32>
    %10 = arith.addf %7, %9 : vector<8x32xf32>
    %c0_9 = arith.constant 0 : index
    %c0_10 = arith.constant 0 : index
    %11 = vector.load %arg6[%c0_9, %c0_10] : memref<32x64xbf16, #tpu.memory_space<vmem>>, vector<32x64xbf16>
    %cst_11 = arith.constant dense<0.000000e+00> : vector<8x64xf32>
    %12 = tpu.matmul %4, %11, %cst_11 {dimension_numbers = #tpu.dot_dimension_numbers<[1], [0], [0], [1], [0, 0, 1, 1], [], []>} : vector<8x32xbf16>, vector<32x64xbf16>, vector<8x64xf32> -> vector<8x64xf32>
    %c0_12 = arith.constant 0 : index
    %c0_13 = arith.constant 0 : index
    %13 = vector.load %arg7[%c0_12, %c0_13] : memref<1x64xf32, #tpu.memory_space<vmem>>, vector<1x64xf32>
    %14 = vector.broadcast %13 : vector<1x64xf32> to vector<8x64xf32>
    %15 = arith.addf %12, %14 : vector<8x64xf32>
    %16 = vector.extract_strided_slice %15 {offsets = [0, 0], sizes = [8, 32], strides = [1, 1]} : vector<8x64xf32> to vector<8x32xf32>
    %17 = vector.extract_strided_slice %15 {offsets = [0, 32], sizes = [8, 32], strides = [1, 1]} : vector<8x64xf32> to vector<8x32xf32>
    %c0_14 = arith.constant 0 : index
    %c0_15 = arith.constant 0 : index
    %18 = vector.load %arg8[%c0_14, %c0_15] : memref<32x32xbf16, #tpu.memory_space<vmem>>, vector<32x32xbf16>
    %c0_16 = arith.constant 0 : index
    %c0_17 = arith.constant 0 : index
    %19 = vector.load %arg9[%c0_16, %c0_17] : memref<1x32xf32, #tpu.memory_space<vmem>>, vector<1x32xf32>
    %20 = vector.extract_strided_slice %10 {offsets = [0, 0], sizes = [8, 8], strides = [1, 1]} : vector<8x32xf32> to vector<8x8xf32>
    %21 = arith.truncf %20 : vector<8x8xf32> to vector<8x8xbf16>
    %22 = vector.extract_strided_slice %16 {offsets = [0, 0], sizes = [8, 8], strides = [1, 1]} : vector<8x32xf32> to vector<8x8xf32>
    %23 = arith.truncf %22 : vector<8x8xf32> to vector<8x8xbf16>
    %24 = vector.extract_strided_slice %17 {offsets = [0, 0], sizes = [8, 8], strides = [1, 1]} : vector<8x32xf32> to vector<8x8xf32>
    %25 = arith.truncf %24 : vector<8x8xf32> to vector<8x8xbf16>
    %cst_18 = arith.constant dense<0.000000e+00> : vector<8x8xf32>
    %26 = tpu.matmul %21, %23, %cst_18 {dimension_numbers = #tpu.dot_dimension_numbers<[1], [1], [0], [0], [0, 0, 1, 0], [], []>} : vector<8x8xbf16>, vector<8x8xbf16>, vector<8x8xf32> -> vector<8x8xf32>
    %cst_19 = arith.constant dense<0xFF800000> : vector<8xf32>
    %27 = vector.multi_reduction <maximumf>, %26, %cst_19 [1] : vector<8x8xf32> to vector<8xf32>
    %28 = vector.shape_cast %27 : vector<8xf32> to vector<8x1xf32>
    %29 = vector.broadcast %28 : vector<8x1xf32> to vector<8x8xf32>
    %30 = arith.subf %26, %29 : vector<8x8xf32>
    %31 = math.exp %30 : vector<8x8xf32>
    %cst_20 = arith.constant dense<0.000000e+00> : vector<8xf32>
    %32 = vector.multi_reduction <add>, %31, %cst_20 [1] : vector<8x8xf32> to vector<8xf32>
    %33 = vector.shape_cast %32 : vector<8xf32> to vector<8x1xf32>
    %34 = tpu.reciprocal %33 {approx = true} : vector<8x1xf32> -> vector<8x1xf32>
    %35 = vector.broadcast %34 : vector<8x1xf32> to vector<8x8xf32>
    %36 = arith.mulf %31, %35 : vector<8x8xf32>
    %37 = arith.truncf %36 : vector<8x8xf32> to vector<8x8xbf16>
    %cst_21 = arith.constant dense<0.000000e+00> : vector<8x8xf32>
    %38 = tpu.matmul %37, %25, %cst_21 {dimension_numbers = #tpu.dot_dimension_numbers<[1], [0], [0], [1], [0, 0, 1, 1], [], []>} : vector<8x8xbf16>, vector<8x8xbf16>, vector<8x8xf32> -> vector<8x8xf32>
    %39 = arith.truncf %38 : vector<8x8xf32> to vector<8x8xbf16>
    %40 = vector.extract_strided_slice %18 {offsets = [0, 0], sizes = [8, 32], strides = [1, 1]} : vector<32x32xbf16> to vector<8x32xbf16>
    %cst_22 = arith.constant dense<0.000000e+00> : vector<8x32xf32>
    %41 = tpu.matmul %39, %40, %cst_22 {dimension_numbers = #tpu.dot_dimension_numbers<[1], [0], [0], [1], [0, 0, 1, 1], [], []>} : vector<8x8xbf16>, vector<8x32xbf16>, vector<8x32xf32> -> vector<8x32xf32>
    %42 = vector.broadcast %19 : vector<1x32xf32> to vector<8x32xf32>
    %43 = arith.addf %42, %41 : vector<8x32xf32>
    %44 = vector.extract_strided_slice %10 {offsets = [0, 8], sizes = [8, 8], strides = [1, 1]} : vector<8x32xf32> to vector<8x8xf32>
    %45 = arith.truncf %44 : vector<8x8xf32> to vector<8x8xbf16>
    %46 = vector.extract_strided_slice %16 {offsets = [0, 8], sizes = [8, 8], strides = [1, 1]} : vector<8x32xf32> to vector<8x8xf32>
    %47 = arith.truncf %46 : vector<8x8xf32> to vector<8x8xbf16>
    %48 = vector.extract_strided_slice %17 {offsets = [0, 8], sizes = [8, 8], strides = [1, 1]} : vector<8x32xf32> to vector<8x8xf32>
    %49 = arith.truncf %48 : vector<8x8xf32> to vector<8x8xbf16>
    %cst_23 = arith.constant dense<0.000000e+00> : vector<8x8xf32>
    %50 = tpu.matmul %45, %47, %cst_23 {dimension_numbers = #tpu.dot_dimension_numbers<[1], [1], [0], [0], [0, 0, 1, 0], [], []>} : vector<8x8xbf16>, vector<8x8xbf16>, vector<8x8xf32> -> vector<8x8xf32>
    %cst_24 = arith.constant dense<0xFF800000> : vector<8xf32>
    %51 = vector.multi_reduction <maximumf>, %50, %cst_24 [1] : vector<8x8xf32> to vector<8xf32>
    %52 = vector.shape_cast %51 : vector<8xf32> to vector<8x1xf32>
    %53 = vector.broadcast %52 : vector<8x1xf32> to vector<8x8xf32>
    %54 = arith.subf %50, %53 : vector<8x8xf32>
    %55 = math.exp %54 : vector<8x8xf32>
    %cst_25 = arith.constant dense<0.000000e+00> : vector<8xf32>
    %56 = vector.multi_reduction <add>, %55, %cst_25 [1] : vector<8x8xf32> to vector<8xf32>
    %57 = vector.shape_cast %56 : vector<8xf32> to vector<8x1xf32>
    %58 = tpu.reciprocal %57 {approx = true} : vector<8x1xf32> -> vector<8x1xf32>
    %59 = vector.broadcast %58 : vector<8x1xf32> to vector<8x8xf32>
    %60 = arith.mulf %55, %59 : vector<8x8xf32>
    %61 = arith.truncf %60 : vector<8x8xf32> to vector<8x8xbf16>
    %cst_26 = arith.constant dense<0.000000e+00> : vector<8x8xf32>
    %62 = tpu.matmul %61, %49, %cst_26 {dimension_numbers = #tpu.dot_dimension_numbers<[1], [0], [0], [1], [0, 0, 1, 1], [], []>} : vector<8x8xbf16>, vector<8x8xbf16>, vector<8x8xf32> -> vector<8x8xf32>
    %63 = arith.truncf %62 : vector<8x8xf32> to vector<8x8xbf16>
    %64 = vector.extract_strided_slice %18 {offsets = [8, 0], sizes = [8, 32], strides = [1, 1]} : vector<32x32xbf16> to vector<8x32xbf16>
    %cst_27 = arith.constant dense<0.000000e+00> : vector<8x32xf32>
    %65 = tpu.matmul %63, %64, %cst_27 {dimension_numbers = #tpu.dot_dimension_numbers<[1], [0], [0], [1], [0, 0, 1, 1], [], []>} : vector<8x8xbf16>, vector<8x32xbf16>, vector<8x32xf32> -> vector<8x32xf32>
    %66 = arith.addf %43, %65 : vector<8x32xf32>
    %67 = vector.extract_strided_slice %10 {offsets = [0, 16], sizes = [8, 8], strides = [1, 1]} : vector<8x32xf32> to vector<8x8xf32>
    %68 = arith.truncf %67 : vector<8x8xf32> to vector<8x8xbf16>
    %69 = vector.extract_strided_slice %16 {offsets = [0, 16], sizes = [8, 8], strides = [1, 1]} : vector<8x32xf32> to vector<8x8xf32>
    %70 = arith.truncf %69 : vector<8x8xf32> to vector<8x8xbf16>
    %71 = vector.extract_strided_slice %17 {offsets = [0, 16], sizes = [8, 8], strides = [1, 1]} : vector<8x32xf32> to vector<8x8xf32>
    %72 = arith.truncf %71 : vector<8x8xf32> to vector<8x8xbf16>
    %cst_28 = arith.constant dense<0.000000e+00> : vector<8x8xf32>
    %73 = tpu.matmul %68, %70, %cst_28 {dimension_numbers = #tpu.dot_dimension_numbers<[1], [1], [0], [0], [0, 0, 1, 0], [], []>} : vector<8x8xbf16>, vector<8x8xbf16>, vector<8x8xf32> -> vector<8x8xf32>
    %cst_29 = arith.constant dense<0xFF800000> : vector<8xf32>
    %74 = vector.multi_reduction <maximumf>, %73, %cst_29 [1] : vector<8x8xf32> to vector<8xf32>
    %75 = vector.shape_cast %74 : vector<8xf32> to vector<8x1xf32>
    %76 = vector.broadcast %75 : vector<8x1xf32> to vector<8x8xf32>
    %77 = arith.subf %73, %76 : vector<8x8xf32>
    %78 = math.exp %77 : vector<8x8xf32>
    %cst_30 = arith.constant dense<0.000000e+00> : vector<8xf32>
    %79 = vector.multi_reduction <add>, %78, %cst_30 [1] : vector<8x8xf32> to vector<8xf32>
    %80 = vector.shape_cast %79 : vector<8xf32> to vector<8x1xf32>
    %81 = tpu.reciprocal %80 {approx = true} : vector<8x1xf32> -> vector<8x1xf32>
    %82 = vector.broadcast %81 : vector<8x1xf32> to vector<8x8xf32>
    %83 = arith.mulf %78, %82 : vector<8x8xf32>
    %84 = arith.truncf %83 : vector<8x8xf32> to vector<8x8xbf16>
    %cst_31 = arith.constant dense<0.000000e+00> : vector<8x8xf32>
    %85 = tpu.matmul %84, %72, %cst_31 {dimension_numbers = #tpu.dot_dimension_numbers<[1], [0], [0], [1], [0, 0, 1, 1], [], []>} : vector<8x8xbf16>, vector<8x8xbf16>, vector<8x8xf32> -> vector<8x8xf32>
    %86 = arith.truncf %85 : vector<8x8xf32> to vector<8x8xbf16>
    %87 = vector.extract_strided_slice %18 {offsets = [16, 0], sizes = [8, 32], strides = [1, 1]} : vector<32x32xbf16> to vector<8x32xbf16>
    %cst_32 = arith.constant dense<0.000000e+00> : vector<8x32xf32>
    %88 = tpu.matmul %86, %87, %cst_32 {dimension_numbers = #tpu.dot_dimension_numbers<[1], [0], [0], [1], [0, 0, 1, 1], [], []>} : vector<8x8xbf16>, vector<8x32xbf16>, vector<8x32xf32> -> vector<8x32xf32>
    %89 = arith.addf %66, %88 : vector<8x32xf32>
    %90 = vector.extract_strided_slice %10 {offsets = [0, 24], sizes = [8, 8], strides = [1, 1]} : vector<8x32xf32> to vector<8x8xf32>
    %91 = arith.truncf %90 : vector<8x8xf32> to vector<8x8xbf16>
    %92 = vector.extract_strided_slice %16 {offsets = [0, 24], sizes = [8, 8], strides = [1, 1]} : vector<8x32xf32> to vector<8x8xf32>
    %93 = arith.truncf %92 : vector<8x8xf32> to vector<8x8xbf16>
    %94 = vector.extract_strided_slice %17 {offsets = [0, 24], sizes = [8, 8], strides = [1, 1]} : vector<8x32xf32> to vector<8x8xf32>
    %95 = arith.truncf %94 : vector<8x8xf32> to vector<8x8xbf16>
    %cst_33 = arith.constant dense<0.000000e+00> : vector<8x8xf32>
    %96 = tpu.matmul %91, %93, %cst_33 {dimension_numbers = #tpu.dot_dimension_numbers<[1], [1], [0], [0], [0, 0, 1, 0], [], []>} : vector<8x8xbf16>, vector<8x8xbf16>, vector<8x8xf32> -> vector<8x8xf32>
    %cst_34 = arith.constant dense<0xFF800000> : vector<8xf32>
    %97 = vector.multi_reduction <maximumf>, %96, %cst_34 [1] : vector<8x8xf32> to vector<8xf32>
    %98 = vector.shape_cast %97 : vector<8xf32> to vector<8x1xf32>
    %99 = vector.broadcast %98 : vector<8x1xf32> to vector<8x8xf32>
    %100 = arith.subf %96, %99 : vector<8x8xf32>
    %101 = math.exp %100 : vector<8x8xf32>
    %cst_35 = arith.constant dense<0.000000e+00> : vector<8xf32>
    %102 = vector.multi_reduction <add>, %101, %cst_35 [1] : vector<8x8xf32> to vector<8xf32>
    %103 = vector.shape_cast %102 : vector<8xf32> to vector<8x1xf32>
    %104 = tpu.reciprocal %103 {approx = true} : vector<8x1xf32> -> vector<8x1xf32>
    %105 = vector.broadcast %104 : vector<8x1xf32> to vector<8x8xf32>
    %106 = arith.mulf %101, %105 : vector<8x8xf32>
    %107 = arith.truncf %106 : vector<8x8xf32> to vector<8x8xbf16>
    %cst_36 = arith.constant dense<0.000000e+00> : vector<8x8xf32>
    %108 = tpu.matmul %107, %95, %cst_36 {dimension_numbers = #tpu.dot_dimension_numbers<[1], [0], [0], [1], [0, 0, 1, 1], [], []>} : vector<8x8xbf16>, vector<8x8xbf16>, vector<8x8xf32> -> vector<8x8xf32>
    %109 = arith.truncf %108 : vector<8x8xf32> to vector<8x8xbf16>
    %110 = vector.extract_strided_slice %18 {offsets = [24, 0], sizes = [8, 32], strides = [1, 1]} : vector<32x32xbf16> to vector<8x32xbf16>
    %cst_37 = arith.constant dense<0.000000e+00> : vector<8x32xf32>
    %111 = tpu.matmul %109, %110, %cst_37 {dimension_numbers = #tpu.dot_dimension_numbers<[1], [0], [0], [1], [0, 0, 1, 1], [], []>} : vector<8x8xbf16>, vector<8x32xbf16>, vector<8x32xf32> -> vector<8x32xf32>
    %112 = arith.addf %89, %111 : vector<8x32xf32>
    %c0_38 = arith.constant 0 : index
    %c0_39 = arith.constant 0 : index
    %113 = vector.load %arg10[%c0_38, %c0_39] : memref<1x32xf32, #tpu.memory_space<vmem>>, vector<1x32xf32>
    %c0_40 = arith.constant 0 : index
    %c0_41 = arith.constant 0 : index
    %114 = vector.load %arg11[%c0_40, %c0_41] : memref<1x32xf32, #tpu.memory_space<vmem>>, vector<1x32xf32>
    %115 = arith.addf %2, %112 : vector<8x32xf32>
    %cst_42 = arith.constant dense<0.000000e+00> : vector<8xf32>
    %116 = vector.multi_reduction <add>, %115, %cst_42 [1] : vector<8x32xf32> to vector<8xf32>
    %117 = vector.shape_cast %116 : vector<8xf32> to vector<8x1xf32>
    %cst_43 = arith.constant 3.200000e+01 : f32
    %118 = vector.broadcast %cst_43 : f32 to vector<8x1xf32>
    %119 = arith.divf %117, %118 : vector<8x1xf32>
    %120 = vector.broadcast %119 : vector<8x1xf32> to vector<8x32xf32>
    %121 = arith.subf %115, %120 : vector<8x32xf32>
    %122 = arith.mulf %121, %121 : vector<8x32xf32>
    %cst_44 = arith.constant dense<0.000000e+00> : vector<8xf32>
    %123 = vector.multi_reduction <add>, %122, %cst_44 [1] : vector<8x32xf32> to vector<8xf32>
    %124 = vector.shape_cast %123 : vector<8xf32> to vector<8x1xf32>
    %cst_45 = arith.constant 3.200000e+01 : f32
    %125 = vector.broadcast %cst_45 : f32 to vector<8x1xf32>
    %126 = arith.divf %124, %125 : vector<8x1xf32>
    %127 = vector.broadcast %119 : vector<8x1xf32> to vector<8x32xf32>
    %128 = arith.subf %115, %127 : vector<8x32xf32>
    %cst_46 = arith.constant 9.99999974E-6 : f32
    %129 = vector.broadcast %cst_46 : f32 to vector<8x1xf32>
    %130 = arith.addf %126, %129 : vector<8x1xf32>
    %131 = math.rsqrt %130 : vector<8x1xf32>
    %132 = vector.broadcast %131 : vector<8x1xf32> to vector<8x32xf32>
    %133 = arith.mulf %128, %132 : vector<8x32xf32>
    %134 = vector.broadcast %113 : vector<1x32xf32> to vector<8x32xf32>
    %135 = arith.mulf %133, %134 : vector<8x32xf32>
    %136 = vector.broadcast %114 : vector<1x32xf32> to vector<8x32xf32>
    %137 = arith.addf %135, %136 : vector<8x32xf32>
    %138 = arith.truncf %137 : vector<8x32xf32> to vector<8x32xbf16>
    %c0_47 = arith.constant 0 : index
    %c0_48 = arith.constant 0 : index
    %c0_49 = arith.constant 0 : index
    %139 = vector.load %arg12[%c0_47, %c0_48, %c0_49] : memref<1x8x32xbf16, #tpu.memory_space<vmem>>, vector<1x8x32xbf16>
    %140 = vector.shape_cast %139 : vector<1x8x32xbf16> to vector<8x32xbf16>
    %141 = vector.shape_cast %138 : vector<8x32xbf16> to vector<1x8x32xbf16>
    tpu.vector_store %arg12[%c0_47, %c0_48, %c0_49], %141 {strides = array<i32>} : memref<1x8x32xbf16, #tpu.memory_space<vmem>>, vector<1x8x32xbf16>,
    return
  }
  func.func @transform_0(%arg0: i32, %arg1: i32) -> (i32, i32, i32) {
    %c0_i32 = arith.constant 0 : i32
    %c0_i32_0 = arith.constant 0 : i32
    return %arg0, %arg1, %c0_i32 : i32, i32, i32
  }
  func.func @transform_1(%arg0: i32, %arg1: i32) -> (i32, i32, i32) {
    %c0_i32 = arith.constant 0 : i32
    %c0_i32_0 = arith.constant 0 : i32
    %c0_i32_1 = arith.constant 0 : i32
    return %arg0, %c0_i32, %c0_i32_0 : i32, i32, i32
  }
  func.func @transform_2(%arg0: i32, %arg1: i32) -> (i32, i32) {
    %c0_i32 = arith.constant 0 : i32
    %c0_i32_0 = arith.constant 0 : i32
    %c0_i32_1 = arith.constant 0 : i32
    return %c0_i32, %c0_i32_0 : i32, i32
  }
  func.func @transform_3(%arg0: i32, %arg1: i32) -> (i32, i32) {
    %c0_i32 = arith.constant 0 : i32
    %c0_i32_0 = arith.constant 0 : i32
    %c0_i32_1 = arith.constant 0 : i32
    return %c0_i32, %c0_i32_0 : i32, i32
  }
  func.func @transform_4(%arg0: i32, %arg1: i32) -> (i32, i32) {
    %c0_i32 = arith.constant 0 : i32
    %c0_i32_0 = arith.constant 0 : i32
    %c0_i32_1 = arith.constant 0 : i32
    return %c0_i32, %c0_i32_0 : i32, i32
  }
  func.func @transform_5(%arg0: i32, %arg1: i32) -> (i32, i32) {
    %c0_i32 = arith.constant 0 : i32
    %c0_i32_0 = arith.constant 0 : i32
    %c0_i32_1 = arith.constant 0 : i32
    return %c0_i32, %c0_i32_0 : i32, i32
  }
  func.func @transform_6(%arg0: i32, %arg1: i32) -> (i32, i32) {
    %c0_i32 = arith.constant 0 : i32
    %c0_i32_0 = arith.constant 0 : i32
    %c0_i32_1 = arith.constant 0 : i32
    return %c0_i32, %c0_i32_0 : i32, i32
  }
  func.func @transform_7(%arg0: i32, %arg1: i32) -> (i32, i32) {
    %c0_i32 = arith.constant 0 : i32
    %c0_i32_0 = arith.constant 0 : i32
    %c0_i32_1 = arith.constant 0 : i32
    return %c0_i32, %c0_i32_0 : i32, i32
  }
  func.func @transform_8(%arg0: i32, %arg1: i32) -> (i32, i32) {
    %c0_i32 = arith.constant 0 : i32
    %c0_i32_0 = arith.constant 0 : i32
    %c0_i32_1 = arith.constant 0 : i32
    return %c0_i32, %c0_i32_0 : i32, i32
  }
  func.func @transform_9(%arg0: i32, %arg1: i32) -> (i32, i32) {
    %c0_i32 = arith.constant 0 : i32
    %c0_i32_0 = arith.constant 0 : i32
    %c0_i32_1 = arith.constant 0 : i32
    return %c0_i32, %c0_i32_0 : i32, i32
  }
  func.func @transform_10(%arg0: i32, %arg1: i32) -> (i32, i32, i32) {
    %c0_i32 = arith.constant 0 : i32
    %c0_i32_0 = arith.constant 0 : i32
    return %arg0, %arg1, %c0_i32 : i32, i32, i32
  }
}

module attributes {stable_mosaic.version = 11 : i64} {
  func.func @_ffn_block_kernel(%arg0: i32, %arg1: memref<16x32xbf16, #tpu.memory_space<vmem>>, %arg2: memref<32x64xbf16, #tpu.memory_space<vmem>>, %arg3: memref<1x64xf32, #tpu.memory_space<vmem>>, %arg4: memref<64x32xbf16, #tpu.memory_space<vmem>>, %arg5: memref<1x32xf32, #tpu.memory_space<vmem>>, %arg6: memref<1x32xf32, #tpu.memory_space<vmem>>, %arg7: memref<1x32xf32, #tpu.memory_space<vmem>>, %arg8: memref<16x32xbf16, #tpu.memory_space<vmem>>) attributes {dimension_semantics = [#tpu.dimension_semantics<parallel>], iteration_bounds = array<i64: 1>, scalar_prefetch = 0 : i64, scratch_operands = 0 : i64, tpu.core_type = #tpu.core_type<tc>, window_params = [{transform_indices = @transform_0, window_bounds = array<i64: 16, 32>}, {pipeline_mode = #tpu.pipeline_mode<synchronous>, transform_indices = @transform_1, window_bounds = array<i64: 32, 64>}, {pipeline_mode = #tpu.pipeline_mode<synchronous>, transform_indices = @transform_2, window_bounds = array<i64: 1, 64>}, {pipeline_mode = #tpu.pipeline_mode<synchronous>, transform_indices = @transform_3, window_bounds = array<i64: 64, 32>}, {pipeline_mode = #tpu.pipeline_mode<synchronous>, transform_indices = @transform_4, window_bounds = array<i64: 1, 32>}, {pipeline_mode = #tpu.pipeline_mode<synchronous>, transform_indices = @transform_5, window_bounds = array<i64: 1, 32>}, {pipeline_mode = #tpu.pipeline_mode<synchronous>, transform_indices = @transform_6, window_bounds = array<i64: 1, 32>}, {transform_indices = @transform_7, window_bounds = array<i64: 16, 32>}]} {
    %c0 = arith.constant 0 : index
    %c0_0 = arith.constant 0 : index
    %0 = vector.load %arg1[%c0, %c0_0] : memref<16x32xbf16, #tpu.memory_space<vmem>>, vector<16x32xbf16>
    %1 = arith.extf %0 : vector<16x32xbf16> to vector<16x32xf32>
    %c0_1 = arith.constant 0 : index
    %c0_2 = arith.constant 0 : index
    %2 = vector.load %arg2[%c0_1, %c0_2] : memref<32x64xbf16, #tpu.memory_space<vmem>>, vector<32x64xbf16>
    %cst = arith.constant dense<0.000000e+00> : vector<16x64xf32>
    %3 = tpu.matmul %0, %2, %cst {dimension_numbers = #tpu.dot_dimension_numbers<[1], [0], [0], [1], [0, 0, 1, 1], [], []>} : vector<16x32xbf16>, vector<32x64xbf16>, vector<16x64xf32> -> vector<16x64xf32>
    %c0_3 = arith.constant 0 : index
    %c0_4 = arith.constant 0 : index
    %4 = vector.load %arg3[%c0_3, %c0_4] : memref<1x64xf32, #tpu.memory_space<vmem>>, vector<1x64xf32>
    %5 = vector.broadcast %4 : vector<1x64xf32> to vector<16x64xf32>
    %6 = arith.addf %3, %5 : vector<16x64xf32>
    %cst_5 = arith.constant 0.000000e+00 : f32
    %7 = vector.broadcast %cst_5 : f32 to vector<16x64xf32>
    %8 = arith.maximumf %6, %7 : vector<16x64xf32>
    %9 = arith.truncf %8 : vector<16x64xf32> to vector<16x64xbf16>
    %c0_6 = arith.constant 0 : index
    %c0_7 = arith.constant 0 : index
    %10 = vector.load %arg4[%c0_6, %c0_7] : memref<64x32xbf16, #tpu.memory_space<vmem>>, vector<64x32xbf16>
    %cst_8 = arith.constant dense<0.000000e+00> : vector<16x32xf32>
    %11 = tpu.matmul %9, %10, %cst_8 {dimension_numbers = #tpu.dot_dimension_numbers<[1], [0], [0], [1], [0, 0, 1, 1], [], []>} : vector<16x64xbf16>, vector<64x32xbf16>, vector<16x32xf32> -> vector<16x32xf32>
    %c0_9 = arith.constant 0 : index
    %c0_10 = arith.constant 0 : index
    %12 = vector.load %arg5[%c0_9, %c0_10] : memref<1x32xf32, #tpu.memory_space<vmem>>, vector<1x32xf32>
    %13 = vector.broadcast %12 : vector<1x32xf32> to vector<16x32xf32>
    %14 = arith.addf %11, %13 : vector<16x32xf32>
    %c0_11 = arith.constant 0 : index
    %c0_12 = arith.constant 0 : index
    %15 = vector.load %arg6[%c0_11, %c0_12] : memref<1x32xf32, #tpu.memory_space<vmem>>, vector<1x32xf32>
    %c0_13 = arith.constant 0 : index
    %c0_14 = arith.constant 0 : index
    %16 = vector.load %arg7[%c0_13, %c0_14] : memref<1x32xf32, #tpu.memory_space<vmem>>, vector<1x32xf32>
    %17 = arith.addf %1, %14 : vector<16x32xf32>
    %cst_15 = arith.constant dense<0.000000e+00> : vector<16xf32>
    %18 = vector.multi_reduction <add>, %17, %cst_15 [1] : vector<16x32xf32> to vector<16xf32>
    %19 = vector.shape_cast %18 : vector<16xf32> to vector<16x1xf32>
    %cst_16 = arith.constant 3.200000e+01 : f32
    %20 = vector.broadcast %cst_16 : f32 to vector<16x1xf32>
    %21 = arith.divf %19, %20 : vector<16x1xf32>
    %22 = vector.broadcast %21 : vector<16x1xf32> to vector<16x32xf32>
    %23 = arith.subf %17, %22 : vector<16x32xf32>
    %24 = arith.mulf %23, %23 : vector<16x32xf32>
    %cst_17 = arith.constant dense<0.000000e+00> : vector<16xf32>
    %25 = vector.multi_reduction <add>, %24, %cst_17 [1] : vector<16x32xf32> to vector<16xf32>
    %26 = vector.shape_cast %25 : vector<16xf32> to vector<16x1xf32>
    %cst_18 = arith.constant 3.200000e+01 : f32
    %27 = vector.broadcast %cst_18 : f32 to vector<16x1xf32>
    %28 = arith.divf %26, %27 : vector<16x1xf32>
    %29 = vector.broadcast %21 : vector<16x1xf32> to vector<16x32xf32>
    %30 = arith.subf %17, %29 : vector<16x32xf32>
    %cst_19 = arith.constant 9.99999974E-6 : f32
    %31 = vector.broadcast %cst_19 : f32 to vector<16x1xf32>
    %32 = arith.addf %28, %31 : vector<16x1xf32>
    %33 = math.rsqrt %32 : vector<16x1xf32>
    %34 = vector.broadcast %33 : vector<16x1xf32> to vector<16x32xf32>
    %35 = arith.mulf %30, %34 : vector<16x32xf32>
    %36 = vector.broadcast %15 : vector<1x32xf32> to vector<16x32xf32>
    %37 = arith.mulf %35, %36 : vector<16x32xf32>
    %38 = vector.broadcast %16 : vector<1x32xf32> to vector<16x32xf32>
    %39 = arith.addf %37, %38 : vector<16x32xf32>
    %40 = arith.truncf %39 : vector<16x32xf32> to vector<16x32xbf16>
    %c0_20 = arith.constant 0 : index
    %c0_21 = arith.constant 0 : index
    %41 = vector.load %arg8[%c0_20, %c0_21] : memref<16x32xbf16, #tpu.memory_space<vmem>>, vector<16x32xbf16>
    tpu.vector_store %arg8[%c0_20, %c0_21], %40 {strides = array<i32>} : memref<16x32xbf16, #tpu.memory_space<vmem>>, vector<16x32xbf16>,
    return
  }
  func.func @transform_0(%arg0: i32) -> (i32, i32) {
    %c0_i32 = arith.constant 0 : i32
    %c0_i32_0 = arith.constant 0 : i32
    return %arg0, %c0_i32 : i32, i32
  }
  func.func @transform_1(%arg0: i32) -> (i32, i32) {
    %c0_i32 = arith.constant 0 : i32
    %c0_i32_0 = arith.constant 0 : i32
    %c0_i32_1 = arith.constant 0 : i32
    return %c0_i32, %c0_i32_0 : i32, i32
  }
  func.func @transform_2(%arg0: i32) -> (i32, i32) {
    %c0_i32 = arith.constant 0 : i32
    %c0_i32_0 = arith.constant 0 : i32
    %c0_i32_1 = arith.constant 0 : i32
    return %c0_i32, %c0_i32_0 : i32, i32
  }
  func.func @transform_3(%arg0: i32) -> (i32, i32) {
    %c0_i32 = arith.constant 0 : i32
    %c0_i32_0 = arith.constant 0 : i32
    %c0_i32_1 = arith.constant 0 : i32
    return %c0_i32, %c0_i32_0 : i32, i32
  }
  func.func @transform_4(%arg0: i32) -> (i32, i32) {
    %c0_i32 = arith.constant 0 : i32
    %c0_i32_0 = arith.constant 0 : i32
    %c0_i32_1 = arith.constant 0 : i32
    return %c0_i32, %c0_i32_0 : i32, i32
  }
  func.func @transform_5(%arg0: i32) -> (i32, i32) {
    %c0_i32 = arith.constant 0 : i32
    %c0_i32_0 = arith.constant 0 : i32
    %c0_i32_1 = arith.constant 0 : i32
    return %c0_i32, %c0_i32_0 : i32, i32
  }
  func.func @transform_6(%arg0: i32) -> (i32, i32) {
    %c0_i32 = arith.constant 0 : i32
    %c0_i32_0 = arith.constant 0 : i32
    %c0_i32_1 = arith.constant 0 : i32
    return %c0_i32, %c0_i32_0 : i32, i32
  }
  func.func @transform_7(%arg0: i32) -> (i32, i32) {
    %c0_i32 = arith.constant 0 : i32
    %c0_i32_0 = arith.constant 0 : i32
    return %arg0, %c0_i32 : i32, i32
  }
}

</mosaic_0001>

<bundles_post_ra>
// kernel: transformer_decoder.8
= control target key start
LH: loop header
LB: loop body
LE: loop exit
PB: predicated region body
PF: predicated region fallthrough
CT: control target
= control target key end

     0   :  { %12 = vsyncpa [#allocation3], 0  ;;  %s427_s0 = inlined_call_operand.vmem [shape: bf16[16,32], index: 0, kind: input, shape index: {}]   ;;  %s428_s1 = inlined_call_operand.vmem [shape: bf16[32,64], index: 1, kind: input, shape index: {}]   ;;  %s429_s2 = inlined_call_operand.vmem [shape: f32[1,64], index: 2, kind: input, shape index: {}]   ;;  %s430_s3 = inlined_call_operand.vmem [shape: bf16[64,32], index: 3, kind: input, shape index: {}]   ;;  %s431_s4 = inlined_call_operand.vmem [shape: f32[1,32], index: 4, kind: input, shape index: {}]   ;;  %s432_s5 = inlined_call_operand.hbm [shape: f32[1,32], index: 5, kind: input, shape index: {}]   ;;  %s433_s6 = inlined_call_operand.hbm [shape: f32[1,32], index: 6, kind: input, shape index: {}]   ;;  %s434_s7 = inlined_call_operand.vmem [shape: bf16[16,32], index: 7, kind: output, shape index: {}]  }
   0x1   :  { %s29_s26 = sshll.u32 %s432_s5, 4  ;;  %s30_s26 = int_to_ptr.hbm [resolvable:$true] %s29_s26 }
   0x2   :  { %13 = vsyncpa [#allocation5], 0  ;;  %s337_s27 = smov [#allocation2]   ;;  %s40_s8 = sshll.u32 %s433_s6, 4  ;;  %s41_s8 = int_to_ptr.hbm [resolvable:$true] %s40_s8 }
   0x3   :  { %s31_s28 = sshll.u32 %s337_s27, 4  ;;  %s338_s9 = smov [#allocation4]   ;;  %s32_s28 = int_to_ptr.vmem [resolvable:$true] %s31_s28 }
   0x4   :  { %34 = dma.hbm_to_vmem [thread:$0]  %s30_s26, 16, %s32_s28, [#allocation3]  }
   0x5   :  { %s42_s10 = sshll.u32 %s338_s9, 4  ;;  %s43_s10 = int_to_ptr.vmem [resolvable:$true] %s42_s10 }
   0x6   :  { %45 = dma.hbm_to_vmem [thread:$0]  %s41_s8, 16, %s43_s10, [#allocation5]  }
   0x7   :  { %333 = dma.done.wait [#allocation3], 16  }
   0x8   :  { %334 = vsyncadd [#allocation3], 4294967280 }
   0x9   :  { %335 = dma.done.wait [#allocation5], 16  }
   0xa   :  { %336 = vsyncadd [#allocation5], 4294967280  ;;  %v267_v0 = vld [vmem:[%s428_s1 + $0x8] sm:$0xff]  ;;  %v266_v1 = vld [vmem:[%s428_s1] sm:$0xff]  ;;  %vm84_vm0 = vcmask 261120   ;;  %vm141_vm1 = vcmask 523264  }
   0xb   :  { %94 = vmatpush.bf16.msra.mxu0 %v267_v0  ;;  %v265_v2 = vld [vmem:[%s427_s0] sm:$0xff]  ;;  %v271_v3 = vld [vmem:[%s430_s3 + $0x18] sm:$0xff]  ;;  %v270_v4 = vld [vmem:[%s430_s3 + $0x10] sm:$0xff]  ;;  %v339_v27 = vmov 32.0   ;;  %vm226_vm7 = vcmask 257024  }
   0xc   :  { %149 = vmatpush.bf16.msra.mxu1 %v271_v3  ;;  %v269_v5 = vld [vmem:[%s430_s3 + $0x8] sm:$0xff]  ;;  %v268_v6 = vld [vmem:[%s430_s3] sm:$0xff]  ;;  %279 = vrcp.f32 %v339_v27 }
   0xd   :  { %v275_v8 = vld [vmem:[%s429_s2] ss:$0 sm:$0xff]  ;;  %v278_v61 = vld [vmem:[#allocation4] ss:$0 sm:$0xff] }
   0xe   :  { %v55_v15 = vld [vmem:[%s427_s0] sm:$0xff]  }
   0xf   :  { %95 = vmatpush.bf16.msra.mxu0 %v266_v1  ;;  %v276_v16 = vld [vmem:[%s431_s4] ss:$0 sm:$0xff]  ;;  %v57_v17 = vunpack.c.l.bf16 %v55_v15  ;;  %v58_v22 = vunpack.c.h.bf16 %v55_v15 }
  0x10   :  { %150 = vmatpush.bf16.msra.mxu1 %v270_v4  ;;  %v277_v58 = vld [vmem:[#allocation2] ss:$0 sm:$0xff] }
  0x12   :  { %247 = vmatmul.msk.bf16.vlgmr.msra.gmra.mxu0 %vm84_vm0, %v265_v2  ;;  %v280_v28 = vpop.eup %279 }
  0x13   :  { %v170_v29 = vmul.f32 32.0, %v280_v28  ;;  %vm174_vm2 = vweird.f32 %v280_v28 }
  0x14   :  { %151 = vmatpush.bf16.msra.mxu1 %v269_v5 }
  0x15   :  { %v171_v30 = vsub.f32 1.0, %v170_v29 }
  0x17   :  { %v172_v31 = vmul.f32 %v280_v28, %v171_v30 }
  0x18   :  { %152 = vmatpush.bf16.msra.mxu1 %v268_v6 }
  0x19   :  { %v173_v32 = vadd.f32 %v280_v28, %v172_v31 }
  0x1b   :  { %v175_v33 = vsel %vm174_vm2, %v280_v28, %v173_v32 }
  0x8f   :  { %v97_v7 = vpop.f32.mrf.mxu0 }
  0x90   :  { %v98_v9 = vadd.f32 %v275_v8, %v97_v7 }
  0x92   :  { %v102_v12 = vmax.f32 %v98_v9, 0.0 }
  0x97   :  { %v99_v10 = vpop.f32.mrf.mxu0 }
  0x98   :  { %v100_v11 = vadd.f32 %v275_v8, %v99_v10 }
  0x9a   :  { %v103_v13 = vmax.f32 %v100_v11, 0.0 }
  0x9c   :  { %v104_v14 = vpack.c.bf16 %v103_v13, %v102_v12 }
  0x9e   :  { %264 = vmatmul.msk.bf16.vlgmr.msra.gmra.mxu1 %vm141_vm1, %v104_v14 }
 0x11b   :  { %v154_v18 = vpop.f32.mrf.mxu1 }
 0x11c   :  { %v155_v19 = vadd.f32 %v276_v16, %v154_v18 }
 0x11e   :  { %v161_v20 = vadd.f32 %v155_v19, %v57_v17 }
 0x120   :  { %v163_v21 = vsel %vm84_vm0, %v161_v20, 0.0 }
 0x121   :  { %164 = vadd.xlane.f32.xlu0 %v163_v21 }
 0x123   :  { %v156_v23 = vpop.f32.mrf.mxu1 }
 0x124   :  { %v157_v24 = vadd.f32 %v276_v16, %v156_v23 }
 0x126   :  { %v162_v25 = vadd.f32 %v157_v24, %v58_v22 }
 0x128   :  { %v166_v26 = vsel %vm84_vm0, %v162_v25, 0.0 }
 0x129   :  { %167 = vadd.xlane.f32.xlu0 %v166_v26 }
 0x194   :  { %v165_v34 = vpop.xlane.xlu0 %164 }
 0x195   :  { %v176_v35 = vmul.f32 %v175_v33, %v165_v34 }
 0x197   :  { %v178_v36 = vsub.f32 %v161_v20, %v176_v35 }
 0x199   :  { %v180_v37 = vmul.f32 %v178_v36, %v178_v36 }
 0x19b   :  { %v182_v38 = vsel %vm84_vm0, %v180_v37, 0.0 }
 0x19c   :  { %183 = vadd.xlane.f32.xlu1 %v182_v38  ;;  %v168_v39 = vpop.xlane.xlu0 %167 }
 0x19d   :  { %v177_v40 = vmul.f32 %v175_v33, %v168_v39 }
 0x19f   :  { %v179_v41 = vsub.f32 %v162_v25, %v177_v40 }
 0x1a1   :  { %v181_v42 = vmul.f32 %v179_v41, %v179_v41 }
 0x1a3   :  { %v185_v43 = vsel %vm84_vm0, %v181_v42, 0.0 }
 0x1a4   :  { %186 = vadd.xlane.f32.xlu1 %v185_v43 }
 0x20f   :  { %v184_v44 = vpop.xlane.xlu1 %183 }
 0x210   :  { %v188_v45 = vmul.f32 %v184_v44, %v175_v33 }
 0x212   :  { %v190_v46 = vadd.f32 1e-05, %v188_v45 }
 0x214   :  { %281 = vrsqrt.f32 %v190_v46  ;;  %vm198_vm4 = vweird.f32 %v190_v46 }
 0x217   :  { %v187_v47 = vpop.xlane.xlu1 %186 }
 0x218   :  { %v189_v48 = vmul.f32 %v187_v47, %v175_v33 }
 0x21a   :  { %v282_v49 = vpop.eup %281  ;;  %v191_v50 = vadd.f32 1e-05, %v189_v48 }
 0x21b   :  { %v193_v51 = vmul.f32 %v282_v49, %v190_v46  ;;  %vm199_vm3 = vweird.f32 %v282_v49 }
 0x21c   :  { %283 = vrsqrt.f32 %v191_v50  ;;  %vm200_vm5 = vmor %vm198_vm4, %vm199_vm3  ;;  %vm208_vm8 = vweird.f32 %v191_v50 }
 0x21d   :  { %v194_v52 = vmul.f32 %v282_v49, %v193_v51 }
 0x21f   :  { %v195_v53 = vmul.f32 0.5, %v194_v52 }
 0x221   :  { %v196_v54 = vsub.f32 1.5, %v195_v53 }
 0x222   :  { %v284_v55 = vpop.eup %283 }
 0x223   :  { %v197_v56 = vmul.f32 %v282_v49, %v196_v54  ;;  %v203_v57 = vmul.f32 %v284_v55, %v191_v50  ;;  %vm209_vm6 = vweird.f32 %v284_v55 }
 0x224   :  { %vm210_vm9 = vmor %vm208_vm8, %vm209_vm6 }
 0x225   :  { %v201_v59 = vsel %vm200_vm5, %v282_v49, %v197_v56  ;;  %v204_v60 = vmul.f32 %v284_v55, %v203_v57 }
 0x226   :  { %v212_v62 = vmul.f32 %v201_v59, %v178_v36 }
 0x227   :  { %v205_v63 = vmul.f32 0.5, %v204_v60 }
 0x228   :  { %v217_v0 = vmul.f32 %v277_v58, %v212_v62 }
 0x229   :  { %v206_v1 = vsub.f32 1.5, %v205_v63 }
 0x22a   :  { %v222_v2 = vadd.f32 %v278_v61, %v217_v0 }
 0x22b   :  { %v207_v3 = vmul.f32 %v284_v55, %v206_v1 }
 0x22c   :  { %v224_v4 = vpack.c.bf16 %v222_v2, %v222_v2 }
 0x22d   :  { %v211_v5 = vsel %vm210_vm9, %v284_v55, %v207_v3 }
 0x22e   :  { %227 = vst.msk [vmem:[%s434_s7] sm:$0xf] %vm226_vm7, %v224_v4  ;;  %v213_v6 = vmul.f32 %v211_v5, %v179_v41 }
 0x230   :  { %v218_v7 = vmul.f32 %v277_v58, %v213_v6 }
 0x232   :  { %v223_v8 = vadd.f32 %v278_v61, %v218_v7 }
 0x234   :  { %v225_v9 = vpack.c.bf16 %v223_v8, %v223_v8 }
 0x236   :  { %228 = vst.msk [vmem:[%s434_s7 + $0x4] sm:$0xf] %vm226_vm7, %v225_v9 }
 0x237   :  { %233 = vsyncpa [#allocation3], 1 }
 0x238   :  { %234 = vsyncpa [#allocation5], 1 }

// kernel: transformer_decoder.7
= control target key start
LH: loop header
LB: loop body
LE: loop exit
PB: predicated region body
PF: predicated region fallthrough
CT: control target
= control target key end

     0   :  { %s1863_s0 = inlined_call_operand.vmem [shape: bf16[2,8,32], index: 0, kind: input, shape index: {}]   ;;  %s1864_s1 = inlined_call_operand.vmem [shape: bf16[2,8,32], index: 1, kind: input, shape index: {}]   ;;  %s1865_s2 = inlined_call_operand.hbm [shape: bf16[32,32], index: 2, kind: input, shape index: {}]   ;;  %s1866_s3 = inlined_call_operand.hbm [shape: f32[1,32], index: 3, kind: input, shape index: {}]   ;;  %s1867_s4 = inlined_call_operand.hbm [shape: bf16[32,64], index: 4, kind: input, shape index: {}]   ;;  %s1868_s5 = inlined_call_operand.hbm [shape: f32[1,64], index: 5, kind: input, shape index: {}]   ;;  %s1869_s6 = inlined_call_operand.hbm [shape: bf16[32,32], index: 6, kind: input, shape index: {}]   ;;  %s1870_s7 = inlined_call_operand.hbm [shape: f32[1,32], index: 7, kind: input, shape index: {}]   ;;  %s1871_s8 = inlined_call_operand.hbm [shape: f32[1,32], index: 8, kind: input, shape index: {}]   ;;  %s1872_s9 = inlined_call_operand.hbm [shape: f32[1,32], index: 9, kind: input, shape index: {}]   ;;  %s1873_s10 = inlined_call_operand.vmem [shape: bf16[2,8,32], index: 10, kind: output, shape index: {}]  }
   0x1   :  { %1874 = sst [smem:[#allocation20_spill]] %s1865_s2 }
   0x2   :  { %1875 = sst [smem:[#allocation21_spill]] %s1866_s3 }
   0x3   :  { %15 = vsyncpa [#allocation3], 0 }
   0x4   :  { %16 = vsyncpa [#allocation5], 0 }
   0x5   :  { %17 = vsyncpa [#allocation8], 0 }
   0x6   :  { %18 = vsyncpa [#allocation11], 0 }
   0x7   :  { %19 = vsyncpa [#allocation14], 0  ;;  %s1687_s13 = smov 0   ;;  %s1689_s14 = smov 0  }
   0x8   :  { %s1691_s15 = smov 0  }
   0x9 LB: > { %s1876_s3 = sld [smem:[#allocation21_spill]]  ;;  %s1130_s19 = sadd.s32 4294967295, %s1612_s15   ;;  %s1612_s15 = sphi %s1691_s15, %s25_s15   ;;  %s1608_s14 = sphi %s1689_s14, %s1882_s14   ;;  %s1604_s13 = sphi %s1687_s13, %s1881_s13  }
   0xa   : > { %p1132_p0 = scmp.ge.s32.totalorder %s1612_s15, 1  ;;  %p292_p1 = scmp.lt.s32.totalorder %s1612_s15, 3 }
   0xb   : > { %p1708_p2 = scmp.eq.s32.totalorder %s1130_s19, 0  ;;  %s1614_s22 = smov [#allocation4]  }
   0xc   : > { %p1712_p3 = pnand %p1132_p0, %p292_p1  ;;  %s320_s23 = sshll.u32 %s1614_s22, 4  ;;  %s321_s23 = int_to_ptr.vmem [resolvable:$true] %s320_s23 }
   0xd   : > { %s344_s26 = sshll.u32 %s1868_s5, 4  ;;  %s370_s29 = sshll.u32 %s1870_s7, 4  ;;  %s345_s26 = int_to_ptr.hbm [resolvable:$true] %s344_s26  ;;  %s371_s29 = int_to_ptr.hbm [resolvable:$true] %s370_s29 }
   0xe   : > { %p1222_p4 = pneg %p1712_p3  ;;  %s1615_s11 = smov [#allocation7]  }
   0xf   : > { %s318_s18 = sshll.u32 %s1876_s3, 4  ;;  %s346_s12 = sshll.u32 %s1615_s11, 4  ;;  %s319_s18 = int_to_ptr.hbm [resolvable:$true] %s318_s18  ;;  %s347_s12 = int_to_ptr.vmem [resolvable:$true] %s346_s12 }
  0x10   : > { %p1726_p5 = pnand %p1708_p2, %p1222_p4  ;;  %s1616_s16 = smov [#allocation10]  }
  0x11   : > { %s372_s17 = sshll.u32 %s1616_s16, 4  ;;  %s37_s19 = sadd.s32 1, %s1608_s14  ;;  %s373_s17 = int_to_ptr.vmem [resolvable:$true] %s372_s17 }
  0x12   : > { %1228 = dma.hbm_to_vmem [thread:$0]  (!%p1726_p5), %s319_s18, 16, %s321_s23, [#allocation5]  }
  0x13   : > { %1234 = dma.hbm_to_vmem [thread:$0]  (!%p1726_p5), %s345_s26, 16, %s347_s12, [#allocation8]  }
  0x14   : > { %1240 = dma.hbm_to_vmem [thread:$0]  (!%p1726_p5), %s371_s29, 16, %s373_s17, [#allocation11]  }
  0x15   : > { %s1880_s2 = sld [smem:[#allocation20_spill]]  ;;  %p39_p6 = scmp.ge.s32.totalorder %s37_s19, 2 }
  0x16   : > { %s1617_s27 = smov [#allocation2]   ;;  %s329_s28 = sshll.u32 %s1867_s4, 4  ;;  %s330_s28 = int_to_ptr.hbm [resolvable:$true] %s329_s28 }
  0x17   : > { %s1884_s19 = smov (%p39_p6, %s37_s19), 0  ;;  %s305_s18 = sshll.u32 %s1617_s27, 4  ;;  %s306_s18 = int_to_ptr.vmem [resolvable:$true] %s305_s18 }
  0x18   : > { %s1618_s11 = smov 64   ;;  %s1619_s29 = smov 4  }
  0x19   : > { %s1620_s12 = smov [#allocation6]   ;;  %s355_s24 = sshll.u32 %s1869_s6, 4  ;;  %s356_s24 = int_to_ptr.hbm [resolvable:$true] %s355_s24 }
  0x1a   : > { %s331_s16 = sshll.u32 %s1620_s12, 4  ;;  %s382_s26 = sshll.u32 %s1871_s8, 4  ;;  %s332_s16 = int_to_ptr.vmem [resolvable:$true] %s331_s16  ;;  %s383_s26 = int_to_ptr.hbm [resolvable:$true] %s382_s26 }
  0x1b   : > { %s303_s25 = sshll.u32 %s1880_s2, 4  ;;  %s1621_s2 = smov [#allocation9]   ;;  %s304_s25 = int_to_ptr.hbm [resolvable:$true] %s303_s25 }
  0x1c   : > { %1225 = dma.hbm_to_vmem [thread:$0]  (!%p1726_p5), %s304_s25, 256, %s306_s18, [#allocation3], %s1618_s11, %s1618_s11, %s1619_s29  }
  0x1d   : > { %1231 = dma.hbm_to_vmem [thread:$0]  (!%p1726_p5), %s330_s28, 256, %s332_s16, [#allocation5], %s1618_s11, %s1618_s11, %s1619_s29  }
  0x1e   : > { %s357_s3 = sshll.u32 %s1621_s2, 4  ;;  %s1622_s25 = smov [#allocation12]   ;;  %s358_s3 = int_to_ptr.vmem [resolvable:$true] %s357_s3 }
  0x1f   : > { %1237 = dma.hbm_to_vmem [thread:$0]  (!%p1726_p5), %s356_s24, 256, %s358_s3, [#allocation8], %s1618_s11, %s1618_s11, %s1619_s29  }
  0x20   : > { %s384_s18 = sshll.u32 %s1622_s25, 4  ;;  %s394_s22 = sshll.u32 %s1872_s9, 4  ;;  %s385_s18 = int_to_ptr.vmem [resolvable:$true] %s384_s18  ;;  %s395_s22 = int_to_ptr.hbm [resolvable:$true] %s394_s22 }
  0x21   : > { %1243 = dma.hbm_to_vmem [thread:$0]  (!%p1726_p5), %s383_s26, 16, %s385_s18, [#allocation11]  }
  0x22   : > { %s1623_s28 = smov [#allocation13]   ;;  %426 = sbr.rel (%p1712_p3) target bundleno = 1758 (0x6de), region = 60 }
  0x23   : > { %s396_s16 = sshll.u32 %s1623_s28, 4  ;;  %s397_s16 = int_to_ptr.vmem [resolvable:$true] %s396_s16 }
  0x24   : > { %1246 = dma.hbm_to_vmem [thread:$0]  (!%p1726_p5), %s395_s22, 16, %s397_s16, [#allocation14]  }
  0x27   : > { %1583 = dma.done.wait (%p1708_p2), [#allocation3], 256  }
  0x28   : > { %1585 = vsyncadd (%p1708_p2), [#allocation3], 4294967040 }
  0x29   : > { %1587 = dma.done.wait (%p1708_p2), [#allocation5], 272  }
  0x2a   : > { %1589 = vsyncadd (%p1708_p2), [#allocation5], 4294967024 }
  0x2b   : > { %1591 = dma.done.wait (%p1708_p2), [#allocation8], 272  }
  0x2c   : > { %1593 = vsyncadd (%p1708_p2), [#allocation8], 4294967024 }
  0x2d   : > { %1595 = dma.done.wait (%p1708_p2), [#allocation11], 32  }
  0x2e   : > { %1597 = vsyncadd (%p1708_p2), [#allocation11], 4294967264 }
  0x2f   : > { %1599 = dma.done.wait (%p1708_p2), [#allocation14], 16  }
  0x30   : > { %1601 = vsyncadd (%p1708_p2), [#allocation14], 4294967280  ;;  %p508_p7 = scmp.lt.s32.totalorder %s1604_s13, 1  ;;  %v1189_v0 = vld [vmem:[#allocation6 + $0x8] sm:$0xff]  ;;  %v1188_v1 = vld [vmem:[#allocation6] sm:$0xff]  ;;  %vm550_vm0 = vcmask 261120  }
  0x31   : > { %v1187_v2 = vld [vmem:[#allocation2 + $0x8] sm:$0xff]  ;;  %596 = vmatpush.bf16.msra.mxu1 %v1189_v0  ;;  %v1186_v3 = vld [vmem:[#allocation2] sm:$0xff]  ;;  %v1306_v9 = vld [vmem:[#allocation4] ss:$0 sm:$0xff]  ;;  %vm610_vm1 = vcmask 64512   ;;  %s1625_s24 = smov 96  }
  0x32   : > { %s1886_s13 = smov (!%p508_p7, %s1604_s13), 1  ;;  %560 = vmatpush.bf16.msra.mxu0 %v1187_v2  ;;  %v1305_v6 = vld [vmem:[#allocation7] ss:$0 sm:$0xff]  ;;  %s1626_s27 = smov 112   ;;  %vm648_vm2 = vcmask 1043456   ;;  %vm962_vm7 = vcmask 257024  }
  0x33   : > { %s1788_s2 = sshll.u32 %s1886_s13, 2  ;;  %s1624_s13 = smov 120   ;;  %v603_v33 = vld [vmem:[#allocation9] sm:$0xf]  ;;  %v604_v48 = vld [vmem:[#allocation9 + $0x4] sm:$0xf] }
  0x34   : > { %s518_s30 = scalar_lea.vmem %s1864_s1, %s1788_s2  ;;  %s514_s29 = scalar_lea.vmem %s1863_s0, %s1788_s2  ;;  %v670_v34 = vsel %vm648_vm2, %v603_v33, 0  ;;  %v751_v49 = vsel %vm648_vm2, %v604_v48, 0  ;;  %v605_v33 = vld [vmem:[#allocation9 + $0x8] sm:$0xf] }
  0x35   : > { %597 = vmatpush.bf16.msra.mxu1 %v1188_v1  ;;  %v529_v4 = vld [vmem:[%s518_s30] sm:$0xf]  ;;  %s1627_s23 = smov 104   ;;  %s1628_s26 = smov 88  }
  0x36   : > { %561 = vmatpush.bf16.msra.mxu0 %v1186_v3  ;;  %v1798_v5 = vld [vmem:[%s514_s29] sm:$0xf]  ;;  %s1629_s25 = smov 72   ;;  %s1630_s18 = smov 80  }
  0x37   : > { %s525_s22 = scalar_lea.vmem %s1873_s10, %s1788_s2 }
  0x38   : > { %1171 = vmatmul.msk.bf16.vlgmr.msra.gmra.mxu1 %vm550_vm0, %v529_v4 }
  0x39   : > { %1162 = vmatmul.msk.bf16.vlgmr.msra.gmra.mxu0 %vm550_vm0, %v1798_v5 }
  0xb5   : > { %v599_v7 = vpop.f32.mrf.mxu1 }
  0xb6   : > { %v600_v8 = vadd.f32 %v1305_v6, %v599_v7  ;;  %v563_v10 = vpop.f32.mrf.mxu0  ;;  %v1307_v6 = vld [vmem:[#allocation10] ss:$0 sm:$0xff] }
  0xb7   : > { %v564_v13 = vadd.f32 %v1306_v9, %v563_v10 }
  0xb8   : > { %v1803_v11 = vpack.c.bf16 %v600_v8, %v600_v8 }
  0xb9   : > { %v608_v15 = vpack.c.bf16 %v564_v13, %v564_v13 }
  0xba   : > { %692 = vrot.lane.b32.xlu0 %v1803_v11, %s1624_s13  ;;  %v615_v12 = vsel %vm610_vm1, %v1803_v11, 0 }
  0xbb   : > { %624 = vmatpush.bf16.xpose.msra.mxu2 %v615_v12 }
  0xbd   : > { %v601_v14 = vpop.f32.mrf.mxu1 }
  0xbe   : > { %v565_v16 = vpop.f32.mrf.mxu0 }
  0xc2   : > { %690 = vrot.lane.b32.xlu0 %v608_v15, %s1624_s13  ;;  %1172 = vmatmul.msk.bf16.vlgmr.msra.gmra.mxu2 %vm610_vm1, %v608_v15 }
  0xc3   : > { %760 = vmatpush.bf16.msrb.mxu2 %v751_v49  ;;  %v528_v49 = vunpack.c.l.bf16 %v1798_v5 }
  0xca   : > { %643 = vrot.lane.b32.xlu0 %v1803_v11, %s1625_s24 }
  0xd2   : > { %769 = vrot.lane.b32.xlu0 %v1803_v11, %s1626_s27 }
  0xda   : > { %844 = vrot.lane.b32.xlu0 %v608_v15, %s1627_s23 }
  0xe2   : > { %767 = vrot.lane.b32.xlu0 %v608_v15, %s1626_s27 }
 0x12c   : > { %v693_v17 = vpop.permute.xlu0 %692 }
 0x12d   : > { %v698_v18 = vsel %vm610_vm1, %v693_v17, 0 }
 0x12e   : > { %707 = vmatpush.bf16.xpose.msrb.mxu0 %v698_v18 }
 0x134   : > { %v691_v19 = vpop.permute.xlu0 %690 }
 0x135   : > { %1175 = vmatmul.msk.bf16.vlgmr.msrb.gmra.mxu0 %vm610_vm1, %v691_v19 }
 0x13c   : > { %v644_v20 = vpop.permute.xlu0 %643 }
 0x13d   : > { %v650_v21 = vsel %vm648_vm2, %v644_v20, 0 }
 0x13e   : > { %659 = vmatpush.bf16.msra.mxu3 %v650_v21 }
 0x142   : > { %679 = vmatpush.bf16.msrb.mxu3 %v670_v34  ;;  %v828_v34 = vsel %vm648_vm2, %v605_v33, 0 }
 0x144   : > { %v770_v45 = vpop.permute.xlu0 %769 }
 0x145   : > { %v626_v22 = vpop.f32.mrf.mxu2  ;;  %v775_v47 = vsel %vm610_vm1, %v770_v45, 0 }
 0x146   : > { %v630_v23 = vsel %vm610_vm1, %v626_v22, -inf }
 0x147   : > { %631 = vmax.xlane.f32.xlu1 %v630_v23 }
 0x14c   : > { %v845_v58 = vpop.permute.xlu0 %844 }
 0x14d   : > { %v628_v24 = vpop.f32.mrf.mxu2 }
 0x154   : > { %v768_v60 = vpop.permute.xlu0 %767 }
 0x1b2   : > { %v709_v25 = vpop.f32.mrf.mxu0 }
 0x1b3   : > { %v713_v26 = vsel %vm610_vm1, %v709_v25, -inf }
 0x1b4   : > { %714 = vmax.xlane.f32.xlu1 %v713_v26 }
 0x1ba   : > { %v632_v27 = vpop.xlane.xlu1 %631  ;;  %v711_v28 = vpop.f32.mrf.mxu0 }
 0x1bb   : > { %v633_v29 = vsub.f32 %v626_v22, %v632_v27 }
 0x1bd   : > { %v634_v30 = vmul.f32 1.442695, %v633_v29 }
 0x1bf   : > { %1310 = vpow2.f32 %v634_v30 }
 0x1c5   : > { %v1311_v31 = vpop.eup %1310 }
 0x1c6   : > { %v636_v32 = vsel %vm610_vm1, %v1311_v31, 0.0 }
 0x1c7   : > { %637 = vadd.xlane.f32.xlu2 %v636_v32 }
 0x1cd   : > { %725 = vrot.lane.b32.xlu1 %v1803_v11, %s1628_s26 }
 0x227   : > { %v715_v35 = vpop.xlane.xlu1 %714 }
 0x228   : > { %v716_v36 = vsub.f32 %v709_v25, %v715_v35 }
 0x22a   : > { %v717_v37 = vmul.f32 1.442695, %v716_v36 }
 0x22c   : > { %1312 = vpow2.f32 %v717_v37 }
 0x232   : > { %v1313_v38 = vpop.eup %1312 }
 0x233   : > { %v719_v39 = vsel %vm610_vm1, %v1313_v38, 0.0 }
 0x234   : > { %720 = vadd.xlane.f32.xlu2 %v719_v39 }
 0x23a   : > { %v638_v40 = vpop.xlane.xlu2 %637 }
 0x23b   : > { %1314 = vrcp.f32 %v638_v40 }
 0x23f   : > { %v726_v41 = vpop.permute.xlu1 %725 }
 0x240   : > { %v731_v42 = vsel %vm648_vm2, %v726_v41, 0 }
 0x241   : > { %v1315_v43 = vpop.eup %1314  ;;  %740 = vmatpush.bf16.msrb.mxu1 %v731_v42 }
 0x242   : > { %v640_v44 = vmul.f32 %v1315_v43, %v1311_v31 }
 0x244   : > { %v641_v46 = vpack.c.bf16 %v640_v44, %v640_v44 }
 0x245   : > { %837 = vmatpush.bf16.msra.mxu1 %v828_v34 }
 0x246   : > { %1173 = vmatmul.msk.bf16.vlgmr.msra.gmra.mxu3 %vm610_vm1, %v641_v46 }
 0x247   : > { %784 = vmatpush.bf16.xpose.msra.mxu3 %v775_v47 }
 0x24c   : > { %846 = vrot.lane.b32.xlu2 %v1803_v11, %s1627_s23 }
 0x2a7   : > { %v721_v50 = vpop.xlane.xlu2 %720 }
 0x2a8   : > { %1316 = vrcp.f32 %v721_v50 }
 0x2ae   : > { %v1317_v51 = vpop.eup %1316 }
 0x2af   : > { %v723_v52 = vmul.f32 %v1317_v51, %v1313_v38  ;;  %v847_v53 = vpop.permute.xlu2 %846  ;;  %v606_v38 = vld [vmem:[#allocation9 + $0xc] sm:$0xf] }
 0x2b0   : > { %v852_v54 = vsel %vm610_vm1, %v847_v53, 0  ;;  %v905_v39 = vsel %vm648_vm2, %v606_v38, 0 }
 0x2b1   : > { %861 = vmatpush.bf16.xpose.msra.mxu2 %v852_v54  ;;  %v724_v55 = vpack.c.bf16 %v723_v52, %v723_v52 }
 0x2b3   : > { %1176 = vmatmul.msk.bf16.vlgmr.msrb.gmra.mxu1 %vm610_vm1, %v724_v55  ;;  %v1631_v55 = vmov 32.0  }
 0x2c9   : > { %v661_v56 = vpop.f32.mrf.mxu3 }
 0x2ca   : > { %v665_v57 = vpack.c.bf16 %v661_v56, %v661_v56 }
 0x2cc   : > { %1174 = vmatmul.msk.bf16.vlgmr.msrb.gmra.mxu3 %vm610_vm1, %v665_v57 }
 0x2d1   : > { %v663_v59 = vpop.f32.mrf.mxu3 }
 0x2dc   : > { %1178 = vmatmul.msk.bf16.vlgmr.msra.gmra.mxu3 %vm610_vm1, %v768_v60 }
 0x330   : > { %v742_v61 = vpop.f32.mrf.mxu1 }
 0x331   : > { %v746_v62 = vpack.c.bf16 %v742_v61, %v742_v61 }
 0x333   : > { %1177 = vmatmul.msk.bf16.vlgmr.msrb.gmra.mxu2 %vm610_vm1, %v746_v62 }
 0x338   : > { %v744_v63 = vpop.f32.mrf.mxu1 }
 0x343   : > { %1181 = vmatmul.msk.bf16.vlgmr.msra.gmra.mxu2 %vm610_vm1, %v845_v58 }
 0x34f   : > { %v681_v0 = vpop.f32.mrf.mxu3 }
 0x350   : > { %v688_v7 = vadd.f32 %v1307_v6, %v681_v0 }
 0x357   : > { %v683_v1 = vpop.f32.mrf.mxu3 }
 0x35f   : > { %v786_v2 = vpop.f32.mrf.mxu3 }
 0x360   : > { %v790_v3 = vsel %vm610_vm1, %v786_v2, -inf }
 0x361   : > { %791 = vmax.xlane.f32.xlu1 %v790_v3 }
 0x367   : > { %v788_v4 = vpop.f32.mrf.mxu3 }
 0x37a   : > { %879 = vrot.lane.b32.xlu1 %v1803_v11, %s1629_s25 }
 0x3b6   : > { %v762_v8 = vpop.f32.mrf.mxu2 }
 0x3b7   : > { %v766_v9 = vadd.f32 %v762_v8, %v688_v7 }
 0x3be   : > { %v764_v10 = vpop.f32.mrf.mxu2 }
 0x3c6   : > { %v863_v12 = vpop.f32.mrf.mxu2 }
 0x3c7   : > { %v867_v13 = vsel %vm610_vm1, %v863_v12, -inf }
 0x3c8   : > { %868 = vmax.xlane.f32.xlu2 %v867_v13  ;;  %v1308_v13 = vld [vmem:[#allocation12] ss:$0 sm:$0xff] }
 0x3ce   : > { %v865_v14 = vpop.f32.mrf.mxu2 }
 0x3d4   : > { %v792_v15 = vpop.xlane.xlu1 %791 }
 0x3d5   : > { %v793_v16 = vsub.f32 %v786_v2, %v792_v15  ;;  %v1309_v15 = vld [vmem:[#allocation13] ss:$0 sm:$0xff] }
 0x3d7   : > { %v794_v17 = vmul.f32 1.442695, %v793_v16 }
 0x3d9   : > { %1318 = vpow2.f32 %v794_v17 }
 0x3df   : > { %v1319_v18 = vpop.eup %1318 }
 0x3e0   : > { %v796_v19 = vsel %vm610_vm1, %v1319_v18, 0.0 }
 0x3e1   : > { %797 = vadd.xlane.f32.xlu2 %v796_v19 }
 0x3ec   : > { %v880_v20 = vpop.permute.xlu1 %879 }
 0x3ed   : > { %v885_v21 = vsel %vm648_vm2, %v880_v20, 0 }
 0x3ee   : > { %894 = vmatpush.bf16.msrb.mxu3 %v885_v21 }
 0x3f9   : > { %802 = vrot.lane.b32.xlu2 %v1803_v11, %s1630_s18 }
 0x43b   : > { %v869_v22 = vpop.xlane.xlu2 %868 }
 0x43c   : > { %v870_v23 = vsub.f32 %v863_v12, %v869_v22 }
 0x43e   : > { %v871_v24 = vmul.f32 1.442695, %v870_v23 }
 0x440   : > { %1320 = vpow2.f32 %v871_v24 }
 0x446   : > { %v1321_v25 = vpop.eup %1320 }
 0x447   : > { %v873_v26 = vsel %vm610_vm1, %v1321_v25, 0.0 }
 0x448   : > { %874 = vadd.xlane.f32.xlu0 %v873_v26 }
 0x454   : > { %v798_v27 = vpop.xlane.xlu2 %797 }
 0x455   : > { %1322 = vrcp.f32 %v798_v27 }
 0x45b   : > { %v1323_v28 = vpop.eup %1322 }
 0x45c   : > { %v800_v29 = vmul.f32 %v1323_v28, %v1319_v18  ;;  %v803_v30 = vpop.permute.xlu2 %802 }
 0x45d   : > { %v808_v31 = vsel %vm648_vm2, %v803_v30, 0 }
 0x45e   : > { %v801_v32 = vpack.c.bf16 %v800_v29, %v800_v29  ;;  %817 = vmatpush.bf16.msra.mxu0 %v808_v31 }
 0x461   : > { %1179 = vmatmul.msk.bf16.vlgmr.msra.gmra.mxu0 %vm610_vm1, %v801_v32 }
 0x462   : > { %914 = vmatpush.bf16.msrb.mxu0 %v905_v39 }
 0x4bb   : > { %v875_v11 = vpop.xlane.xlu0 %874 }
 0x4bc   : > { %1324 = vrcp.f32 %v875_v11 }
 0x4bd   : > { %1326 = vrcp.f32 %v1631_v55 }
 0x4c2   : > { %v1325_v35 = vpop.eup %1324 }
 0x4c3   : > { %v877_v36 = vmul.f32 %v1325_v35, %v1321_v25  ;;  %v1327_v56 = vpop.eup %1326 }
 0x4c4   : > { %v928_v57 = vmul.f32 32.0, %v1327_v56  ;;  %vm932_vm3 = vweird.f32 %v1327_v56 }
 0x4c5   : > { %v878_v37 = vpack.c.bf16 %v877_v36, %v877_v36 }
 0x4c6   : > { %v929_v58 = vsub.f32 1.0, %v928_v57 }
 0x4c7   : > { %1182 = vmatmul.msk.bf16.vlgmr.msrb.gmra.mxu3 %vm610_vm1, %v878_v37 }
 0x4c8   : > { %v930_v59 = vmul.f32 %v1327_v56, %v929_v58 }
 0x4ca   : > { %v931_v60 = vadd.f32 %v1327_v56, %v930_v59 }
 0x4cc   : > { %v933_v61 = vsel %vm932_vm3, %v1327_v56, %v931_v60 }
 0x4de   : > { %v819_v40 = vpop.f32.mrf.mxu0 }
 0x4df   : > { %v823_v41 = vpack.c.bf16 %v819_v40, %v819_v40 }
 0x4e1   : > { %1180 = vmatmul.msk.bf16.vlgmr.msra.gmra.mxu1 %vm610_vm1, %v823_v41 }
 0x4e6   : > { %v821_v42 = vpop.f32.mrf.mxu0 }
 0x54a   : > { %v896_v43 = vpop.f32.mrf.mxu3 }
 0x54b   : > { %v900_v44 = vpack.c.bf16 %v896_v43, %v896_v43 }
 0x54d   : > { %1183 = vmatmul.msk.bf16.vlgmr.msrb.gmra.mxu0 %vm610_vm1, %v900_v44 }
 0x552   : > { %v898_v45 = vpop.f32.mrf.mxu3 }
 0x55e   : > { %v839_v46 = vpop.f32.mrf.mxu1 }
 0x55f   : > { %v843_v47 = vadd.f32 %v839_v46, %v766_v9 }
 0x566   : > { %v841_v48 = vpop.f32.mrf.mxu1 }
 0x5ca   : > { %v916_v50 = vpop.f32.mrf.mxu0 }
 0x5cb   : > { %v920_v51 = vadd.f32 %v916_v50, %v843_v47 }
 0x5cd   : > { %v923_v52 = vadd.f32 %v920_v51, %v528_v49 }
 0x5cf   : > { %v924_v53 = vsel %vm550_vm0, %v923_v52, 0.0 }
 0x5d0   : > { %925 = vadd.xlane.f32.xlu0 %v924_v53 }
 0x5d2   : > { %v918_v54 = vpop.f32.mrf.mxu0 }
 0x643   : > { %v926_v62 = vpop.xlane.xlu0 %925 }
 0x644   : > { %v934_v63 = vmul.f32 %v933_v61, %v926_v62 }
 0x646   : > { %v935_v0 = vsub.f32 %v923_v52, %v934_v63 }
 0x648   : > { %v936_v5 = vmul.f32 %v935_v0, %v935_v0 }
 0x64a   : > { %v937_v1 = vsel %vm550_vm0, %v936_v5, 0.0 }
 0x64b   : > { %938 = vadd.xlane.f32.xlu0 %v937_v1 }
 0x6be   : > { %v939_v2 = vpop.xlane.xlu0 %938 }
 0x6bf   : > { %v940_v3 = vmul.f32 %v939_v2, %v933_v61 }
 0x6c1   : > { %v941_v4 = vadd.f32 1e-05, %v940_v3 }
 0x6c3   : > { %1328 = vrsqrt.f32 %v941_v4  ;;  %vm948_vm5 = vweird.f32 %v941_v4 }
 0x6c9   : > { %v1329_v6 = vpop.eup %1328 }
 0x6ca   : > { %v943_v7 = vmul.f32 %v1329_v6, %v941_v4  ;;  %vm949_vm4 = vweird.f32 %v1329_v6 }
 0x6cb   : > { %vm950_vm6 = vmor %vm948_vm5, %vm949_vm4 }
 0x6cc   : > { %v944_v8 = vmul.f32 %v1329_v6, %v943_v7 }
 0x6ce   : > { %v945_v9 = vmul.f32 0.5, %v944_v8 }
 0x6d0   : > { %v946_v10 = vsub.f32 1.5, %v945_v9 }
 0x6d2   : > { %v947_v12 = vmul.f32 %v1329_v6, %v946_v10 }
 0x6d4   : > { %v951_v14 = vsel %vm950_vm6, %v1329_v6, %v947_v12 }
 0x6d5   : > { %v952_v16 = vmul.f32 %v951_v14, %v935_v0 }
 0x6d7   : > { %v956_v17 = vmul.f32 %v1308_v13, %v952_v16 }
 0x6d9   : > { %v960_v18 = vadd.f32 %v1309_v15, %v956_v17 }
 0x6db   : > { %v961_v19 = vpack.c.bf16 %v960_v18, %v960_v18 }
 0x6dd   : > { %963 = vst.msk [vmem:[%s525_s22] sm:$0xf] %vm962_vm7, %v961_v19 }
 0x6de PF: > { %s25_s15 = sadd.s32 1, %s1612_s15   ;;  %s1881_s13 = smov %s1608_s14 }
 0x6df   : > { %p22_p8 = scmp.ge.s32.totalorder %s25_s15, 4   ;;  %s1882_s14 = smov %s1884_s19 }
 0x6e1   :  { %24 = sbr.rel (!%p22_p8) target bundleno = 9 (0x9), region = 126 }
 0x6e6   :  { %989 = vsyncpa [#allocation3], 1 }
 0x6e7   :  { %991 = vsyncpa [#allocation3 + $0x1], 1 }
 0x6e8   :  { %992 = vsyncpa [#allocation5], 1 }
 0x6e9   :  { %993 = vsyncpa [#allocation8], 1 }
 0x6ea   :  { %994 = vsyncpa [#allocation11], 1 }
 0x6eb   :  { %995 = vsyncpa [#allocation14], 1 }

// kernel: transformer_decoder.6
= control target key start
LH: loop header
LB: loop body
LE: loop exit
PB: predicated region body
PF: predicated region fallthrough
CT: control target
= control target key end

     0   :  { %17 = vsyncpa [#allocation3], 0  ;;  %s1295_s21 = smov 0   ;;  %s1297_s22 = smov 0   ;;  %s1435_s0 = inlined_call_operand.vmem [shape: bf16[2,8,32], index: 0, kind: input, shape index: {}, may-alias: {0,2}]   ;;  %s1436_s1 = inlined_call_operand.vmem [shape: f32[8,32], index: 1, kind: input, shape index: {}, may-alias: {1,3}]   ;;  %s1437_s2 = inlined_call_operand.vmem [shape: bf16[2,8,32], index: 2, kind: input, shape index: {}, may-alias: {0,2}]   ;;  %s1438_s3 = inlined_call_operand.vmem [shape: f32[8,32], index: 3, kind: input, shape index: {}, may-alias: {1,3}]   ;;  %s1439_s4 = inlined_call_operand.vmem [shape: bf16[32,32], index: 4, kind: input, shape index: {}]   ;;  %s1440_s5 = inlined_call_operand.vmem [shape: f32[1,32], index: 5, kind: input, shape index: {}]   ;;  %s1441_s6 = inlined_call_operand.vmem [shape: bf16[32,64], index: 6, kind: input, shape index: {}]   ;;  %s1442_s7 = inlined_call_operand.vmem [shape: f32[1,64], index: 7, kind: input, shape index: {}]   ;;  %s1443_s8 = inlined_call_operand.vmem [shape: bf16[32,32], index: 8, kind: input, shape index: {}]   ;;  %s1444_s9 = inlined_call_operand.vmem [shape: f32[1,32], index: 9, kind: input, shape index: {}]   ;;  %s1445_s10 = inlined_call_operand.vmem [shape: f32[1,32], index: 10, kind: input, shape index: {}]   ;;  %s1446_s11 = inlined_call_operand.hbm [shape: f32[1,32], index: 11, kind: input, shape index: {}]   ;;  %s1447_s12 = inlined_call_operand.vmem [shape: bf16[2,8,32], index: 12, kind: output, shape index: {}]  }
   0x1   :  { %s1299_s23 = smov 0  }
   0x2 LB: > { %s1048_s24 = sadd.s32 4294967295, %s1219_s23   ;;  %s35_s25 = sadd.s32 1, %s1215_s22  ;;  %s1219_s23 = sphi %s1299_s23, %s23_s23   ;;  %s1215_s22 = sphi %s1297_s22, %s1449_s22   ;;  %s1211_s21 = sphi %s1295_s21, %s1448_s21  }
   0x3   : > { %p37_p0 = scmp.ge.s32.totalorder %s35_s25, 2  ;;  %p1050_p1 = scmp.ge.s32.totalorder %s1219_s23, 1 }
   0x4   : > { %p337_p2 = scmp.lt.s32.totalorder %s1219_s23, 3  ;;  %p1103_p4 = scmp.eq.s32.totalorder %s1048_s24, 0 }
   0x5   : > { %s1451_s25 = smov (%p37_p0, %s35_s25), 0  ;;  %s380_s28 = sshll.u32 %s1446_s11, 4  ;;  %s381_s28 = int_to_ptr.hbm [resolvable:$true] %s380_s28 }
   0x6   : > { %p338_p3 = pnand %p1050_p1, %p337_p2  ;;  %s1221_s29 = smov [#allocation2]  }
   0x7   : > { %s382_s30 = sshll.u32 %s1221_s29, 4  ;;  %s383_s30 = int_to_ptr.vmem [resolvable:$true] %s382_s30 }
   0x8   : > { %p1099_p5 = pneg %p338_p3  ;;  %412 = sbr.rel (%p338_p3) target bundleno = 1728 (0x6c0), region = 68 }
   0xa   : > { %p1100_p6 = pnand %p1103_p4, %p1099_p5 }
   0xc   : > { %1102 = dma.hbm_to_vmem [thread:$0]  (!%p1100_p6), %s381_s28, 16, %s383_s30, [#allocation3]  }
   0xd   : > { %1206 = dma.done.wait (%p1103_p4), [#allocation3], 16  }
   0xe   : > { %1208 = vsyncadd (%p1103_p4), [#allocation3], 4294967280  ;;  %p467_p7 = scmp.lt.s32.totalorder %s1211_s21, 1  ;;  %v1094_v0 = vld [vmem:[%s1441_s6 + $0x8] sm:$0xff]  ;;  %v1093_v2 = vld [vmem:[%s1441_s6] sm:$0xff]  ;;  %vm520_vm0 = vcmask 261120  }
   0xf   : > { %v496_v4 = vld [vmem:[%s1438_s3] sm:$0xff]  ;;  %v1092_v5 = vld [vmem:[%s1439_s4 + $0x8] sm:$0xff]  ;;  %566 = vmatpush.bf16.msra.mxu1 %v1094_v0  ;;  %vm580_vm1 = vcmask 64512   ;;  %s1222_s26 = smov 120   ;;  %s1223_s27 = smov 96   ;;  %vm618_vm2 = vcmask 1043456  }
  0x10   : > { %s1453_s21 = smov (!%p467_p7, %s1211_s21), 1  ;;  %v492_v7 = vld [vmem:[%s1436_s1] sm:$0xff]  ;;  %530 = vmatpush.bf16.msra.mxu0 %v1092_v5  ;;  %s1225_s28 = smov 104   ;;  %vm932_vm7 = vcmask 257024  }
  0x11   : > { %s1317_s13 = sshll.u32 %s1453_s21, 2  ;;  %v1091_v9 = vld [vmem:[%s1439_s4] sm:$0xff]  ;;  %s1224_s21 = smov 112  }
  0x12   : > { %s481_s16 = scalar_lea.vmem %s1437_s2, %s1317_s13  ;;  %s473_s19 = scalar_lea.vmem %s1435_s0, %s1317_s13  ;;  %v1138_v14 = vld [vmem:[%s1442_s7] ss:$0 sm:$0xff]  ;;  %v574_v56 = vld [vmem:[%s1443_s8 + $0x4] sm:$0xf] }
  0x13   : > { %v494_v1 = vld [vmem:[%s481_s16] sm:$0xf]  ;;  %567 = vmatpush.bf16.msra.mxu1 %v1093_v2  ;;  %s1226_s29 = smov 88   ;;  %v721_v57 = vsel %vm618_vm2, %v574_v56, 0  ;;  %s1227_s17 = smov 72  }
  0x14   : > { %v495_v3 = vunpack.c.l.bf16 %v494_v1  ;;  %v490_v6 = vld [vmem:[%s473_s19] sm:$0xf]  ;;  %531 = vmatpush.bf16.msra.mxu0 %v1091_v9  ;;  %s1228_s20 = smov 80   ;;  %s488_s15 = scalar_lea.vmem %s1447_s12, %s1317_s13 }
  0x15   : > { %v491_v10 = vunpack.c.l.bf16 %v490_v6  ;;  %v1139_v17 = vld [vmem:[%s1440_s5] ss:$0 sm:$0xff] }
  0x16   : > { %v497_v8 = vadd.f32 %v496_v4, %v495_v3  ;;  %v573_v41 = vld [vmem:[%s1443_s8] sm:$0xf] }
  0x17   : > { %v1345_v12 = vadd.f32 %v492_v7, %v491_v10  ;;  %v640_v42 = vsel %vm618_vm2, %v573_v41, 0  ;;  %v575_v41 = vld [vmem:[%s1443_s8 + $0x8] sm:$0xf] }
  0x18   : > { %v498_v11 = vpack.c.bf16 %v497_v8, %v497_v8 }
  0x19   : > { %v499_v13 = vpack.c.bf16 %v1345_v12, %v1345_v12 }
  0x1a   : > { %1076 = vmatmul.msk.bf16.vlgmr.msra.gmra.mxu1 %vm520_vm0, %v498_v11 }
  0x1b   : > { %1067 = vmatmul.msk.bf16.vlgmr.msra.gmra.mxu0 %vm520_vm0, %v499_v13 }
  0x97   : > { %v569_v15 = vpop.f32.mrf.mxu1 }
  0x98   : > { %v570_v16 = vadd.f32 %v1138_v14, %v569_v15  ;;  %v533_v18 = vpop.f32.mrf.mxu0  ;;  %v1140_v14 = vld [vmem:[%s1444_s9] ss:$0 sm:$0xff] }
  0x99   : > { %v534_v21 = vadd.f32 %v1139_v17, %v533_v18 }
  0x9a   : > { %v1357_v19 = vpack.c.bf16 %v570_v16, %v570_v16 }
  0x9b   : > { %v578_v23 = vpack.c.bf16 %v534_v21, %v534_v21 }
  0x9c   : > { %662 = vrot.lane.b32.xlu0 %v1357_v19, %s1222_s26  ;;  %v585_v20 = vsel %vm580_vm1, %v1357_v19, 0 }
  0x9d   : > { %594 = vmatpush.bf16.xpose.msra.mxu2 %v585_v20 }
  0x9f   : > { %v571_v22 = vpop.f32.mrf.mxu1 }
  0xa0   : > { %v535_v24 = vpop.f32.mrf.mxu0 }
  0xa4   : > { %660 = vrot.lane.b32.xlu0 %v578_v23, %s1222_s26  ;;  %1077 = vmatmul.msk.bf16.vlgmr.msra.gmra.mxu2 %vm580_vm1, %v578_v23 }
  0xa5   : > { %730 = vmatpush.bf16.msrb.mxu2 %v721_v57 }
  0xac   : > { %613 = vrot.lane.b32.xlu0 %v1357_v19, %s1223_s27 }
  0xb4   : > { %739 = vrot.lane.b32.xlu0 %v1357_v19, %s1224_s21 }
  0xbc   : > { %814 = vrot.lane.b32.xlu0 %v578_v23, %s1225_s28 }
  0xc4   : > { %737 = vrot.lane.b32.xlu0 %v578_v23, %s1224_s21 }
 0x10e   : > { %v663_v25 = vpop.permute.xlu0 %662 }
 0x10f   : > { %v668_v26 = vsel %vm580_vm1, %v663_v25, 0 }
 0x110   : > { %677 = vmatpush.bf16.xpose.msrb.mxu0 %v668_v26 }
 0x116   : > { %v661_v27 = vpop.permute.xlu0 %660 }
 0x117   : > { %1080 = vmatmul.msk.bf16.vlgmr.msrb.gmra.mxu0 %vm580_vm1, %v661_v27 }
 0x11e   : > { %v614_v28 = vpop.permute.xlu0 %613 }
 0x11f   : > { %v620_v29 = vsel %vm618_vm2, %v614_v28, 0 }
 0x120   : > { %629 = vmatpush.bf16.msra.mxu3 %v620_v29 }
 0x124   : > { %649 = vmatpush.bf16.msrb.mxu3 %v640_v42  ;;  %v798_v42 = vsel %vm618_vm2, %v575_v41, 0 }
 0x126   : > { %v740_v53 = vpop.permute.xlu0 %739 }
 0x127   : > { %v596_v30 = vpop.f32.mrf.mxu2  ;;  %v745_v55 = vsel %vm580_vm1, %v740_v53, 0 }
 0x128   : > { %v600_v31 = vsel %vm580_vm1, %v596_v30, -inf }
 0x129   : > { %601 = vmax.xlane.f32.xlu1 %v600_v31 }
 0x12e   : > { %v815_v2 = vpop.permute.xlu0 %814 }
 0x12f   : > { %v598_v32 = vpop.f32.mrf.mxu2 }
 0x136   : > { %v738_v4 = vpop.permute.xlu0 %737 }
 0x194   : > { %v679_v33 = vpop.f32.mrf.mxu0 }
 0x195   : > { %v683_v34 = vsel %vm580_vm1, %v679_v33, -inf }
 0x196   : > { %684 = vmax.xlane.f32.xlu1 %v683_v34 }
 0x19c   : > { %v602_v35 = vpop.xlane.xlu1 %601  ;;  %v681_v36 = vpop.f32.mrf.mxu0 }
 0x19d   : > { %v603_v37 = vsub.f32 %v596_v30, %v602_v35 }
 0x19f   : > { %v604_v38 = vmul.f32 1.442695, %v603_v37 }
 0x1a1   : > { %1143 = vpow2.f32 %v604_v38 }
 0x1a7   : > { %v1144_v39 = vpop.eup %1143 }
 0x1a8   : > { %v606_v40 = vsel %vm580_vm1, %v1144_v39, 0.0 }
 0x1a9   : > { %607 = vadd.xlane.f32.xlu2 %v606_v40 }
 0x1af   : > { %695 = vrot.lane.b32.xlu1 %v1357_v19, %s1226_s29 }
 0x209   : > { %v685_v43 = vpop.xlane.xlu1 %684 }
 0x20a   : > { %v686_v44 = vsub.f32 %v679_v33, %v685_v43 }
 0x20c   : > { %v687_v45 = vmul.f32 1.442695, %v686_v44 }
 0x20e   : > { %1145 = vpow2.f32 %v687_v45 }
 0x214   : > { %v1146_v46 = vpop.eup %1145 }
 0x215   : > { %v689_v47 = vsel %vm580_vm1, %v1146_v46, 0.0 }
 0x216   : > { %690 = vadd.xlane.f32.xlu2 %v689_v47 }
 0x21c   : > { %v608_v48 = vpop.xlane.xlu2 %607 }
 0x21d   : > { %1147 = vrcp.f32 %v608_v48 }
 0x221   : > { %v696_v49 = vpop.permute.xlu1 %695 }
 0x222   : > { %v701_v50 = vsel %vm618_vm2, %v696_v49, 0 }
 0x223   : > { %v1148_v51 = vpop.eup %1147  ;;  %710 = vmatpush.bf16.msrb.mxu1 %v701_v50 }
 0x224   : > { %v610_v52 = vmul.f32 %v1148_v51, %v1144_v39 }
 0x226   : > { %v611_v54 = vpack.c.bf16 %v610_v52, %v610_v52 }
 0x227   : > { %807 = vmatpush.bf16.msra.mxu1 %v798_v42 }
 0x228   : > { %1078 = vmatmul.msk.bf16.vlgmr.msra.gmra.mxu3 %vm580_vm1, %v611_v54 }
 0x229   : > { %754 = vmatpush.bf16.xpose.msra.mxu3 %v745_v55 }
 0x22e   : > { %816 = vrot.lane.b32.xlu2 %v1357_v19, %s1225_s28 }
 0x289   : > { %v691_v58 = vpop.xlane.xlu2 %690 }
 0x28a   : > { %1149 = vrcp.f32 %v691_v58 }
 0x290   : > { %v1150_v59 = vpop.eup %1149 }
 0x291   : > { %v693_v60 = vmul.f32 %v1150_v59, %v1146_v46  ;;  %v817_v61 = vpop.permute.xlu2 %816  ;;  %v576_v46 = vld [vmem:[%s1443_s8 + $0xc] sm:$0xf] }
 0x292   : > { %v822_v62 = vsel %vm580_vm1, %v817_v61, 0  ;;  %v875_v47 = vsel %vm618_vm2, %v576_v46, 0 }
 0x293   : > { %831 = vmatpush.bf16.xpose.msra.mxu2 %v822_v62  ;;  %v694_v63 = vpack.c.bf16 %v693_v60, %v693_v60  ;;  %v1229_v62 = vmov 32.0  }
 0x295   : > { %1081 = vmatmul.msk.bf16.vlgmr.msrb.gmra.mxu1 %vm580_vm1, %v694_v63 }
 0x2ab   : > { %v631_v0 = vpop.f32.mrf.mxu3 }
 0x2ac   : > { %v635_v1 = vpack.c.bf16 %v631_v0, %v631_v0 }
 0x2ae   : > { %1079 = vmatmul.msk.bf16.vlgmr.msrb.gmra.mxu3 %vm580_vm1, %v635_v1 }
 0x2b3   : > { %v633_v3 = vpop.f32.mrf.mxu3 }
 0x2be   : > { %1083 = vmatmul.msk.bf16.vlgmr.msra.gmra.mxu3 %vm580_vm1, %v738_v4 }
 0x312   : > { %v712_v5 = vpop.f32.mrf.mxu1 }
 0x313   : > { %v716_v6 = vpack.c.bf16 %v712_v5, %v712_v5 }
 0x315   : > { %1082 = vmatmul.msk.bf16.vlgmr.msrb.gmra.mxu2 %vm580_vm1, %v716_v6 }
 0x31a   : > { %v714_v7 = vpop.f32.mrf.mxu1 }
 0x325   : > { %1086 = vmatmul.msk.bf16.vlgmr.msra.gmra.mxu2 %vm580_vm1, %v815_v2 }
 0x331   : > { %v651_v8 = vpop.f32.mrf.mxu3 }
 0x332   : > { %v658_v15 = vadd.f32 %v1140_v14, %v651_v8 }
 0x339   : > { %v653_v9 = vpop.f32.mrf.mxu3 }
 0x341   : > { %v756_v10 = vpop.f32.mrf.mxu3 }
 0x342   : > { %v760_v11 = vsel %vm580_vm1, %v756_v10, -inf }
 0x343   : > { %761 = vmax.xlane.f32.xlu1 %v760_v11 }
 0x349   : > { %v758_v13 = vpop.f32.mrf.mxu3 }
 0x35c   : > { %849 = vrot.lane.b32.xlu1 %v1357_v19, %s1227_s17 }
 0x398   : > { %v732_v16 = vpop.f32.mrf.mxu2 }
 0x399   : > { %v736_v17 = vadd.f32 %v732_v16, %v658_v15 }
 0x3a0   : > { %v734_v18 = vpop.f32.mrf.mxu2 }
 0x3a8   : > { %v833_v20 = vpop.f32.mrf.mxu2 }
 0x3a9   : > { %v837_v21 = vsel %vm580_vm1, %v833_v20, -inf }
 0x3aa   : > { %838 = vmax.xlane.f32.xlu2 %v837_v21 }
 0x3b0   : > { %v835_v22 = vpop.f32.mrf.mxu2 }
 0x3b1   : > { %v1142_v22 = vld [vmem:[#allocation2] ss:$0 sm:$0xff] }
 0x3b6   : > { %v762_v23 = vpop.xlane.xlu1 %761 }
 0x3b7   : > { %v763_v24 = vsub.f32 %v756_v10, %v762_v23 }
 0x3b9   : > { %v764_v25 = vmul.f32 1.442695, %v763_v24 }
 0x3bb   : > { %1151 = vpow2.f32 %v764_v25 }
 0x3c1   : > { %v1152_v26 = vpop.eup %1151 }
 0x3c2   : > { %v766_v27 = vsel %vm580_vm1, %v1152_v26, 0.0 }
 0x3c3   : > { %767 = vadd.xlane.f32.xlu2 %v766_v27 }
 0x3ce   : > { %v850_v28 = vpop.permute.xlu1 %849 }
 0x3cf   : > { %v855_v29 = vsel %vm618_vm2, %v850_v28, 0 }
 0x3d0   : > { %864 = vmatpush.bf16.msrb.mxu3 %v855_v29 }
 0x3db   : > { %772 = vrot.lane.b32.xlu2 %v1357_v19, %s1228_s20 }
 0x41d   : > { %v839_v30 = vpop.xlane.xlu2 %838 }
 0x41e   : > { %v840_v31 = vsub.f32 %v833_v20, %v839_v30  ;;  %v1141_v20 = vld [vmem:[%s1445_s10] ss:$0 sm:$0xff] }
 0x420   : > { %v841_v32 = vmul.f32 1.442695, %v840_v31 }
 0x422   : > { %1153 = vpow2.f32 %v841_v32 }
 0x428   : > { %v1154_v33 = vpop.eup %1153 }
 0x429   : > { %v843_v34 = vsel %vm580_vm1, %v1154_v33, 0.0 }
 0x42a   : > { %844 = vadd.xlane.f32.xlu0 %v843_v34 }
 0x436   : > { %v768_v35 = vpop.xlane.xlu2 %767 }
 0x437   : > { %1155 = vrcp.f32 %v768_v35 }
 0x43d   : > { %v1156_v36 = vpop.eup %1155 }
 0x43e   : > { %v770_v37 = vmul.f32 %v1156_v36, %v1152_v26  ;;  %v773_v38 = vpop.permute.xlu2 %772 }
 0x43f   : > { %v778_v39 = vsel %vm618_vm2, %v773_v38, 0 }
 0x440   : > { %v771_v40 = vpack.c.bf16 %v770_v37, %v770_v37  ;;  %787 = vmatpush.bf16.msra.mxu0 %v778_v39 }
 0x443   : > { %1084 = vmatmul.msk.bf16.vlgmr.msra.gmra.mxu0 %vm580_vm1, %v771_v40 }
 0x444   : > { %884 = vmatpush.bf16.msrb.mxu0 %v875_v47 }
 0x49d   : > { %v845_v19 = vpop.xlane.xlu0 %844 }
 0x49e   : > { %1157 = vrcp.f32 %v845_v19 }
 0x49f   : > { %1159 = vrcp.f32 %v1229_v62 }
 0x4a4   : > { %v1158_v43 = vpop.eup %1157 }
 0x4a5   : > { %v847_v44 = vmul.f32 %v1158_v43, %v1154_v33  ;;  %v1160_v63 = vpop.eup %1159 }
 0x4a6   : > { %v898_v0 = vmul.f32 32.0, %v1160_v63  ;;  %vm902_vm3 = vweird.f32 %v1160_v63 }
 0x4a7   : > { %v848_v45 = vpack.c.bf16 %v847_v44, %v847_v44 }
 0x4a8   : > { %v899_v1 = vsub.f32 1.0, %v898_v0 }
 0x4a9   : > { %1087 = vmatmul.msk.bf16.vlgmr.msrb.gmra.mxu3 %vm580_vm1, %v848_v45 }
 0x4aa   : > { %v900_v2 = vmul.f32 %v1160_v63, %v899_v1 }
 0x4ac   : > { %v901_v3 = vadd.f32 %v1160_v63, %v900_v2 }
 0x4ae   : > { %v903_v4 = vsel %vm902_vm3, %v1160_v63, %v901_v3 }
 0x4c0   : > { %v789_v48 = vpop.f32.mrf.mxu0 }
 0x4c1   : > { %v793_v49 = vpack.c.bf16 %v789_v48, %v789_v48 }
 0x4c3   : > { %1085 = vmatmul.msk.bf16.vlgmr.msra.gmra.mxu1 %vm580_vm1, %v793_v49 }
 0x4c8   : > { %v791_v50 = vpop.f32.mrf.mxu0 }
 0x52c   : > { %v866_v51 = vpop.f32.mrf.mxu3 }
 0x52d   : > { %v870_v52 = vpack.c.bf16 %v866_v51, %v866_v51 }
 0x52f   : > { %1088 = vmatmul.msk.bf16.vlgmr.msrb.gmra.mxu0 %vm580_vm1, %v870_v52 }
 0x534   : > { %v868_v53 = vpop.f32.mrf.mxu3 }
 0x540   : > { %v809_v54 = vpop.f32.mrf.mxu1 }
 0x541   : > { %v813_v55 = vadd.f32 %v809_v54, %v736_v17 }
 0x548   : > { %v811_v56 = vpop.f32.mrf.mxu1 }
 0x5ac   : > { %v886_v57 = vpop.f32.mrf.mxu0 }
 0x5ad   : > { %v890_v58 = vadd.f32 %v886_v57, %v813_v55 }
 0x5af   : > { %v893_v59 = vadd.f32 %v890_v58, %v1345_v12 }
 0x5b1   : > { %v894_v60 = vsel %vm520_vm0, %v893_v59, 0.0 }
 0x5b2   : > { %895 = vadd.xlane.f32.xlu0 %v894_v60 }
 0x5b4   : > { %v888_v61 = vpop.f32.mrf.mxu0 }
 0x625   : > { %v896_v5 = vpop.xlane.xlu0 %895 }
 0x626   : > { %v904_v6 = vmul.f32 %v903_v4, %v896_v5 }
 0x628   : > { %v905_v7 = vsub.f32 %v893_v59, %v904_v6 }
 0x62a   : > { %v906_v8 = vmul.f32 %v905_v7, %v905_v7 }
 0x62c   : > { %v907_v9 = vsel %vm520_vm0, %v906_v8, 0.0 }
 0x62d   : > { %908 = vadd.xlane.f32.xlu0 %v907_v9 }
 0x6a0   : > { %v909_v12 = vpop.xlane.xlu0 %908 }
 0x6a1   : > { %v910_v10 = vmul.f32 %v909_v12, %v903_v4 }
 0x6a3   : > { %v911_v11 = vadd.f32 1e-05, %v910_v10 }
 0x6a5   : > { %1161 = vrsqrt.f32 %v911_v11  ;;  %vm918_vm5 = vweird.f32 %v911_v11 }
 0x6ab   : > { %v1162_v13 = vpop.eup %1161 }
 0x6ac   : > { %v913_v14 = vmul.f32 %v1162_v13, %v911_v11  ;;  %vm919_vm4 = vweird.f32 %v1162_v13 }
 0x6ad   : > { %vm920_vm6 = vmor %vm918_vm5, %vm919_vm4 }
 0x6ae   : > { %v914_v15 = vmul.f32 %v1162_v13, %v913_v14 }
 0x6b0   : > { %v915_v16 = vmul.f32 0.5, %v914_v15 }
 0x6b2   : > { %v916_v17 = vsub.f32 1.5, %v915_v16 }
 0x6b4   : > { %v917_v18 = vmul.f32 %v1162_v13, %v916_v17 }
 0x6b6   : > { %v921_v21 = vsel %vm920_vm6, %v1162_v13, %v917_v18 }
 0x6b7   : > { %v922_v23 = vmul.f32 %v921_v21, %v905_v7 }
 0x6b9   : > { %v926_v24 = vmul.f32 %v1141_v20, %v922_v23 }
 0x6bb   : > { %v930_v25 = vadd.f32 %v1142_v22, %v926_v24 }
 0x6bd   : > { %v931_v26 = vpack.c.bf16 %v930_v25, %v930_v25 }
 0x6bf   : > { %933 = vst.msk [vmem:[%s488_s15] sm:$0xf] %vm932_vm7, %v931_v26 }
 0x6c0 PF: > { %s23_s23 = sadd.s32 1, %s1219_s23   ;;  %s1448_s21 = smov %s1215_s22 }
 0x6c1   : > { %p20_p8 = scmp.ge.s32.totalorder %s23_s23, 4   ;;  %s1449_s22 = smov %s1451_s25 }
 0x6c3   :  { %22 = sbr.rel (!%p20_p8) target bundleno = 2 (0x2), region = 109 }
 0x6c8   :  { %959 = vsyncpa [#allocation3], 1 }
 0x6c9   :  { %961 = vsyncpa [#allocation3 + $0x1], 1 }

// kernel: transformer_decoder.9
= control target key start
LH: loop header
LB: loop body
LE: loop exit
PB: predicated region body
PF: predicated region fallthrough
CT: control target
= control target key end

     0   :  { %s1786_s0 = inlined_call_operand.vmem [shape: bf16[2,8,32], index: 0, kind: input, shape index: {}, may-alias: {0,1}]   ;;  %s1787_s1 = inlined_call_operand.vmem [shape: bf16[2,8,32], index: 1, kind: input, shape index: {}, may-alias: {0,1}]   ;;  %s1788_s2 = inlined_call_operand.vmem [shape: bf16[32,32], index: 2, kind: input, shape index: {}]   ;;  %s1789_s3 = inlined_call_operand.hbm [shape: f32[1,32], index: 3, kind: input, shape index: {}]   ;;  %s1790_s4 = inlined_call_operand.hbm [shape: bf16[32,64], index: 4, kind: input, shape index: {}]   ;;  %s1791_s5 = inlined_call_operand.hbm [shape: f32[1,64], index: 5, kind: input, shape index: {}]   ;;  %s1792_s6 = inlined_call_operand.hbm [shape: bf16[32,32], index: 6, kind: input, shape index: {}]   ;;  %s1793_s7 = inlined_call_operand.hbm [shape: f32[1,32], index: 7, kind: input, shape index: {}]   ;;  %s1794_s8 = inlined_call_operand.hbm [shape: f32[1,32], index: 8, kind: input, shape index: {}]   ;;  %s1795_s9 = inlined_call_operand.hbm [shape: f32[1,32], index: 9, kind: input, shape index: {}]   ;;  %s1796_s10 = inlined_call_operand.vmem [shape: bf16[2,8,32], index: 10, kind: output, shape index: {}]  }
   0x1   :  { %1797 = sst [smem:[#allocation17_spill]] %s1790_s4 }
   0x2   :  { %15 = vsyncpa [#allocation3], 0 }
   0x3   :  { %16 = vsyncpa [#allocation5], 0 }
   0x4   :  { %17 = vsyncpa [#allocation8], 0 }
   0x5   :  { %18 = vsyncpa [#allocation11], 0  ;;  %s1613_s13 = smov 0   ;;  %s1615_s14 = smov 0  }
   0x6   :  { %s1617_s15 = smov 0  }
   0x7 LB: > { %s1798_s4 = sld [smem:[#allocation17_spill]]  ;;  %s1103_s19 = sadd.s32 4294967295, %s1539_s15   ;;  %s1539_s15 = sphi %s1617_s15, %s24_s15   ;;  %s1535_s14 = sphi %s1615_s14, %s1803_s14   ;;  %s1531_s13 = sphi %s1613_s13, %s1802_s13  }
   0x8   : > { %p1105_p0 = scmp.ge.s32.totalorder %s1539_s15, 1  ;;  %p291_p1 = scmp.lt.s32.totalorder %s1539_s15, 3 }
   0x9   : > { %p1634_p2 = scmp.eq.s32.totalorder %s1103_s19, 0  ;;  %s1541_s22 = smov [#allocation4]  }
   0xa   : > { %p1638_p3 = pnand %p1105_p0, %p291_p1  ;;  %s319_s23 = sshll.u32 %s1541_s22, 4  ;;  %s320_s23 = int_to_ptr.vmem [resolvable:$true] %s319_s23 }
   0xb   : > { %s343_s26 = sshll.u32 %s1792_s6, 4  ;;  %s1542_s28 = smov [#allocation7]   ;;  %s344_s26 = int_to_ptr.hbm [resolvable:$true] %s343_s26 }
   0xc   : > { %p1189_p4 = pneg %p1638_p3  ;;  %s345_s29 = sshll.u32 %s1542_s28, 4  ;;  %s346_s29 = int_to_ptr.vmem [resolvable:$true] %s345_s29 }
   0xd   : > { %s317_s18 = sshll.u32 %s1798_s4, 4  ;;  %s370_s12 = sshll.u32 %s1794_s8, 4  ;;  %s318_s18 = int_to_ptr.hbm [resolvable:$true] %s317_s18  ;;  %s371_s12 = int_to_ptr.hbm [resolvable:$true] %s370_s12 }
   0xe   : > { %p1649_p5 = pnand %p1634_p2, %p1189_p4  ;;  %s1543_s16 = smov 64  }
   0xf   : > { %s1544_s17 = smov 4   ;;  %s1545_s19 = smov [#allocation10]  }
  0x10   : > { %1195 = dma.hbm_to_vmem [thread:$0]  (!%p1649_p5), %s318_s18, 256, %s320_s23, [#allocation5], %s1543_s16, %s1543_s16, %s1544_s17  }
  0x11   : > { %1201 = dma.hbm_to_vmem [thread:$0]  (!%p1649_p5), %s344_s26, 256, %s346_s29, [#allocation8], %s1543_s16, %s1543_s16, %s1544_s17  }
  0x12   : > { %s372_s22 = sshll.u32 %s1545_s19, 4  ;;  %s36_s24 = sadd.s32 1, %s1535_s14  ;;  %s373_s22 = int_to_ptr.vmem [resolvable:$true] %s372_s22 }
  0x13   : > { %1207 = dma.hbm_to_vmem [thread:$0]  (!%p1649_p5), %s371_s12, 16, %s373_s22, [#allocation11]  }
  0x14   : > { %s306_s30 = sshll.u32 %s1789_s3, 4  ;;  %p38_p6 = scmp.ge.s32.totalorder %s36_s24, 2  ;;  %s307_s30 = int_to_ptr.hbm [resolvable:$true] %s306_s30 }
  0x15   : > { %s332_s18 = sshll.u32 %s1791_s5, 4  ;;  %s1546_s23 = smov [#allocation2]   ;;  %s333_s18 = int_to_ptr.hbm [resolvable:$true] %s332_s18 }
  0x16   : > { %s1805_s24 = smov (%p38_p6, %s36_s24), 0  ;;  %s308_s26 = sshll.u32 %s1546_s23, 4  ;;  %s309_s26 = int_to_ptr.vmem [resolvable:$true] %s308_s26 }
  0x17   : > { %1192 = dma.hbm_to_vmem [thread:$0]  (!%p1649_p5), %s307_s30, 16, %s309_s26, [#allocation3]  }
  0x18   : > { %s1547_s29 = smov [#allocation6]   ;;  %s358_s19 = sshll.u32 %s1793_s7, 4  ;;  %s359_s19 = int_to_ptr.hbm [resolvable:$true] %s358_s19 }
  0x19   : > { %s334_s12 = sshll.u32 %s1547_s29, 4  ;;  %s382_s25 = sshll.u32 %s1795_s9, 4  ;;  %s335_s12 = int_to_ptr.vmem [resolvable:$true] %s334_s12  ;;  %s383_s25 = int_to_ptr.hbm [resolvable:$true] %s382_s25 }
  0x1a   : > { %1198 = dma.hbm_to_vmem [thread:$0]  (!%p1649_p5), %s333_s18, 16, %s335_s12, [#allocation5]  }
  0x1b   : > { %s1548_s28 = smov [#allocation9]   ;;  %s1549_s30 = smov [#allocation12]  }
  0x1c   : > { %s360_s11 = sshll.u32 %s1548_s28, 4  ;;  %s384_s23 = sshll.u32 %s1549_s30, 4  ;;  %s361_s11 = int_to_ptr.vmem [resolvable:$true] %s360_s11  ;;  %s385_s23 = int_to_ptr.vmem [resolvable:$true] %s384_s23 }
  0x1d   : > { %1204 = dma.hbm_to_vmem [thread:$0]  (!%p1649_p5), %s359_s19, 16, %s361_s11, [#allocation8]  }
  0x1e   : > { %1210 = dma.hbm_to_vmem [thread:$0]  (!%p1649_p5), %s383_s25, 16, %s385_s23, [#allocation11]  }
  0x1f   : > { %414 = sbr.rel (%p1638_p3) target bundleno = 1753 (0x6d9), region = 60 }
  0x24   : > { %1514 = dma.done.wait (%p1634_p2), [#allocation3], 16  }
  0x25   : > { %1516 = vsyncadd (%p1634_p2), [#allocation3], 4294967280 }
  0x26   : > { %1518 = dma.done.wait (%p1634_p2), [#allocation5], 272  }
  0x27   : > { %1520 = vsyncadd (%p1634_p2), [#allocation5], 4294967024 }
  0x28   : > { %1522 = dma.done.wait (%p1634_p2), [#allocation8], 272  }
  0x29   : > { %1524 = vsyncadd (%p1634_p2), [#allocation8], 4294967024 }
  0x2a   : > { %1526 = dma.done.wait (%p1634_p2), [#allocation11], 32  }
  0x2b   : > { %1528 = vsyncadd (%p1634_p2), [#allocation11], 4294967264  ;;  %p491_p7 = scmp.lt.s32.totalorder %s1531_s13, 1  ;;  %v1160_v0 = vld [vmem:[#allocation4 + $0x8] sm:$0xff]  ;;  %v1159_v1 = vld [vmem:[#allocation4] sm:$0xff]  ;;  %vm533_vm0 = vcmask 261120  }
  0x2c   : > { %v1158_v2 = vld [vmem:[%s1788_s2 + $0x8] sm:$0xff]  ;;  %579 = vmatpush.bf16.msra.mxu1 %v1160_v0  ;;  %v1157_v3 = vld [vmem:[%s1788_s2] sm:$0xff]  ;;  %v1266_v6 = vld [vmem:[#allocation6] ss:$0 sm:$0xff]  ;;  %vm593_vm1 = vcmask 64512   ;;  %s1550_s4 = smov 120  }
  0x2d   : > { %s1807_s13 = smov (!%p491_p7, %s1531_s13), 1  ;;  %543 = vmatpush.bf16.msra.mxu0 %v1158_v2  ;;  %v1267_v9 = vld [vmem:[#allocation2] ss:$0 sm:$0xff]  ;;  %s1551_s22 = smov 96   ;;  %vm631_vm2 = vcmask 1043456   ;;  %vm945_vm7 = vcmask 257024  }
  0x2e   : > { %s1705_s21 = sshll.u32 %s1807_s13, 2  ;;  %s1552_s25 = smov 112   ;;  %v586_v33 = vld [vmem:[#allocation7] sm:$0xf]  ;;  %v587_v48 = vld [vmem:[#allocation7 + $0x4] sm:$0xf] }
  0x2f   : > { %s501_s16 = scalar_lea.vmem %s1787_s1, %s1705_s21  ;;  %s497_s19 = scalar_lea.vmem %s1786_s0, %s1705_s21  ;;  %v653_v34 = vsel %vm631_vm2, %v586_v33, 0  ;;  %v734_v49 = vsel %vm631_vm2, %v587_v48, 0  ;;  %v588_v33 = vld [vmem:[#allocation7 + $0x8] sm:$0xf] }
  0x30   : > { %580 = vmatpush.bf16.msra.mxu1 %v1159_v1  ;;  %v512_v4 = vld [vmem:[%s501_s16] sm:$0xf]  ;;  %s1553_s28 = smov 104   ;;  %s1554_s11 = smov 88  }
  0x31   : > { %544 = vmatpush.bf16.msra.mxu0 %v1157_v3  ;;  %v1721_v5 = vld [vmem:[%s497_s19] sm:$0xf]  ;;  %s1555_s30 = smov 72   ;;  %s1556_s23 = smov 80  }
  0x32   : > { %s508_s26 = scalar_lea.vmem %s1796_s10, %s1705_s21 }
  0x33   : > { %1142 = vmatmul.msk.bf16.vlgmr.msra.gmra.mxu1 %vm533_vm0, %v512_v4 }
  0x34   : > { %1133 = vmatmul.msk.bf16.vlgmr.msra.gmra.mxu0 %vm533_vm0, %v1721_v5 }
  0xb0   : > { %v582_v7 = vpop.f32.mrf.mxu1 }
  0xb1   : > { %v583_v8 = vadd.f32 %v1266_v6, %v582_v7  ;;  %v546_v10 = vpop.f32.mrf.mxu0  ;;  %v1268_v6 = vld [vmem:[#allocation9] ss:$0 sm:$0xff] }
  0xb2   : > { %v547_v13 = vadd.f32 %v1267_v9, %v546_v10 }
  0xb3   : > { %v1726_v11 = vpack.c.bf16 %v583_v8, %v583_v8 }
  0xb4   : > { %v591_v15 = vpack.c.bf16 %v547_v13, %v547_v13 }
  0xb5   : > { %675 = vrot.lane.b32.xlu0 %v1726_v11, %s1550_s4  ;;  %v598_v12 = vsel %vm593_vm1, %v1726_v11, 0 }
  0xb6   : > { %607 = vmatpush.bf16.xpose.msra.mxu2 %v598_v12 }
  0xb8   : > { %v584_v14 = vpop.f32.mrf.mxu1 }
  0xb9   : > { %v548_v16 = vpop.f32.mrf.mxu0 }
  0xbd   : > { %673 = vrot.lane.b32.xlu0 %v591_v15, %s1550_s4  ;;  %1143 = vmatmul.msk.bf16.vlgmr.msra.gmra.mxu2 %vm593_vm1, %v591_v15 }
  0xbe   : > { %743 = vmatpush.bf16.msrb.mxu2 %v734_v49  ;;  %v511_v49 = vunpack.c.l.bf16 %v1721_v5 }
  0xc5   : > { %626 = vrot.lane.b32.xlu0 %v1726_v11, %s1551_s22 }
  0xcd   : > { %752 = vrot.lane.b32.xlu0 %v1726_v11, %s1552_s25 }
  0xd5   : > { %827 = vrot.lane.b32.xlu0 %v591_v15, %s1553_s28 }
  0xdd   : > { %750 = vrot.lane.b32.xlu0 %v591_v15, %s1552_s25 }
 0x127   : > { %v676_v17 = vpop.permute.xlu0 %675 }
 0x128   : > { %v681_v18 = vsel %vm593_vm1, %v676_v17, 0 }
 0x129   : > { %690 = vmatpush.bf16.xpose.msrb.mxu0 %v681_v18 }
 0x12f   : > { %v674_v19 = vpop.permute.xlu0 %673 }
 0x130   : > { %1146 = vmatmul.msk.bf16.vlgmr.msrb.gmra.mxu0 %vm593_vm1, %v674_v19 }
 0x137   : > { %v627_v20 = vpop.permute.xlu0 %626 }
 0x138   : > { %v633_v21 = vsel %vm631_vm2, %v627_v20, 0 }
 0x139   : > { %642 = vmatpush.bf16.msra.mxu3 %v633_v21 }
 0x13d   : > { %662 = vmatpush.bf16.msrb.mxu3 %v653_v34  ;;  %v811_v34 = vsel %vm631_vm2, %v588_v33, 0 }
 0x13f   : > { %v753_v45 = vpop.permute.xlu0 %752 }
 0x140   : > { %v609_v22 = vpop.f32.mrf.mxu2  ;;  %v758_v47 = vsel %vm593_vm1, %v753_v45, 0 }
 0x141   : > { %v613_v23 = vsel %vm593_vm1, %v609_v22, -inf }
 0x142   : > { %614 = vmax.xlane.f32.xlu1 %v613_v23 }
 0x147   : > { %v828_v58 = vpop.permute.xlu0 %827 }
 0x148   : > { %v611_v24 = vpop.f32.mrf.mxu2 }
 0x14f   : > { %v751_v60 = vpop.permute.xlu0 %750 }
 0x1ad   : > { %v692_v25 = vpop.f32.mrf.mxu0 }
 0x1ae   : > { %v696_v26 = vsel %vm593_vm1, %v692_v25, -inf }
 0x1af   : > { %697 = vmax.xlane.f32.xlu1 %v696_v26 }
 0x1b5   : > { %v615_v27 = vpop.xlane.xlu1 %614  ;;  %v694_v28 = vpop.f32.mrf.mxu0 }
 0x1b6   : > { %v616_v29 = vsub.f32 %v609_v22, %v615_v27 }
 0x1b8   : > { %v617_v30 = vmul.f32 1.442695, %v616_v29 }
 0x1ba   : > { %1271 = vpow2.f32 %v617_v30 }
 0x1c0   : > { %v1272_v31 = vpop.eup %1271 }
 0x1c1   : > { %v619_v32 = vsel %vm593_vm1, %v1272_v31, 0.0 }
 0x1c2   : > { %620 = vadd.xlane.f32.xlu2 %v619_v32 }
 0x1c8   : > { %708 = vrot.lane.b32.xlu1 %v1726_v11, %s1554_s11 }
 0x222   : > { %v698_v35 = vpop.xlane.xlu1 %697 }
 0x223   : > { %v699_v36 = vsub.f32 %v692_v25, %v698_v35 }
 0x225   : > { %v700_v37 = vmul.f32 1.442695, %v699_v36 }
 0x227   : > { %1273 = vpow2.f32 %v700_v37 }
 0x22d   : > { %v1274_v38 = vpop.eup %1273 }
 0x22e   : > { %v702_v39 = vsel %vm593_vm1, %v1274_v38, 0.0 }
 0x22f   : > { %703 = vadd.xlane.f32.xlu2 %v702_v39 }
 0x235   : > { %v621_v40 = vpop.xlane.xlu2 %620 }
 0x236   : > { %1275 = vrcp.f32 %v621_v40 }
 0x23a   : > { %v709_v41 = vpop.permute.xlu1 %708 }
 0x23b   : > { %v714_v42 = vsel %vm631_vm2, %v709_v41, 0 }
 0x23c   : > { %v1276_v43 = vpop.eup %1275  ;;  %723 = vmatpush.bf16.msrb.mxu1 %v714_v42 }
 0x23d   : > { %v623_v44 = vmul.f32 %v1276_v43, %v1272_v31 }
 0x23f   : > { %v624_v46 = vpack.c.bf16 %v623_v44, %v623_v44 }
 0x240   : > { %820 = vmatpush.bf16.msra.mxu1 %v811_v34 }
 0x241   : > { %1144 = vmatmul.msk.bf16.vlgmr.msra.gmra.mxu3 %vm593_vm1, %v624_v46 }
 0x242   : > { %767 = vmatpush.bf16.xpose.msra.mxu3 %v758_v47 }
 0x247   : > { %829 = vrot.lane.b32.xlu2 %v1726_v11, %s1553_s28 }
 0x2a2   : > { %v704_v50 = vpop.xlane.xlu2 %703 }
 0x2a3   : > { %1277 = vrcp.f32 %v704_v50 }
 0x2a9   : > { %v1278_v51 = vpop.eup %1277 }
 0x2aa   : > { %v706_v52 = vmul.f32 %v1278_v51, %v1274_v38  ;;  %v830_v53 = vpop.permute.xlu2 %829  ;;  %v589_v38 = vld [vmem:[#allocation7 + $0xc] sm:$0xf] }
 0x2ab   : > { %v835_v54 = vsel %vm593_vm1, %v830_v53, 0  ;;  %v888_v39 = vsel %vm631_vm2, %v589_v38, 0 }
 0x2ac   : > { %844 = vmatpush.bf16.xpose.msra.mxu2 %v835_v54  ;;  %v707_v55 = vpack.c.bf16 %v706_v52, %v706_v52 }
 0x2ae   : > { %1147 = vmatmul.msk.bf16.vlgmr.msrb.gmra.mxu1 %vm593_vm1, %v707_v55  ;;  %v1557_v55 = vmov 32.0  }
 0x2c4   : > { %v644_v56 = vpop.f32.mrf.mxu3 }
 0x2c5   : > { %v648_v57 = vpack.c.bf16 %v644_v56, %v644_v56 }
 0x2c7   : > { %1145 = vmatmul.msk.bf16.vlgmr.msrb.gmra.mxu3 %vm593_vm1, %v648_v57 }
 0x2cc   : > { %v646_v59 = vpop.f32.mrf.mxu3 }
 0x2d7   : > { %1149 = vmatmul.msk.bf16.vlgmr.msra.gmra.mxu3 %vm593_vm1, %v751_v60 }
 0x32b   : > { %v725_v61 = vpop.f32.mrf.mxu1 }
 0x32c   : > { %v729_v62 = vpack.c.bf16 %v725_v61, %v725_v61 }
 0x32e   : > { %1148 = vmatmul.msk.bf16.vlgmr.msrb.gmra.mxu2 %vm593_vm1, %v729_v62 }
 0x333   : > { %v727_v63 = vpop.f32.mrf.mxu1 }
 0x33e   : > { %1152 = vmatmul.msk.bf16.vlgmr.msra.gmra.mxu2 %vm593_vm1, %v828_v58 }
 0x34a   : > { %v664_v0 = vpop.f32.mrf.mxu3 }
 0x34b   : > { %v671_v7 = vadd.f32 %v1268_v6, %v664_v0 }
 0x352   : > { %v666_v1 = vpop.f32.mrf.mxu3 }
 0x35a   : > { %v769_v2 = vpop.f32.mrf.mxu3 }
 0x35b   : > { %v773_v3 = vsel %vm593_vm1, %v769_v2, -inf }
 0x35c   : > { %774 = vmax.xlane.f32.xlu1 %v773_v3 }
 0x362   : > { %v771_v4 = vpop.f32.mrf.mxu3 }
 0x375   : > { %862 = vrot.lane.b32.xlu1 %v1726_v11, %s1555_s30 }
 0x3b1   : > { %v745_v8 = vpop.f32.mrf.mxu2 }
 0x3b2   : > { %v749_v9 = vadd.f32 %v745_v8, %v671_v7 }
 0x3b9   : > { %v747_v10 = vpop.f32.mrf.mxu2 }
 0x3c1   : > { %v846_v12 = vpop.f32.mrf.mxu2 }
 0x3c2   : > { %v850_v13 = vsel %vm593_vm1, %v846_v12, -inf }
 0x3c3   : > { %851 = vmax.xlane.f32.xlu2 %v850_v13  ;;  %v1269_v13 = vld [vmem:[#allocation10] ss:$0 sm:$0xff] }
 0x3c9   : > { %v848_v14 = vpop.f32.mrf.mxu2 }
 0x3cf   : > { %v775_v15 = vpop.xlane.xlu1 %774 }
 0x3d0   : > { %v776_v16 = vsub.f32 %v769_v2, %v775_v15  ;;  %v1270_v15 = vld [vmem:[#allocation12] ss:$0 sm:$0xff] }
 0x3d2   : > { %v777_v17 = vmul.f32 1.442695, %v776_v16 }
 0x3d4   : > { %1279 = vpow2.f32 %v777_v17 }
 0x3da   : > { %v1280_v18 = vpop.eup %1279 }
 0x3db   : > { %v779_v19 = vsel %vm593_vm1, %v1280_v18, 0.0 }
 0x3dc   : > { %780 = vadd.xlane.f32.xlu2 %v779_v19 }
 0x3e7   : > { %v863_v20 = vpop.permute.xlu1 %862 }
 0x3e8   : > { %v868_v21 = vsel %vm631_vm2, %v863_v20, 0 }
 0x3e9   : > { %877 = vmatpush.bf16.msrb.mxu3 %v868_v21 }
 0x3f4   : > { %785 = vrot.lane.b32.xlu2 %v1726_v11, %s1556_s23 }
 0x436   : > { %v852_v22 = vpop.xlane.xlu2 %851 }
 0x437   : > { %v853_v23 = vsub.f32 %v846_v12, %v852_v22 }
 0x439   : > { %v854_v24 = vmul.f32 1.442695, %v853_v23 }
 0x43b   : > { %1281 = vpow2.f32 %v854_v24 }
 0x441   : > { %v1282_v25 = vpop.eup %1281 }
 0x442   : > { %v856_v26 = vsel %vm593_vm1, %v1282_v25, 0.0 }
 0x443   : > { %857 = vadd.xlane.f32.xlu0 %v856_v26 }
 0x44f   : > { %v781_v27 = vpop.xlane.xlu2 %780 }
 0x450   : > { %1283 = vrcp.f32 %v781_v27 }
 0x456   : > { %v1284_v28 = vpop.eup %1283 }
 0x457   : > { %v783_v29 = vmul.f32 %v1284_v28, %v1280_v18  ;;  %v786_v30 = vpop.permute.xlu2 %785 }
 0x458   : > { %v791_v31 = vsel %vm631_vm2, %v786_v30, 0 }
 0x459   : > { %v784_v32 = vpack.c.bf16 %v783_v29, %v783_v29  ;;  %800 = vmatpush.bf16.msra.mxu0 %v791_v31 }
 0x45c   : > { %1150 = vmatmul.msk.bf16.vlgmr.msra.gmra.mxu0 %vm593_vm1, %v784_v32 }
 0x45d   : > { %897 = vmatpush.bf16.msrb.mxu0 %v888_v39 }
 0x4b6   : > { %v858_v11 = vpop.xlane.xlu0 %857 }
 0x4b7   : > { %1285 = vrcp.f32 %v858_v11 }
 0x4b8   : > { %1287 = vrcp.f32 %v1557_v55 }
 0x4bd   : > { %v1286_v35 = vpop.eup %1285 }
 0x4be   : > { %v860_v36 = vmul.f32 %v1286_v35, %v1282_v25  ;;  %v1288_v56 = vpop.eup %1287 }
 0x4bf   : > { %v911_v57 = vmul.f32 32.0, %v1288_v56  ;;  %vm915_vm3 = vweird.f32 %v1288_v56 }
 0x4c0   : > { %v861_v37 = vpack.c.bf16 %v860_v36, %v860_v36 }
 0x4c1   : > { %v912_v58 = vsub.f32 1.0, %v911_v57 }
 0x4c2   : > { %1153 = vmatmul.msk.bf16.vlgmr.msrb.gmra.mxu3 %vm593_vm1, %v861_v37 }
 0x4c3   : > { %v913_v59 = vmul.f32 %v1288_v56, %v912_v58 }
 0x4c5   : > { %v914_v60 = vadd.f32 %v1288_v56, %v913_v59 }
 0x4c7   : > { %v916_v61 = vsel %vm915_vm3, %v1288_v56, %v914_v60 }
 0x4d9   : > { %v802_v40 = vpop.f32.mrf.mxu0 }
 0x4da   : > { %v806_v41 = vpack.c.bf16 %v802_v40, %v802_v40 }
 0x4dc   : > { %1151 = vmatmul.msk.bf16.vlgmr.msra.gmra.mxu1 %vm593_vm1, %v806_v41 }
 0x4e1   : > { %v804_v42 = vpop.f32.mrf.mxu0 }
 0x545   : > { %v879_v43 = vpop.f32.mrf.mxu3 }
 0x546   : > { %v883_v44 = vpack.c.bf16 %v879_v43, %v879_v43 }
 0x548   : > { %1154 = vmatmul.msk.bf16.vlgmr.msrb.gmra.mxu0 %vm593_vm1, %v883_v44 }
 0x54d   : > { %v881_v45 = vpop.f32.mrf.mxu3 }
 0x559   : > { %v822_v46 = vpop.f32.mrf.mxu1 }
 0x55a   : > { %v826_v47 = vadd.f32 %v822_v46, %v749_v9 }
 0x561   : > { %v824_v48 = vpop.f32.mrf.mxu1 }
 0x5c5   : > { %v899_v50 = vpop.f32.mrf.mxu0 }
 0x5c6   : > { %v903_v51 = vadd.f32 %v899_v50, %v826_v47 }
 0x5c8   : > { %v906_v52 = vadd.f32 %v903_v51, %v511_v49 }
 0x5ca   : > { %v907_v53 = vsel %vm533_vm0, %v906_v52, 0.0 }
 0x5cb   : > { %908 = vadd.xlane.f32.xlu0 %v907_v53 }
 0x5cd   : > { %v901_v54 = vpop.f32.mrf.mxu0 }
 0x63e   : > { %v909_v62 = vpop.xlane.xlu0 %908 }
 0x63f   : > { %v917_v63 = vmul.f32 %v916_v61, %v909_v62 }
 0x641   : > { %v918_v0 = vsub.f32 %v906_v52, %v917_v63 }
 0x643   : > { %v919_v5 = vmul.f32 %v918_v0, %v918_v0 }
 0x645   : > { %v920_v1 = vsel %vm533_vm0, %v919_v5, 0.0 }
 0x646   : > { %921 = vadd.xlane.f32.xlu0 %v920_v1 }
 0x6b9   : > { %v922_v2 = vpop.xlane.xlu0 %921 }
 0x6ba   : > { %v923_v3 = vmul.f32 %v922_v2, %v916_v61 }
 0x6bc   : > { %v924_v4 = vadd.f32 1e-05, %v923_v3 }
 0x6be   : > { %1289 = vrsqrt.f32 %v924_v4  ;;  %vm931_vm5 = vweird.f32 %v924_v4 }
 0x6c4   : > { %v1290_v6 = vpop.eup %1289 }
 0x6c5   : > { %v926_v7 = vmul.f32 %v1290_v6, %v924_v4  ;;  %vm932_vm4 = vweird.f32 %v1290_v6 }
 0x6c6   : > { %vm933_vm6 = vmor %vm931_vm5, %vm932_vm4 }
 0x6c7   : > { %v927_v8 = vmul.f32 %v1290_v6, %v926_v7 }
 0x6c9   : > { %v928_v9 = vmul.f32 0.5, %v927_v8 }
 0x6cb   : > { %v929_v10 = vsub.f32 1.5, %v928_v9 }
 0x6cd   : > { %v930_v12 = vmul.f32 %v1290_v6, %v929_v10 }
 0x6cf   : > { %v934_v14 = vsel %vm933_vm6, %v1290_v6, %v930_v12 }
 0x6d0   : > { %v935_v16 = vmul.f32 %v934_v14, %v918_v0 }
 0x6d2   : > { %v939_v17 = vmul.f32 %v1269_v13, %v935_v16 }
 0x6d4   : > { %v943_v18 = vadd.f32 %v1270_v15, %v939_v17 }
 0x6d6   : > { %v944_v19 = vpack.c.bf16 %v943_v18, %v943_v18 }
 0x6d8   : > { %946 = vst.msk [vmem:[%s508_s26] sm:$0xf] %vm945_vm7, %v944_v19 }
 0x6d9 PF: > { %s24_s15 = sadd.s32 1, %s1539_s15   ;;  %s1802_s13 = smov %s1535_s14 }
 0x6da   : > { %p21_p8 = scmp.ge.s32.totalorder %s24_s15, 4   ;;  %s1803_s14 = smov %s1805_s24 }
 0x6dc   :  { %23 = sbr.rel (!%p21_p8) target bundleno = 7 (0x7), region = 122 }
 0x6e1   :  { %972 = vsyncpa [#allocation3], 1 }
 0x6e2   :  { %974 = vsyncpa [#allocation3 + $0x1], 1 }
 0x6e3   :  { %975 = vsyncpa [#allocation5], 1 }
 0x6e4   :  { %976 = vsyncpa [#allocation8], 1 }
 0x6e5   :  { %977 = vsyncpa [#allocation11], 1 }

// kernel: transformer_decoder.11
= control target key start
LH: loop header
LB: loop body
LE: loop exit
PB: predicated region body
PF: predicated region fallthrough
CT: control target
= control target key end

     0   :  { %vm56_vm0 = vcmask 261120   ;;  %vm113_vm1 = vcmask 523264   ;;  %v253_v27 = vmov 32.0   ;;  %vm198_vm7 = vcmask 257024   ;;  %s341_s1 = inlined_call_operand.vmem [shape: bf16[32,64], index: 1, kind: input, shape index: {}]   ;;  %s342_s2 = inlined_call_operand.vmem [shape: f32[1,64], index: 2, kind: input, shape index: {}]   ;;  %s343_s0 = inlined_call_operand.vmem [shape: bf16[16,32], index: 0, kind: input, shape index: {}]   ;;  %s344_s4 = inlined_call_operand.vmem [shape: f32[1,32], index: 4, kind: input, shape index: {}]   ;;  %s345_s3 = inlined_call_operand.vmem [shape: bf16[64,32], index: 3, kind: input, shape index: {}]   ;;  %s346_s5 = inlined_call_operand.vmem [shape: f32[1,32], index: 5, kind: input, shape index: {}]   ;;  %s347_s6 = inlined_call_operand.vmem [shape: f32[1,32], index: 6, kind: input, shape index: {}]   ;;  %s348_s7 = inlined_call_operand.vmem [shape: bf16[16,32], index: 7, kind: output, shape index: {}]  }
   0x1   :  { %v237_v0 = vld [vmem:[%s341_s1 + $0x8] sm:$0xff]  ;;  %v236_v1 = vld [vmem:[%s341_s1] sm:$0xff]  ;;  %v241_v3 = vld [vmem:[%s345_s3 + $0x18] sm:$0xff]  ;;  %247 = vrcp.f32 %v253_v27 }
   0x2   :  { %66 = vmatpush.bf16.msra.mxu0 %v237_v0  ;;  %v235_v2 = vld [vmem:[%s343_s0] sm:$0xff]  ;;  %121 = vmatpush.bf16.msra.mxu1 %v241_v3  ;;  %v240_v4 = vld [vmem:[%s345_s3 + $0x10] sm:$0xff]  ;;  %v239_v5 = vld [vmem:[%s345_s3 + $0x8] sm:$0xff] }
   0x3   :  { %v238_v6 = vld [vmem:[%s345_s3] sm:$0xff] }
   0x4   :  { %v243_v8 = vld [vmem:[%s342_s2] ss:$0 sm:$0xff] }
   0x5   :  { %v27_v15 = vld [vmem:[%s343_s0] sm:$0xff]  }
   0x6   :  { %67 = vmatpush.bf16.msra.mxu0 %v236_v1  ;;  %122 = vmatpush.bf16.msra.mxu1 %v240_v4  ;;  %v244_v16 = vld [vmem:[%s344_s4] ss:$0 sm:$0xff]  ;;  %v29_v17 = vunpack.c.l.bf16 %v27_v15  ;;  %v30_v22 = vunpack.c.h.bf16 %v27_v15 }
   0x7   :  { %v248_v28 = vpop.eup %247  ;;  %v245_v58 = vld [vmem:[%s346_s5] ss:$0 sm:$0xff] }
   0x8   :  { %v142_v29 = vmul.f32 32.0, %v248_v28  ;;  %vm146_vm2 = vweird.f32 %v248_v28  ;;  %v246_v61 = vld [vmem:[%s347_s6] ss:$0 sm:$0xff] }
   0x9   :  { %217 = vmatmul.msk.bf16.vlgmr.msra.gmra.mxu0 %vm56_vm0, %v235_v2 }
   0xa   :  { %123 = vmatpush.bf16.msra.mxu1 %v239_v5  ;;  %v143_v30 = vsub.f32 1.0, %v142_v29 }
   0xc   :  { %v144_v31 = vmul.f32 %v248_v28, %v143_v30 }
   0xe   :  { %124 = vmatpush.bf16.msra.mxu1 %v238_v6  ;;  %v145_v32 = vadd.f32 %v248_v28, %v144_v31 }
  0x10   :  { %v147_v33 = vsel %vm146_vm2, %v248_v28, %v145_v32 }
  0x86   :  { %v69_v7 = vpop.f32.mrf.mxu0 }
  0x87   :  { %v70_v9 = vadd.f32 %v243_v8, %v69_v7 }
  0x89   :  { %v74_v12 = vmax.f32 %v70_v9, 0.0 }
  0x8e   :  { %v71_v10 = vpop.f32.mrf.mxu0 }
  0x8f   :  { %v72_v11 = vadd.f32 %v243_v8, %v71_v10 }
  0x91   :  { %v75_v13 = vmax.f32 %v72_v11, 0.0 }
  0x93   :  { %v76_v14 = vpack.c.bf16 %v75_v13, %v74_v12 }
  0x95   :  { %234 = vmatmul.msk.bf16.vlgmr.msra.gmra.mxu1 %vm113_vm1, %v76_v14 }
 0x112   :  { %v126_v18 = vpop.f32.mrf.mxu1 }
 0x113   :  { %v127_v19 = vadd.f32 %v244_v16, %v126_v18 }
 0x115   :  { %v133_v20 = vadd.f32 %v127_v19, %v29_v17 }
 0x117   :  { %v135_v21 = vsel %vm56_vm0, %v133_v20, 0.0 }
 0x118   :  { %136 = vadd.xlane.f32.xlu0 %v135_v21 }
 0x11a   :  { %v128_v23 = vpop.f32.mrf.mxu1 }
 0x11b   :  { %v129_v24 = vadd.f32 %v244_v16, %v128_v23 }
 0x11d   :  { %v134_v25 = vadd.f32 %v129_v24, %v30_v22 }
 0x11f   :  { %v138_v26 = vsel %vm56_vm0, %v134_v25, 0.0 }
 0x120   :  { %139 = vadd.xlane.f32.xlu0 %v138_v26 }
 0x18b   :  { %v137_v34 = vpop.xlane.xlu0 %136 }
 0x18c   :  { %v148_v35 = vmul.f32 %v147_v33, %v137_v34 }
 0x18e   :  { %v150_v36 = vsub.f32 %v133_v20, %v148_v35 }
 0x190   :  { %v152_v37 = vmul.f32 %v150_v36, %v150_v36 }
 0x192   :  { %v154_v38 = vsel %vm56_vm0, %v152_v37, 0.0 }
 0x193   :  { %155 = vadd.xlane.f32.xlu1 %v154_v38  ;;  %v140_v39 = vpop.xlane.xlu0 %139 }
 0x194   :  { %v149_v40 = vmul.f32 %v147_v33, %v140_v39 }
 0x196   :  { %v151_v41 = vsub.f32 %v134_v25, %v149_v40 }
 0x198   :  { %v153_v42 = vmul.f32 %v151_v41, %v151_v41 }
 0x19a   :  { %v157_v43 = vsel %vm56_vm0, %v153_v42, 0.0 }
 0x19b   :  { %158 = vadd.xlane.f32.xlu1 %v157_v43 }
 0x206   :  { %v156_v44 = vpop.xlane.xlu1 %155 }
 0x207   :  { %v160_v45 = vmul.f32 %v156_v44, %v147_v33 }
 0x209   :  { %v162_v46 = vadd.f32 1e-05, %v160_v45 }
 0x20b   :  { %249 = vrsqrt.f32 %v162_v46  ;;  %vm170_vm4 = vweird.f32 %v162_v46 }
 0x20e   :  { %v159_v47 = vpop.xlane.xlu1 %158 }
 0x20f   :  { %v161_v48 = vmul.f32 %v159_v47, %v147_v33 }
 0x211   :  { %v250_v49 = vpop.eup %249  ;;  %v163_v50 = vadd.f32 1e-05, %v161_v48 }
 0x212   :  { %v165_v51 = vmul.f32 %v250_v49, %v162_v46  ;;  %vm171_vm3 = vweird.f32 %v250_v49 }
 0x213   :  { %251 = vrsqrt.f32 %v163_v50  ;;  %vm172_vm5 = vmor %vm170_vm4, %vm171_vm3  ;;  %vm180_vm8 = vweird.f32 %v163_v50 }
 0x214   :  { %v166_v52 = vmul.f32 %v250_v49, %v165_v51 }
 0x216   :  { %v167_v53 = vmul.f32 0.5, %v166_v52 }
 0x218   :  { %v168_v54 = vsub.f32 1.5, %v167_v53 }
 0x219   :  { %v252_v55 = vpop.eup %251 }
 0x21a   :  { %v169_v56 = vmul.f32 %v250_v49, %v168_v54  ;;  %v175_v57 = vmul.f32 %v252_v55, %v163_v50  ;;  %vm181_vm6 = vweird.f32 %v252_v55 }
 0x21b   :  { %vm182_vm9 = vmor %vm180_vm8, %vm181_vm6 }
 0x21c   :  { %v173_v59 = vsel %vm172_vm5, %v250_v49, %v169_v56  ;;  %v176_v60 = vmul.f32 %v252_v55, %v175_v57 }
 0x21d   :  { %v184_v62 = vmul.f32 %v173_v59, %v150_v36 }
 0x21e   :  { %v177_v63 = vmul.f32 0.5, %v176_v60 }
 0x21f   :  { %v189_v0 = vmul.f32 %v245_v58, %v184_v62 }
 0x220   :  { %v178_v1 = vsub.f32 1.5, %v177_v63 }
 0x221   :  { %v194_v2 = vadd.f32 %v246_v61, %v189_v0 }
 0x222   :  { %v179_v3 = vmul.f32 %v252_v55, %v178_v1 }
 0x223   :  { %v196_v4 = vpack.c.bf16 %v194_v2, %v194_v2 }
 0x224   :  { %v183_v5 = vsel %vm182_vm9, %v252_v55, %v179_v3 }
 0x225   :  { %199 = vst.msk [vmem:[%s348_s7] sm:$0xf] %vm198_vm7, %v196_v4  ;;  %v185_v6 = vmul.f32 %v183_v5, %v151_v41 }
 0x227   :  { %v190_v7 = vmul.f32 %v245_v58, %v185_v6 }
 0x229   :  { %v195_v8 = vadd.f32 %v246_v61, %v190_v7 }
 0x22b   :  { %v197_v9 = vpack.c.bf16 %v195_v8, %v195_v8 }
 0x22d   :  { %200 = vst.msk [vmem:[%s348_s7 + $0x4] sm:$0xf] %vm198_vm7, %v197_v9 }

// kernel: transformer_decoder.10
= control target key start
LH: loop header
LB: loop body
LE: loop exit
PB: predicated region body
PF: predicated region fallthrough
CT: control target
= control target key end

     0   :  { %s1785_s0 = inlined_call_operand.vmem [shape: bf16[2,8,32], index: 0, kind: input, shape index: {}]   ;;  %s1786_s1 = inlined_call_operand.vmem [shape: bf16[2,8,32], index: 1, kind: input, shape index: {}]   ;;  %s1787_s2 = inlined_call_operand.hbm [shape: bf16[32,32], index: 2, kind: input, shape index: {}]   ;;  %s1788_s3 = inlined_call_operand.vmem [shape: f32[1,32], index: 3, kind: input, shape index: {}]   ;;  %s1789_s4 = inlined_call_operand.hbm [shape: bf16[32,64], index: 4, kind: input, shape index: {}]   ;;  %s1790_s5 = inlined_call_operand.hbm [shape: f32[1,64], index: 5, kind: input, shape index: {}]   ;;  %s1791_s6 = inlined_call_operand.hbm [shape: bf16[32,32], index: 6, kind: input, shape index: {}]   ;;  %s1792_s7 = inlined_call_operand.hbm [shape: f32[1,32], index: 7, kind: input, shape index: {}]   ;;  %s1793_s8 = inlined_call_operand.hbm [shape: f32[1,32], index: 8, kind: input, shape index: {}]   ;;  %s1794_s9 = inlined_call_operand.hbm [shape: f32[1,32], index: 9, kind: input, shape index: {}]   ;;  %s1795_s10 = inlined_call_operand.vmem [shape: bf16[2,8,32], index: 10, kind: output, shape index: {}]  }
   0x1   :  { %1796 = sst [smem:[#allocation17_spill]] %s1787_s2 }
   0x2   :  { %1797 = sst [smem:[#allocation18_spill]] %s1789_s4 }
   0x3   :  { %15 = vsyncpa [#allocation3], 0 }
   0x4   :  { %16 = vsyncpa [#allocation5], 0 }
   0x5   :  { %17 = vsyncpa [#allocation8], 0 }
   0x6   :  { %18 = vsyncpa [#allocation11], 0  ;;  %s1615_s13 = smov 0   ;;  %s1617_s14 = smov 0  }
   0x7   :  { %s1619_s15 = smov 0  }
   0x8 LB: > { %s1105_s16 = sadd.s32 4294967295, %s1541_s15   ;;  %p1107_p0 = scmp.ge.s32.totalorder %s1541_s15, 1  ;;  %s1541_s15 = sphi %s1619_s15, %s24_s15   ;;  %s1537_s14 = sphi %s1617_s14, %s1804_s14   ;;  %s1533_s13 = sphi %s1615_s13, %s1803_s13  }
   0x9   : > { %p291_p1 = scmp.lt.s32.totalorder %s1541_s15, 3  ;;  %p1633_p2 = scmp.eq.s32.totalorder %s1105_s16, 0 }
   0xa   : > { %s1799_s4 = sld [smem:[#allocation18_spill]]  ;;  %s345_s24 = sshll.u32 %s1791_s6, 4  ;;  %s346_s24 = int_to_ptr.hbm [resolvable:$true] %s345_s24 }
   0xb   : > { %p1640_p3 = pnand %p1107_p0, %p291_p1  ;;  %s1543_s25 = smov [#allocation4]  }
   0xc   : > { %s321_s26 = sshll.u32 %s1543_s25, 4  ;;  %s1544_s28 = smov [#allocation7]   ;;  %s322_s26 = int_to_ptr.vmem [resolvable:$true] %s321_s26 }
   0xd   : > { %p1191_p4 = pneg %p1640_p3  ;;  %s347_s29 = sshll.u32 %s1544_s28, 4  ;;  %s348_s29 = int_to_ptr.vmem [resolvable:$true] %s347_s29 }
   0xe   : > { %s372_s12 = sshll.u32 %s1793_s8, 4  ;;  %s1545_s16 = smov 64   ;;  %s373_s12 = int_to_ptr.hbm [resolvable:$true] %s372_s12 }
   0xf   : > { %p1651_p5 = pnand %p1633_p2, %p1191_p4  ;;  %s1546_s18 = smov 4  }
  0x10   : > { %s319_s20 = sshll.u32 %s1799_s4, 4  ;;  %s1547_s19 = smov [#allocation10]   ;;  %s320_s20 = int_to_ptr.hbm [resolvable:$true] %s319_s20 }
  0x11   : > { %1197 = dma.hbm_to_vmem [thread:$0]  (!%p1651_p5), %s320_s20, 256, %s322_s26, [#allocation5], %s1545_s16, %s1545_s16, %s1546_s18  }
  0x12   : > { %1203 = dma.hbm_to_vmem [thread:$0]  (!%p1651_p5), %s346_s24, 256, %s348_s29, [#allocation8], %s1545_s16, %s1545_s16, %s1546_s18  }
  0x13   : > { %s374_s22 = sshll.u32 %s1547_s19, 4  ;;  %s36_s23 = sadd.s32 1, %s1537_s14  ;;  %s375_s22 = int_to_ptr.vmem [resolvable:$true] %s374_s22 }
  0x14   : > { %1209 = dma.hbm_to_vmem [thread:$0]  (!%p1651_p5), %s373_s12, 16, %s375_s22, [#allocation11]  }
  0x15   : > { %s1802_s2 = sld [smem:[#allocation17_spill]]  ;;  %p38_p6 = scmp.ge.s32.totalorder %s36_s23, 2 }
  0x16   : > { %s334_s20 = sshll.u32 %s1790_s5, 4  ;;  %s1548_s24 = smov [#allocation2]   ;;  %s335_s20 = int_to_ptr.hbm [resolvable:$true] %s334_s20 }
  0x17   : > { %s1806_s23 = smov (%p38_p6, %s36_s23), 0  ;;  %s304_s26 = sshll.u32 %s1548_s24, 4  ;;  %s305_s26 = int_to_ptr.vmem [resolvable:$true] %s304_s26 }
  0x18   : > { %s1549_s29 = smov [#allocation6]   ;;  %s360_s25 = sshll.u32 %s1792_s7, 4  ;;  %s361_s25 = int_to_ptr.hbm [resolvable:$true] %s360_s25 }
  0x19   : > { %s336_s12 = sshll.u32 %s1549_s29, 4  ;;  %s384_s11 = sshll.u32 %s1794_s9, 4  ;;  %s337_s12 = int_to_ptr.vmem [resolvable:$true] %s336_s12  ;;  %s385_s11 = int_to_ptr.hbm [resolvable:$true] %s384_s11 }
  0x1a   : > { %1200 = dma.hbm_to_vmem [thread:$0]  (!%p1651_p5), %s335_s20, 16, %s337_s12, [#allocation5]  }
  0x1b   : > { %s302_s30 = sshll.u32 %s1802_s2, 4  ;;  %s1550_s24 = smov [#allocation9]   ;;  %s303_s30 = int_to_ptr.hbm [resolvable:$true] %s302_s30 }
  0x1c   : > { %1194 = dma.hbm_to_vmem [thread:$0]  (!%p1651_p5), %s303_s30, 256, %s305_s26, [#allocation3], %s1545_s16, %s1545_s16, %s1546_s18  }
  0x1d   : > { %s362_s2 = sshll.u32 %s1550_s24, 4  ;;  %s1551_s16 = smov [#allocation12]   ;;  %s363_s2 = int_to_ptr.vmem [resolvable:$true] %s362_s2 }
  0x1e   : > { %1206 = dma.hbm_to_vmem [thread:$0]  (!%p1651_p5), %s361_s25, 16, %s363_s2, [#allocation8]  }
  0x1f   : > { %s386_s18 = sshll.u32 %s1551_s16, 4  ;;  %416 = sbr.rel (%p1640_p3) target bundleno = 1753 (0x6d9), region = 60  ;;  %s387_s18 = int_to_ptr.vmem [resolvable:$true] %s386_s18 }
  0x20   : > { %1212 = dma.hbm_to_vmem [thread:$0]  (!%p1651_p5), %s385_s11, 16, %s387_s18, [#allocation11]  }
  0x24   : > { %1516 = dma.done.wait (%p1633_p2), [#allocation3], 256  }
  0x25   : > { %1518 = vsyncadd (%p1633_p2), [#allocation3], 4294967040 }
  0x26   : > { %1520 = dma.done.wait (%p1633_p2), [#allocation5], 272  }
  0x27   : > { %1522 = vsyncadd (%p1633_p2), [#allocation5], 4294967024 }
  0x28   : > { %1524 = dma.done.wait (%p1633_p2), [#allocation8], 272  }
  0x29   : > { %1526 = vsyncadd (%p1633_p2), [#allocation8], 4294967024 }
  0x2a   : > { %1528 = dma.done.wait (%p1633_p2), [#allocation11], 32  }
  0x2b   : > { %1530 = vsyncadd (%p1633_p2), [#allocation11], 4294967264  ;;  %p493_p7 = scmp.lt.s32.totalorder %s1533_s13, 1  ;;  %v1162_v0 = vld [vmem:[#allocation4 + $0x8] sm:$0xff]  ;;  %v1161_v1 = vld [vmem:[#allocation4] sm:$0xff]  ;;  %vm535_vm0 = vcmask 261120  }
  0x2c   : > { %v1160_v2 = vld [vmem:[#allocation2 + $0x8] sm:$0xff]  ;;  %581 = vmatpush.bf16.msra.mxu1 %v1162_v0  ;;  %v1159_v3 = vld [vmem:[#allocation2] sm:$0xff]  ;;  %vm595_vm1 = vcmask 64512   ;;  %s1552_s12 = smov 120   ;;  %s1553_s19 = smov 96   ;;  %vm633_vm2 = vcmask 1043456  }
  0x2d   : > { %s1808_s13 = smov (!%p493_p7, %s1533_s13), 1  ;;  %545 = vmatpush.bf16.msra.mxu0 %v1160_v2  ;;  %v1268_v6 = vld [vmem:[#allocation6] ss:$0 sm:$0xff]  ;;  %s1554_s22 = smov 112   ;;  %v588_v33 = vld [vmem:[#allocation7] sm:$0xf] }
  0x2e   : > { %s1707_s2 = sshll.u32 %s1808_s13, 2  ;;  %v1269_v9 = vld [vmem:[%s1788_s3] ss:$0 sm:$0xff]  ;;  %s1555_s25 = smov 104   ;;  %v655_v34 = vsel %vm633_vm2, %v588_v33, 0  ;;  %vm947_vm7 = vcmask 257024  }
  0x2f   : > { %s503_s30 = scalar_lea.vmem %s1786_s1, %s1707_s2  ;;  %s499_s26 = scalar_lea.vmem %s1785_s0, %s1707_s2  ;;  %v589_v48 = vld [vmem:[#allocation7 + $0x4] sm:$0xf]  ;;  %v590_v33 = vld [vmem:[#allocation7 + $0x8] sm:$0xf] }
  0x30   : > { %582 = vmatpush.bf16.msra.mxu1 %v1161_v1  ;;  %v514_v4 = vld [vmem:[%s503_s30] sm:$0xf]  ;;  %s1556_s4 = smov 88   ;;  %v736_v49 = vsel %vm633_vm2, %v589_v48, 0  ;;  %s1557_s28 = smov 72  }
  0x31   : > { %546 = vmatpush.bf16.msra.mxu0 %v1159_v3  ;;  %v1717_v5 = vld [vmem:[%s499_s26] sm:$0xf]  ;;  %s1558_s11 = smov 80   ;;  %s510_s18 = scalar_lea.vmem %s1795_s10, %s1707_s2 }
  0x33   : > { %1144 = vmatmul.msk.bf16.vlgmr.msra.gmra.mxu1 %vm535_vm0, %v514_v4 }
  0x34   : > { %1135 = vmatmul.msk.bf16.vlgmr.msra.gmra.mxu0 %vm535_vm0, %v1717_v5 }
  0xb0   : > { %v584_v7 = vpop.f32.mrf.mxu1 }
  0xb1   : > { %v585_v8 = vadd.f32 %v1268_v6, %v584_v7  ;;  %v548_v10 = vpop.f32.mrf.mxu0  ;;  %v1270_v6 = vld [vmem:[#allocation9] ss:$0 sm:$0xff] }
  0xb2   : > { %v549_v13 = vadd.f32 %v1269_v9, %v548_v10 }
  0xb3   : > { %v1725_v11 = vpack.c.bf16 %v585_v8, %v585_v8 }
  0xb4   : > { %v593_v15 = vpack.c.bf16 %v549_v13, %v549_v13 }
  0xb5   : > { %677 = vrot.lane.b32.xlu0 %v1725_v11, %s1552_s12  ;;  %v600_v12 = vsel %vm595_vm1, %v1725_v11, 0 }
  0xb6   : > { %609 = vmatpush.bf16.xpose.msra.mxu2 %v600_v12 }
  0xb8   : > { %v586_v14 = vpop.f32.mrf.mxu1 }
  0xb9   : > { %v550_v16 = vpop.f32.mrf.mxu0 }
  0xbd   : > { %675 = vrot.lane.b32.xlu0 %v593_v15, %s1552_s12  ;;  %1145 = vmatmul.msk.bf16.vlgmr.msra.gmra.mxu2 %vm595_vm1, %v593_v15 }
  0xbe   : > { %745 = vmatpush.bf16.msrb.mxu2 %v736_v49  ;;  %v513_v49 = vunpack.c.l.bf16 %v1717_v5 }
  0xc5   : > { %628 = vrot.lane.b32.xlu0 %v1725_v11, %s1553_s19 }
  0xcd   : > { %754 = vrot.lane.b32.xlu0 %v1725_v11, %s1554_s22 }
  0xd5   : > { %829 = vrot.lane.b32.xlu0 %v593_v15, %s1555_s25 }
  0xdd   : > { %752 = vrot.lane.b32.xlu0 %v593_v15, %s1554_s22 }
 0x127   : > { %v678_v17 = vpop.permute.xlu0 %677 }
 0x128   : > { %v683_v18 = vsel %vm595_vm1, %v678_v17, 0 }
 0x129   : > { %692 = vmatpush.bf16.xpose.msrb.mxu0 %v683_v18 }
 0x12f   : > { %v676_v19 = vpop.permute.xlu0 %675 }
 0x130   : > { %1148 = vmatmul.msk.bf16.vlgmr.msrb.gmra.mxu0 %vm595_vm1, %v676_v19 }
 0x137   : > { %v629_v20 = vpop.permute.xlu0 %628 }
 0x138   : > { %v635_v21 = vsel %vm633_vm2, %v629_v20, 0 }
 0x139   : > { %644 = vmatpush.bf16.msra.mxu3 %v635_v21 }
 0x13d   : > { %664 = vmatpush.bf16.msrb.mxu3 %v655_v34  ;;  %v813_v34 = vsel %vm633_vm2, %v590_v33, 0 }
 0x13f   : > { %v755_v45 = vpop.permute.xlu0 %754 }
 0x140   : > { %v611_v22 = vpop.f32.mrf.mxu2  ;;  %v760_v47 = vsel %vm595_vm1, %v755_v45, 0 }
 0x141   : > { %v615_v23 = vsel %vm595_vm1, %v611_v22, -inf }
 0x142   : > { %616 = vmax.xlane.f32.xlu1 %v615_v23 }
 0x147   : > { %v830_v58 = vpop.permute.xlu0 %829 }
 0x148   : > { %v613_v24 = vpop.f32.mrf.mxu2 }
 0x14f   : > { %v753_v60 = vpop.permute.xlu0 %752 }
 0x1ad   : > { %v694_v25 = vpop.f32.mrf.mxu0 }
 0x1ae   : > { %v698_v26 = vsel %vm595_vm1, %v694_v25, -inf }
 0x1af   : > { %699 = vmax.xlane.f32.xlu1 %v698_v26 }
 0x1b5   : > { %v617_v27 = vpop.xlane.xlu1 %616  ;;  %v696_v28 = vpop.f32.mrf.mxu0 }
 0x1b6   : > { %v618_v29 = vsub.f32 %v611_v22, %v617_v27 }
 0x1b8   : > { %v619_v30 = vmul.f32 1.442695, %v618_v29 }
 0x1ba   : > { %1273 = vpow2.f32 %v619_v30 }
 0x1c0   : > { %v1274_v31 = vpop.eup %1273 }
 0x1c1   : > { %v621_v32 = vsel %vm595_vm1, %v1274_v31, 0.0 }
 0x1c2   : > { %622 = vadd.xlane.f32.xlu2 %v621_v32 }
 0x1c8   : > { %710 = vrot.lane.b32.xlu1 %v1725_v11, %s1556_s4 }
 0x222   : > { %v700_v35 = vpop.xlane.xlu1 %699 }
 0x223   : > { %v701_v36 = vsub.f32 %v694_v25, %v700_v35 }
 0x225   : > { %v702_v37 = vmul.f32 1.442695, %v701_v36 }
 0x227   : > { %1275 = vpow2.f32 %v702_v37 }
 0x22d   : > { %v1276_v38 = vpop.eup %1275 }
 0x22e   : > { %v704_v39 = vsel %vm595_vm1, %v1276_v38, 0.0 }
 0x22f   : > { %705 = vadd.xlane.f32.xlu2 %v704_v39 }
 0x235   : > { %v623_v40 = vpop.xlane.xlu2 %622 }
 0x236   : > { %1277 = vrcp.f32 %v623_v40 }
 0x23a   : > { %v711_v41 = vpop.permute.xlu1 %710 }
 0x23b   : > { %v716_v42 = vsel %vm633_vm2, %v711_v41, 0 }
 0x23c   : > { %v1278_v43 = vpop.eup %1277  ;;  %725 = vmatpush.bf16.msrb.mxu1 %v716_v42 }
 0x23d   : > { %v625_v44 = vmul.f32 %v1278_v43, %v1274_v31 }
 0x23f   : > { %v626_v46 = vpack.c.bf16 %v625_v44, %v625_v44 }
 0x240   : > { %822 = vmatpush.bf16.msra.mxu1 %v813_v34 }
 0x241   : > { %1146 = vmatmul.msk.bf16.vlgmr.msra.gmra.mxu3 %vm595_vm1, %v626_v46 }
 0x242   : > { %769 = vmatpush.bf16.xpose.msra.mxu3 %v760_v47 }
 0x247   : > { %831 = vrot.lane.b32.xlu2 %v1725_v11, %s1555_s25 }
 0x2a2   : > { %v706_v50 = vpop.xlane.xlu2 %705 }
 0x2a3   : > { %1279 = vrcp.f32 %v706_v50 }
 0x2a9   : > { %v1280_v51 = vpop.eup %1279 }
 0x2aa   : > { %v708_v52 = vmul.f32 %v1280_v51, %v1276_v38  ;;  %v832_v53 = vpop.permute.xlu2 %831  ;;  %v591_v38 = vld [vmem:[#allocation7 + $0xc] sm:$0xf] }
 0x2ab   : > { %v837_v54 = vsel %vm595_vm1, %v832_v53, 0  ;;  %v890_v39 = vsel %vm633_vm2, %v591_v38, 0 }
 0x2ac   : > { %846 = vmatpush.bf16.xpose.msra.mxu2 %v837_v54  ;;  %v709_v55 = vpack.c.bf16 %v708_v52, %v708_v52 }
 0x2ae   : > { %1149 = vmatmul.msk.bf16.vlgmr.msrb.gmra.mxu1 %vm595_vm1, %v709_v55  ;;  %v1559_v55 = vmov 32.0  }
 0x2c4   : > { %v646_v56 = vpop.f32.mrf.mxu3 }
 0x2c5   : > { %v650_v57 = vpack.c.bf16 %v646_v56, %v646_v56 }
 0x2c7   : > { %1147 = vmatmul.msk.bf16.vlgmr.msrb.gmra.mxu3 %vm595_vm1, %v650_v57 }
 0x2cc   : > { %v648_v59 = vpop.f32.mrf.mxu3 }
 0x2d7   : > { %1151 = vmatmul.msk.bf16.vlgmr.msra.gmra.mxu3 %vm595_vm1, %v753_v60 }
 0x32b   : > { %v727_v61 = vpop.f32.mrf.mxu1 }
 0x32c   : > { %v731_v62 = vpack.c.bf16 %v727_v61, %v727_v61 }
 0x32e   : > { %1150 = vmatmul.msk.bf16.vlgmr.msrb.gmra.mxu2 %vm595_vm1, %v731_v62 }
 0x333   : > { %v729_v63 = vpop.f32.mrf.mxu1 }
 0x33e   : > { %1154 = vmatmul.msk.bf16.vlgmr.msra.gmra.mxu2 %vm595_vm1, %v830_v58 }
 0x34a   : > { %v666_v0 = vpop.f32.mrf.mxu3 }
 0x34b   : > { %v673_v7 = vadd.f32 %v1270_v6, %v666_v0 }
 0x352   : > { %v668_v1 = vpop.f32.mrf.mxu3 }
 0x35a   : > { %v771_v2 = vpop.f32.mrf.mxu3 }
 0x35b   : > { %v775_v3 = vsel %vm595_vm1, %v771_v2, -inf }
 0x35c   : > { %776 = vmax.xlane.f32.xlu1 %v775_v3 }
 0x362   : > { %v773_v4 = vpop.f32.mrf.mxu3 }
 0x375   : > { %864 = vrot.lane.b32.xlu1 %v1725_v11, %s1557_s28 }
 0x3b1   : > { %v747_v8 = vpop.f32.mrf.mxu2 }
 0x3b2   : > { %v751_v9 = vadd.f32 %v747_v8, %v673_v7 }
 0x3b9   : > { %v749_v10 = vpop.f32.mrf.mxu2 }
 0x3c1   : > { %v848_v12 = vpop.f32.mrf.mxu2 }
 0x3c2   : > { %v852_v13 = vsel %vm595_vm1, %v848_v12, -inf }
 0x3c3   : > { %853 = vmax.xlane.f32.xlu2 %v852_v13  ;;  %v1271_v13 = vld [vmem:[#allocation10] ss:$0 sm:$0xff] }
 0x3c9   : > { %v850_v14 = vpop.f32.mrf.mxu2 }
 0x3cf   : > { %v777_v15 = vpop.xlane.xlu1 %776 }
 0x3d0   : > { %v778_v16 = vsub.f32 %v771_v2, %v777_v15  ;;  %v1272_v15 = vld [vmem:[#allocation12] ss:$0 sm:$0xff] }
 0x3d2   : > { %v779_v17 = vmul.f32 1.442695, %v778_v16 }
 0x3d4   : > { %1281 = vpow2.f32 %v779_v17 }
 0x3da   : > { %v1282_v18 = vpop.eup %1281 }
 0x3db   : > { %v781_v19 = vsel %vm595_vm1, %v1282_v18, 0.0 }
 0x3dc   : > { %782 = vadd.xlane.f32.xlu2 %v781_v19 }
 0x3e7   : > { %v865_v20 = vpop.permute.xlu1 %864 }
 0x3e8   : > { %v870_v21 = vsel %vm633_vm2, %v865_v20, 0 }
 0x3e9   : > { %879 = vmatpush.bf16.msrb.mxu3 %v870_v21 }
 0x3f4   : > { %787 = vrot.lane.b32.xlu2 %v1725_v11, %s1558_s11 }
 0x436   : > { %v854_v22 = vpop.xlane.xlu2 %853 }
 0x437   : > { %v855_v23 = vsub.f32 %v848_v12, %v854_v22 }
 0x439   : > { %v856_v24 = vmul.f32 1.442695, %v855_v23 }
 0x43b   : > { %1283 = vpow2.f32 %v856_v24 }
 0x441   : > { %v1284_v25 = vpop.eup %1283 }
 0x442   : > { %v858_v26 = vsel %vm595_vm1, %v1284_v25, 0.0 }
 0x443   : > { %859 = vadd.xlane.f32.xlu0 %v858_v26 }
 0x44f   : > { %v783_v27 = vpop.xlane.xlu2 %782 }
 0x450   : > { %1285 = vrcp.f32 %v783_v27 }
 0x456   : > { %v1286_v28 = vpop.eup %1285 }
 0x457   : > { %v785_v29 = vmul.f32 %v1286_v28, %v1282_v18  ;;  %v788_v30 = vpop.permute.xlu2 %787 }
 0x458   : > { %v793_v31 = vsel %vm633_vm2, %v788_v30, 0 }
 0x459   : > { %v786_v32 = vpack.c.bf16 %v785_v29, %v785_v29  ;;  %802 = vmatpush.bf16.msra.mxu0 %v793_v31 }
 0x45c   : > { %1152 = vmatmul.msk.bf16.vlgmr.msra.gmra.mxu0 %vm595_vm1, %v786_v32 }
 0x45d   : > { %899 = vmatpush.bf16.msrb.mxu0 %v890_v39 }
 0x4b6   : > { %v860_v11 = vpop.xlane.xlu0 %859 }
 0x4b7   : > { %1287 = vrcp.f32 %v860_v11 }
 0x4b8   : > { %1289 = vrcp.f32 %v1559_v55 }
 0x4bd   : > { %v1288_v35 = vpop.eup %1287 }
 0x4be   : > { %v862_v36 = vmul.f32 %v1288_v35, %v1284_v25  ;;  %v1290_v56 = vpop.eup %1289 }
 0x4bf   : > { %v913_v57 = vmul.f32 32.0, %v1290_v56  ;;  %vm917_vm3 = vweird.f32 %v1290_v56 }
 0x4c0   : > { %v863_v37 = vpack.c.bf16 %v862_v36, %v862_v36 }
 0x4c1   : > { %v914_v58 = vsub.f32 1.0, %v913_v57 }
 0x4c2   : > { %1155 = vmatmul.msk.bf16.vlgmr.msrb.gmra.mxu3 %vm595_vm1, %v863_v37 }
 0x4c3   : > { %v915_v59 = vmul.f32 %v1290_v56, %v914_v58 }
 0x4c5   : > { %v916_v60 = vadd.f32 %v1290_v56, %v915_v59 }
 0x4c7   : > { %v918_v61 = vsel %vm917_vm3, %v1290_v56, %v916_v60 }
 0x4d9   : > { %v804_v40 = vpop.f32.mrf.mxu0 }
 0x4da   : > { %v808_v41 = vpack.c.bf16 %v804_v40, %v804_v40 }
 0x4dc   : > { %1153 = vmatmul.msk.bf16.vlgmr.msra.gmra.mxu1 %vm595_vm1, %v808_v41 }
 0x4e1   : > { %v806_v42 = vpop.f32.mrf.mxu0 }
 0x545   : > { %v881_v43 = vpop.f32.mrf.mxu3 }
 0x546   : > { %v885_v44 = vpack.c.bf16 %v881_v43, %v881_v43 }
 0x548   : > { %1156 = vmatmul.msk.bf16.vlgmr.msrb.gmra.mxu0 %vm595_vm1, %v885_v44 }
 0x54d   : > { %v883_v45 = vpop.f32.mrf.mxu3 }
 0x559   : > { %v824_v46 = vpop.f32.mrf.mxu1 }
 0x55a   : > { %v828_v47 = vadd.f32 %v824_v46, %v751_v9 }
 0x561   : > { %v826_v48 = vpop.f32.mrf.mxu1 }
 0x5c5   : > { %v901_v50 = vpop.f32.mrf.mxu0 }
 0x5c6   : > { %v905_v51 = vadd.f32 %v901_v50, %v828_v47 }
 0x5c8   : > { %v908_v52 = vadd.f32 %v905_v51, %v513_v49 }
 0x5ca   : > { %v909_v53 = vsel %vm535_vm0, %v908_v52, 0.0 }
 0x5cb   : > { %910 = vadd.xlane.f32.xlu0 %v909_v53 }
 0x5cd   : > { %v903_v54 = vpop.f32.mrf.mxu0 }
 0x63e   : > { %v911_v62 = vpop.xlane.xlu0 %910 }
 0x63f   : > { %v919_v63 = vmul.f32 %v918_v61, %v911_v62 }
 0x641   : > { %v920_v0 = vsub.f32 %v908_v52, %v919_v63 }
 0x643   : > { %v921_v5 = vmul.f32 %v920_v0, %v920_v0 }
 0x645   : > { %v922_v1 = vsel %vm535_vm0, %v921_v5, 0.0 }
 0x646   : > { %923 = vadd.xlane.f32.xlu0 %v922_v1 }
 0x6b9   : > { %v924_v2 = vpop.xlane.xlu0 %923 }
 0x6ba   : > { %v925_v3 = vmul.f32 %v924_v2, %v918_v61 }
 0x6bc   : > { %v926_v4 = vadd.f32 1e-05, %v925_v3 }
 0x6be   : > { %1291 = vrsqrt.f32 %v926_v4  ;;  %vm933_vm5 = vweird.f32 %v926_v4 }
 0x6c4   : > { %v1292_v6 = vpop.eup %1291 }
 0x6c5   : > { %v928_v7 = vmul.f32 %v1292_v6, %v926_v4  ;;  %vm934_vm4 = vweird.f32 %v1292_v6 }
 0x6c6   : > { %vm935_vm6 = vmor %vm933_vm5, %vm934_vm4 }
 0x6c7   : > { %v929_v8 = vmul.f32 %v1292_v6, %v928_v7 }
 0x6c9   : > { %v930_v9 = vmul.f32 0.5, %v929_v8 }
 0x6cb   : > { %v931_v10 = vsub.f32 1.5, %v930_v9 }
 0x6cd   : > { %v932_v12 = vmul.f32 %v1292_v6, %v931_v10 }
 0x6cf   : > { %v936_v14 = vsel %vm935_vm6, %v1292_v6, %v932_v12 }
 0x6d0   : > { %v937_v16 = vmul.f32 %v936_v14, %v920_v0 }
 0x6d2   : > { %v941_v17 = vmul.f32 %v1271_v13, %v937_v16 }
 0x6d4   : > { %v945_v18 = vadd.f32 %v1272_v15, %v941_v17 }
 0x6d6   : > { %v946_v19 = vpack.c.bf16 %v945_v18, %v945_v18 }
 0x6d8   : > { %948 = vst.msk [vmem:[%s510_s18] sm:$0xf] %vm947_vm7, %v946_v19 }
 0x6d9 PF: > { %s24_s15 = sadd.s32 1, %s1541_s15   ;;  %s1803_s13 = smov %s1537_s14 }
 0x6da   : > { %p21_p8 = scmp.ge.s32.totalorder %s24_s15, 4   ;;  %s1804_s14 = smov %s1806_s23 }
 0x6dc   :  { %23 = sbr.rel (!%p21_p8) target bundleno = 8 (0x8), region = 122 }
 0x6e1   :  { %974 = vsyncpa [#allocation3], 1 }
 0x6e2   :  { %976 = vsyncpa [#allocation3 + $0x1], 1 }
 0x6e3   :  { %977 = vsyncpa [#allocation5], 1 }
 0x6e4   :  { %978 = vsyncpa [#allocation8], 1 }
 0x6e5   :  { %979 = vsyncpa [#allocation11], 1 }

</bundles_post_ra>
